<compile_context>
chip_gen: v7x
topology: tpu7x:2x2x1
jax: 0.10.0
libtpu: 0.0.40
codegen_flags: <defaults>
</compile_context>

<pallas_src>
import numpy as np
import jax
import jax.numpy as jnp
from jax.experimental import pallas as pl
from jax.experimental.pallas import tpu as pltpu

NUM_CAPSULES = 10
INPUT_DIM = 8
OUTPUT_DIM = 16
NUM_ITERATIONS = 3


def _round_up(x, m):
    return ((x + m - 1) // m) * m


def _routing_constants(n_in, d_in, d_out, n_caps, w, b):
    """Constant matrices (0/1 and 1/N) that let the MXU perform every broadcast
    and segment reduction of the routing loop on lane-dense packed arrays.

    Lane layouts used by the kernel:
      ut      lane = n*D + d              (N*D   = 128 lanes)
      logits  lane = n*C + c              (N*C   =  80 lanes, n-major)
      s / v   lane = c*D + d              (C*D   = 160 lanes, c-major == output)
      product lane = c*(N*D) + n*D + d    (C*N*D = 1280 lanes, capsule-tile major,
                                           so each capsule occupies one aligned
                                           128-lane tile == a copy of ut)
    """
    N, D, C = n_in, d_out, n_caps
    w = np.asarray(w, np.float32).reshape(d_in, d_out)
    b = np.asarray(b, np.float32).reshape(-1)

    # Fused Linear over a whole batch tile: block-diagonal weight + tiled bias.
    wb = np.kron(np.eye(N, dtype=np.float32), w)          # (N*Din, N*D)
    bb = np.tile(b.reshape(1, D), (1, N))                  # (1, N*D)

    nn, cc, dd = np.meshgrid(np.arange(N), np.arange(C), np.arange(D),
                             indexing="ij")
    nn, cc, dd = nn.ravel(), cc.ravel(), dd.ravel()
    lane_u = nn * D + dd
    lane_b = nn * C + cc
    lane_s = cc * D + dd
    lane_p = cc * (N * D) + nn * D + dd

    def scat(rows, cols, shape, val=1.0):
        m = np.zeros(shape, np.float32)
        m[rows, cols] = val
        return m

    avg  = scat(lane_u, lane_s, (N * D, C * D), 1.0 / N)   # iter-0: softmax(0) == 1/N
    eb   = scat(lane_b, lane_p, (N * C, C * N * D))        # bcast e over d -> product layout
    rs   = scat(lane_p, lane_s, (C * N * D, C * D))        # sum over n     -> s
    sd   = scat(lane_b, cc,     (N * C, C))                # softmax denominator (sum over n)
    ed   = scat(cc, lane_s,     (C, C * D))                # bcast 1/den over d
    rd   = scat(lane_s, dd,     (C * D, D))                # sum over c (squash ||s||^2)
    edup = scat(dd, lane_s,     (D, C * D))                # bcast squash scale over c
    ev   = scat(lane_s, lane_p, (C * D, C * N * D))        # bcast v over n -> product layout
    rb   = scat(lane_p, lane_b, (C * N * D, N * C))        # sum over d     -> logit update
    return [wb, bb, avg, eb, rs, sd, ed, rd, edup, ev, rb]


def digicaps_kernel(u_ref, wb_ref, bb_ref, avg_ref, eb_ref, rs_ref, sd_ref,
                    ed_ref, rd_ref, edup_ref, ev_ref, rb_ref, out_ref):
    # u_ref:   (TB, N*D_in)    batch tile, input capsules flattened into lanes
    # wb/bb:   fused Linear (block-diagonal weight, tiled bias)
    # avg..rb: constant routing matrices (see _routing_constants)
    # out_ref: (TB, C*D_out)   lane-dense routed output, lane = c*D_out + d
    f32 = jnp.float32
    tb = u_ref.shape[0]
    n_caps = sd_ref.shape[1]
    n_in = sd_ref.shape[0] // n_caps

    def mm(a, m):
        return jnp.dot(a, m, preferred_element_type=f32)

    # ---- fused Linear: one MXU matmul for the whole batch tile, bias hoisted ----
    ut = mm(u_ref[...], wb_ref[...]) + bb_ref[...]                    # (TB, N*D)
    # ut replicated once per output capsule (loop-invariant).  Each copy is a
    # full 128-lane tile, so this is plain aligned vreg copies, no shuffles.
    ut_big = jnp.concatenate([ut] * n_caps, axis=-1)                  # (TB, C*N*D)

    bs = jnp.zeros((tb, n_in * n_caps), f32)                          # routing logits (packed)
    v = None
    for it in range(NUM_ITERATIONS):                                  # static unroll (3)
        if it == 0:
            # softmax(zeros) over n is exactly 1/N -> s is the per-d mean of ut,
            # identical for every capsule: a single constant matmul.
            s = mm(ut, avg_ref[...])                                  # (TB, C*D)
        else:
            # softmax over the input-capsule axis n, fully lane-dense:
            # per-row max is constant in n (softmax unchanged) -> 1 lane reduce;
            # the n-sum and all broadcasts run on the idle MXU.
            row_max = jnp.max(bs, axis=-1, keepdims=True)             # (TB, 1)
            e = jnp.exp(bs - row_max)                                 # (TB, N*C)
            den = mm(e, sd_ref[...])                                  # (TB, C)
            inv_den = mm(1.0 / den, ed_ref[...])                      # (TB, C*D) exact recip
            e_big = mm(e, eb_ref[...])                                # (TB, C*N*D)
            s = mm(ut_big * e_big, rs_ref[...]) * inv_den             # (TB, C*D)

        # ---- squash over the capsule axis c (per (b, d)) ----
        # v = s * norm / ((1+norm)(1+norm^2)); norm^2 via one MXU segment-sum.
        nsq = mm(s * s, rd_ref[...])                                  # (TB, D)
        norm = jnp.sqrt(nsq)
        scale = norm / ((1.0 + norm) * (1.0 + nsq))                   # (TB, D)
        v = s * mm(scale, edup_ref[...])                              # (TB, C*D)

        if it < NUM_ITERATIONS - 1:
            # b[n,c] += sum_d ut[n,d] * v[d,c] : broadcast over n and reduce over d
            # both handled by constant-matrix matmuls on the MXU.
            v_big = mm(v, ev_ref[...])                                # (TB, C*N*D)
            bs = bs + mm(ut_big * v_big, rb_ref[...])                 # (TB, N*C)

    # lane-dense store: lanes ordered c*D + d, i.e. already torch's v.transpose(2,1)
    out_ref[...] = v


def digicaps_forward(u, w, b, *, tb=512):
    B, n_in, d_in = u.shape
    d_out = w.shape[-1]
    n_caps = NUM_CAPSULES

    # Flatten input capsules into lanes: (B, N*D_in).  Pure layout plumbing.
    u2 = jnp.asarray(u, jnp.float32).reshape(B, n_in * d_in)

    # Batch tile: multiple of 8; keep >= 2 grid steps whenever B allows so the
    # "parallel" batch axis can shard across v7x's two TensorCores.
    half = _round_up(-(-B // 2), 8)            # ceil(B/2) rounded to sublanes
    tb_eff = max(8, min(tb, half))
    b_pad = _round_up(B, tb_eff)
    if b_pad != B:
        u2 = jnp.pad(u2, ((0, b_pad - B), (0, 0)))   # padded rows discarded below

    consts = [jnp.asarray(c) for c in
              _routing_constants(n_in, d_in, d_out, n_caps, w, b)]

    grid = (b_pad // tb_eff,)
    const_specs = [pl.BlockSpec(c.shape, lambda i: (0, 0)) for c in consts]

    out = pl.pallas_call(
        digicaps_kernel,
        out_shape=jax.ShapeDtypeStruct((b_pad, n_caps * d_out), jnp.float32),
        grid=grid,
        in_specs=[pl.BlockSpec((tb_eff, n_in * d_in), lambda i: (i, 0))]
                 + const_specs,
        out_specs=pl.BlockSpec((tb_eff, n_caps * d_out), lambda i: (i, 0)),
        compiler_params=pltpu.CompilerParams(
            dimension_semantics=("parallel",),
            vmem_limit_bytes=32 * 1024 * 1024,
        ),
    )(u2, *consts)

    # lanes are (c, d)-ordered, so this reshape == torch's v.transpose(2, 1)
    return out[:B].reshape(B, n_caps, d_out)


def digicaps_ref(u, w, b):
    """Pure-JAX reference reproducing the PyTorch forward."""
    ut = jnp.einsum("bnd,de->bne", u, w) + b.reshape(1, 1, -1)        # Linear
    B, N, _ = ut.shape
    bs = jnp.zeros((B, N, NUM_CAPSULES), dtype=jnp.float32)
    v = None
    for i in range(NUM_ITERATIONS):
        cs = jax.nn.softmax(bs, axis=1)
        s = jnp.einsum("bnd,bnc->bdc", ut, cs)
        norm = jnp.linalg.norm(s, axis=-1, keepdims=True)
        scaling = (norm**2 / (1.0 + norm)) / (1.0 + norm**2)
        v = scaling * (s / norm)
        if i < NUM_ITERATIONS - 1:
            bs = bs + jnp.einsum("bnd,bdc->bnc", ut, v)
    return jnp.transpose(v, (0, 2, 1))


if __name__ == "__main__":
    key = jax.random.PRNGKey(0)
    k_u, k_w, k_b = jax.random.split(key, 3)

    B, N = 2, 8                                   # small shapes: batch=2, 8 input capsules
    u = jax.random.normal(k_u, (B, N, INPUT_DIM), dtype=jnp.float32)

    # Deterministic Linear(8 -> 16) params (PyTorch-style uniform(-1/sqrt(in), 1/sqrt(in)))
    bound = 1.0 / (INPUT_DIM ** 0.5)
    w = jax.random.uniform(k_w, (INPUT_DIM, OUTPUT_DIM),
                           minval=-bound, maxval=bound, dtype=jnp.float32)
    b = jax.random.uniform(k_b, (1, OUTPUT_DIM),
                           minval=-bound, maxval=bound, dtype=jnp.float32)

    out = digicaps_forward(u, w, b)
    jax.block_until_ready(out)

    ref = digicaps_ref(u, w, b)
    assert out.shape == (B, NUM_CAPSULES, OUTPUT_DIM), out.shape
    # Exact reciprocals everywhere now -> differences are only f32 summation-order
    # noise, so the tolerance is an order of magnitude tighter than before.
    assert jnp.allclose(out, ref, atol=5e-4, rtol=5e-4), "mismatch vs reference"

    print("KERNEL_OK")
</pallas_src>

<mosaic_0001>
module attributes {stable_mosaic.version = 11 : i64} {
  func.func @digicaps_kernel(%arg0: i32, %arg1: memref<8x64xf32, #tpu.memory_space<vmem>>, %arg2: memref<64x128xf32, #tpu.memory_space<vmem>>, %arg3: memref<1x128xf32, #tpu.memory_space<vmem>>, %arg4: memref<128x160xf32, #tpu.memory_space<vmem>>, %arg5: memref<80x1280xf32, #tpu.memory_space<vmem>>, %arg6: memref<1280x160xf32, #tpu.memory_space<vmem>>, %arg7: memref<80x10xf32, #tpu.memory_space<vmem>>, %arg8: memref<10x160xf32, #tpu.memory_space<vmem>>, %arg9: memref<160x16xf32, #tpu.memory_space<vmem>>, %arg10: memref<16x160xf32, #tpu.memory_space<vmem>>, %arg11: memref<160x1280xf32, #tpu.memory_space<vmem>>, %arg12: memref<1280x80xf32, #tpu.memory_space<vmem>>, %arg13: memref<8x160xf32, #tpu.memory_space<vmem>>) attributes {dimension_semantics = [#tpu.dimension_semantics<parallel>], iteration_bounds = array<i64: 1>, scalar_prefetch = 0 : i64, scratch_operands = 0 : i64, tpu.core_type = #tpu.core_type<tc>, window_params = [{transform_indices = @transform_0, window_bounds = array<i64: 8, 64>}, {pipeline_mode = #tpu.pipeline_mode<synchronous>, transform_indices = @transform_1, window_bounds = array<i64: 64, 128>}, {pipeline_mode = #tpu.pipeline_mode<synchronous>, transform_indices = @transform_2, window_bounds = array<i64: 1, 128>}, {pipeline_mode = #tpu.pipeline_mode<synchronous>, transform_indices = @transform_3, window_bounds = array<i64: 128, 160>}, {pipeline_mode = #tpu.pipeline_mode<synchronous>, transform_indices = @transform_4, window_bounds = array<i64: 80, 1280>}, {pipeline_mode = #tpu.pipeline_mode<synchronous>, transform_indices = @transform_5, window_bounds = array<i64: 1280, 160>}, {pipeline_mode = #tpu.pipeline_mode<synchronous>, transform_indices = @transform_6, window_bounds = array<i64: 80, 10>}, {pipeline_mode = #tpu.pipeline_mode<synchronous>, transform_indices = @transform_7, window_bounds = array<i64: 10, 160>}, {pipeline_mode = #tpu.pipeline_mode<synchronous>, transform_indices = @transform_8, window_bounds = array<i64: 160, 16>}, {pipeline_mode = #tpu.pipeline_mode<synchronous>, transform_indices = @transform_9, window_bounds = array<i64: 16, 160>}, {pipeline_mode = #tpu.pipeline_mode<synchronous>, transform_indices = @transform_10, window_bounds = array<i64: 160, 1280>}, {pipeline_mode = #tpu.pipeline_mode<synchronous>, transform_indices = @transform_11, window_bounds = array<i64: 1280, 80>}, {transform_indices = @transform_12, window_bounds = array<i64: 8, 160>}]} {
    %c0 = arith.constant 0 : index
    %c0_0 = arith.constant 0 : index
    %0 = vector.load %arg1[%c0, %c0_0] : memref<8x64xf32, #tpu.memory_space<vmem>>, vector<8x64xf32>
    %c0_1 = arith.constant 0 : index
    %c0_2 = arith.constant 0 : index
    %1 = vector.load %arg2[%c0_1, %c0_2] : memref<64x128xf32, #tpu.memory_space<vmem>>, vector<64x128xf32>
    %cst = arith.constant dense<0.000000e+00> : vector<8x128xf32>
    %2 = tpu.matmul %0, %1, %cst {dimension_numbers = #tpu.dot_dimension_numbers<[1], [0], [0], [1], [0, 0, 1, 1], [], []>} : vector<8x64xf32>, vector<64x128xf32>, vector<8x128xf32> -> vector<8x128xf32>
    %c0_3 = arith.constant 0 : index
    %c0_4 = arith.constant 0 : index
    %3 = vector.load %arg3[%c0_3, %c0_4] : memref<1x128xf32, #tpu.memory_space<vmem>>, vector<1x128xf32>
    %4 = vector.broadcast %3 : vector<1x128xf32> to vector<8x128xf32>
    %5 = arith.addf %2, %4 : vector<8x128xf32>
    %6 = tpu.concatenate %5, %5, %5, %5, %5, %5, %5, %5, %5, %5 in 1 : vector<8x128xf32>, vector<8x128xf32>, vector<8x128xf32>, vector<8x128xf32>, vector<8x128xf32>, vector<8x128xf32>, vector<8x128xf32>, vector<8x128xf32>, vector<8x128xf32>, vector<8x128xf32> -> vector<8x1280xf32>
    %cst_5 = arith.constant 0.000000e+00 : f32
    %7 = vector.broadcast %cst_5 : f32 to vector<8x80xf32>
    %c0_6 = arith.constant 0 : index
    %c0_7 = arith.constant 0 : index
    %8 = vector.load %arg4[%c0_6, %c0_7] : memref<128x160xf32, #tpu.memory_space<vmem>>, vector<128x160xf32>
    %cst_8 = arith.constant dense<0.000000e+00> : vector<8x160xf32>
    %9 = tpu.matmul %5, %8, %cst_8 {dimension_numbers = #tpu.dot_dimension_numbers<[1], [0], [0], [1], [0, 0, 1, 1], [], []>} : vector<8x128xf32>, vector<128x160xf32>, vector<8x160xf32> -> vector<8x160xf32>
    %10 = arith.mulf %9, %9 : vector<8x160xf32>
    %c0_9 = arith.constant 0 : index
    %c0_10 = arith.constant 0 : index
    %11 = vector.load %arg9[%c0_9, %c0_10] : memref<160x16xf32, #tpu.memory_space<vmem>>, vector<160x16xf32>
    %cst_11 = arith.constant dense<0.000000e+00> : vector<8x16xf32>
    %12 = tpu.matmul %10, %11, %cst_11 {dimension_numbers = #tpu.dot_dimension_numbers<[1], [0], [0], [1], [0, 0, 1, 1], [], []>} : vector<8x160xf32>, vector<160x16xf32>, vector<8x16xf32> -> vector<8x16xf32>
    %13 = math.sqrt %12 : vector<8x16xf32>
    %cst_12 = arith.constant 1.000000e+00 : f32
    %14 = vector.broadcast %cst_12 : f32 to vector<8x16xf32>
    %15 = arith.addf %14, %13 : vector<8x16xf32>
    %cst_13 = arith.constant 1.000000e+00 : f32
    %16 = vector.broadcast %cst_13 : f32 to vector<8x16xf32>
    %17 = arith.addf %16, %12 : vector<8x16xf32>
    %18 = arith.mulf %15, %17 : vector<8x16xf32>
    %19 = arith.divf %13, %18 : vector<8x16xf32>
    %c0_14 = arith.constant 0 : index
    %c0_15 = arith.constant 0 : index
    %20 = vector.load %arg10[%c0_14, %c0_15] : memref<16x160xf32, #tpu.memory_space<vmem>>, vector<16x160xf32>
    %cst_16 = arith.constant dense<0.000000e+00> : vector<8x160xf32>
    %21 = tpu.matmul %19, %20, %cst_16 {dimension_numbers = #tpu.dot_dimension_numbers<[1], [0], [0], [1], [0, 0, 1, 1], [], []>} : vector<8x16xf32>, vector<16x160xf32>, vector<8x160xf32> -> vector<8x160xf32>
    %22 = arith.mulf %9, %21 : vector<8x160xf32>
    %c0_17 = arith.constant 0 : index
    %c0_18 = arith.constant 0 : index
    %23 = vector.load %arg11[%c0_17, %c0_18] : memref<160x1280xf32, #tpu.memory_space<vmem>>, vector<160x1280xf32>
    %cst_19 = arith.constant dense<0.000000e+00> : vector<8x1280xf32>
    %24 = tpu.matmul %22, %23, %cst_19 {dimension_numbers = #tpu.dot_dimension_numbers<[1], [0], [0], [1], [0, 0, 1, 1], [], []>} : vector<8x160xf32>, vector<160x1280xf32>, vector<8x1280xf32> -> vector<8x1280xf32>
    %25 = arith.mulf %6, %24 : vector<8x1280xf32>
    %c0_20 = arith.constant 0 : index
    %c0_21 = arith.constant 0 : index
    %26 = vector.load %arg12[%c0_20, %c0_21] : memref<1280x80xf32, #tpu.memory_space<vmem>>, vector<1280x80xf32>
    %cst_22 = arith.constant dense<0.000000e+00> : vector<8x80xf32>
    %27 = tpu.matmul %25, %26, %cst_22 {dimension_numbers = #tpu.dot_dimension_numbers<[1], [0], [0], [1], [0, 0, 1, 1], [], []>} : vector<8x1280xf32>, vector<1280x80xf32>, vector<8x80xf32> -> vector<8x80xf32>
    %28 = arith.addf %7, %27 : vector<8x80xf32>
    %cst_23 = arith.constant dense<0xFF800000> : vector<8xf32>
    %29 = vector.multi_reduction <maximumf>, %28, %cst_23 [1] : vector<8x80xf32> to vector<8xf32>
    %30 = vector.shape_cast %29 : vector<8xf32> to vector<8x1xf32>
    %31 = vector.broadcast %30 : vector<8x1xf32> to vector<8x80xf32>
    %32 = arith.subf %28, %31 : vector<8x80xf32>
    %33 = math.exp %32 : vector<8x80xf32>
    %c0_24 = arith.constant 0 : index
    %c0_25 = arith.constant 0 : index
    %34 = vector.load %arg7[%c0_24, %c0_25] : memref<80x10xf32, #tpu.memory_space<vmem>>, vector<80x10xf32>
    %cst_26 = arith.constant dense<0.000000e+00> : vector<8x10xf32>
    %35 = tpu.matmul %33, %34, %cst_26 {dimension_numbers = #tpu.dot_dimension_numbers<[1], [0], [0], [1], [0, 0, 1, 1], [], []>} : vector<8x80xf32>, vector<80x10xf32>, vector<8x10xf32> -> vector<8x10xf32>
    %cst_27 = arith.constant 1.000000e+00 : f32
    %36 = vector.broadcast %cst_27 : f32 to vector<8x10xf32>
    %37 = arith.divf %36, %35 : vector<8x10xf32>
    %c0_28 = arith.constant 0 : index
    %c0_29 = arith.constant 0 : index
    %38 = vector.load %arg8[%c0_28, %c0_29] : memref<10x160xf32, #tpu.memory_space<vmem>>, vector<10x160xf32>
    %cst_30 = arith.constant dense<0.000000e+00> : vector<8x160xf32>
    %39 = tpu.matmul %37, %38, %cst_30 {dimension_numbers = #tpu.dot_dimension_numbers<[1], [0], [0], [1], [0, 0, 1, 1], [], []>} : vector<8x10xf32>, vector<10x160xf32>, vector<8x160xf32> -> vector<8x160xf32>
    %c0_31 = arith.constant 0 : index
    %c0_32 = arith.constant 0 : index
    %40 = vector.load %arg5[%c0_31, %c0_32] : memref<80x1280xf32, #tpu.memory_space<vmem>>, vector<80x1280xf32>
    %cst_33 = arith.constant dense<0.000000e+00> : vector<8x1280xf32>
    %41 = tpu.matmul %33, %40, %cst_33 {dimension_numbers = #tpu.dot_dimension_numbers<[1], [0], [0], [1], [0, 0, 1, 1], [], []>} : vector<8x80xf32>, vector<80x1280xf32>, vector<8x1280xf32> -> vector<8x1280xf32>
    %42 = arith.mulf %6, %41 : vector<8x1280xf32>
    %c0_34 = arith.constant 0 : index
    %c0_35 = arith.constant 0 : index
    %43 = vector.load %arg6[%c0_34, %c0_35] : memref<1280x160xf32, #tpu.memory_space<vmem>>, vector<1280x160xf32>
    %cst_36 = arith.constant dense<0.000000e+00> : vector<8x160xf32>
    %44 = tpu.matmul %42, %43, %cst_36 {dimension_numbers = #tpu.dot_dimension_numbers<[1], [0], [0], [1], [0, 0, 1, 1], [], []>} : vector<8x1280xf32>, vector<1280x160xf32>, vector<8x160xf32> -> vector<8x160xf32>
    %45 = arith.mulf %44, %39 : vector<8x160xf32>
    %46 = arith.mulf %45, %45 : vector<8x160xf32>
    %c0_37 = arith.constant 0 : index
    %c0_38 = arith.constant 0 : index
    %47 = vector.load %arg9[%c0_37, %c0_38] : memref<160x16xf32, #tpu.memory_space<vmem>>, vector<160x16xf32>
    %cst_39 = arith.constant dense<0.000000e+00> : vector<8x16xf32>
    %48 = tpu.matmul %46, %47, %cst_39 {dimension_numbers = #tpu.dot_dimension_numbers<[1], [0], [0], [1], [0, 0, 1, 1], [], []>} : vector<8x160xf32>, vector<160x16xf32>, vector<8x16xf32> -> vector<8x16xf32>
    %49 = math.sqrt %48 : vector<8x16xf32>
    %cst_40 = arith.constant 1.000000e+00 : f32
    %50 = vector.broadcast %cst_40 : f32 to vector<8x16xf32>
    %51 = arith.addf %50, %49 : vector<8x16xf32>
    %cst_41 = arith.constant 1.000000e+00 : f32
    %52 = vector.broadcast %cst_41 : f32 to vector<8x16xf32>
    %53 = arith.addf %52, %48 : vector<8x16xf32>
    %54 = arith.mulf %51, %53 : vector<8x16xf32>
    %55 = arith.divf %49, %54 : vector<8x16xf32>
    %c0_42 = arith.constant 0 : index
    %c0_43 = arith.constant 0 : index
    %56 = vector.load %arg10[%c0_42, %c0_43] : memref<16x160xf32, #tpu.memory_space<vmem>>, vector<16x160xf32>
    %cst_44 = arith.constant dense<0.000000e+00> : vector<8x160xf32>
    %57 = tpu.matmul %55, %56, %cst_44 {dimension_numbers = #tpu.dot_dimension_numbers<[1], [0], [0], [1], [0, 0, 1, 1], [], []>} : vector<8x16xf32>, vector<16x160xf32>, vector<8x160xf32> -> vector<8x160xf32>
    %58 = arith.mulf %45, %57 : vector<8x160xf32>
    %c0_45 = arith.constant 0 : index
    %c0_46 = arith.constant 0 : index
    %59 = vector.load %arg11[%c0_45, %c0_46] : memref<160x1280xf32, #tpu.memory_space<vmem>>, vector<160x1280xf32>
    %cst_47 = arith.constant dense<0.000000e+00> : vector<8x1280xf32>
    %60 = tpu.matmul %58, %59, %cst_47 {dimension_numbers = #tpu.dot_dimension_numbers<[1], [0], [0], [1], [0, 0, 1, 1], [], []>} : vector<8x160xf32>, vector<160x1280xf32>, vector<8x1280xf32> -> vector<8x1280xf32>
    %61 = arith.mulf %6, %60 : vector<8x1280xf32>
    %c0_48 = arith.constant 0 : index
    %c0_49 = arith.constant 0 : index
    %62 = vector.load %arg12[%c0_48, %c0_49] : memref<1280x80xf32, #tpu.memory_space<vmem>>, vector<1280x80xf32>
    %cst_50 = arith.constant dense<0.000000e+00> : vector<8x80xf32>
    %63 = tpu.matmul %61, %62, %cst_50 {dimension_numbers = #tpu.dot_dimension_numbers<[1], [0], [0], [1], [0, 0, 1, 1], [], []>} : vector<8x1280xf32>, vector<1280x80xf32>, vector<8x80xf32> -> vector<8x80xf32>
    %64 = arith.addf %28, %63 : vector<8x80xf32>
    %cst_51 = arith.constant dense<0xFF800000> : vector<8xf32>
    %65 = vector.multi_reduction <maximumf>, %64, %cst_51 [1] : vector<8x80xf32> to vector<8xf32>
    %66 = vector.shape_cast %65 : vector<8xf32> to vector<8x1xf32>
    %67 = vector.broadcast %66 : vector<8x1xf32> to vector<8x80xf32>
    %68 = arith.subf %64, %67 : vector<8x80xf32>
    %69 = math.exp %68 : vector<8x80xf32>
    %c0_52 = arith.constant 0 : index
    %c0_53 = arith.constant 0 : index
    %70 = vector.load %arg7[%c0_52, %c0_53] : memref<80x10xf32, #tpu.memory_space<vmem>>, vector<80x10xf32>
    %cst_54 = arith.constant dense<0.000000e+00> : vector<8x10xf32>
    %71 = tpu.matmul %69, %70, %cst_54 {dimension_numbers = #tpu.dot_dimension_numbers<[1], [0], [0], [1], [0, 0, 1, 1], [], []>} : vector<8x80xf32>, vector<80x10xf32>, vector<8x10xf32> -> vector<8x10xf32>
    %cst_55 = arith.constant 1.000000e+00 : f32
    %72 = vector.broadcast %cst_55 : f32 to vector<8x10xf32>
    %73 = arith.divf %72, %71 : vector<8x10xf32>
    %c0_56 = arith.constant 0 : index
    %c0_57 = arith.constant 0 : index
    %74 = vector.load %arg8[%c0_56, %c0_57] : memref<10x160xf32, #tpu.memory_space<vmem>>, vector<10x160xf32>
    %cst_58 = arith.constant dense<0.000000e+00> : vector<8x160xf32>
    %75 = tpu.matmul %73, %74, %cst_58 {dimension_numbers = #tpu.dot_dimension_numbers<[1], [0], [0], [1], [0, 0, 1, 1], [], []>} : vector<8x10xf32>, vector<10x160xf32>, vector<8x160xf32> -> vector<8x160xf32>
    %c0_59 = arith.constant 0 : index
    %c0_60 = arith.constant 0 : index
    %76 = vector.load %arg5[%c0_59, %c0_60] : memref<80x1280xf32, #tpu.memory_space<vmem>>, vector<80x1280xf32>
    %cst_61 = arith.constant dense<0.000000e+00> : vector<8x1280xf32>
    %77 = tpu.matmul %69, %76, %cst_61 {dimension_numbers = #tpu.dot_dimension_numbers<[1], [0], [0], [1], [0, 0, 1, 1], [], []>} : vector<8x80xf32>, vector<80x1280xf32>, vector<8x1280xf32> -> vector<8x1280xf32>
    %78 = arith.mulf %6, %77 : vector<8x1280xf32>
    %c0_62 = arith.constant 0 : index
    %c0_63 = arith.constant 0 : index
    %79 = vector.load %arg6[%c0_62, %c0_63] : memref<1280x160xf32, #tpu.memory_space<vmem>>, vector<1280x160xf32>
    %cst_64 = arith.constant dense<0.000000e+00> : vector<8x160xf32>
    %80 = tpu.matmul %78, %79, %cst_64 {dimension_numbers = #tpu.dot_dimension_numbers<[1], [0], [0], [1], [0, 0, 1, 1], [], []>} : vector<8x1280xf32>, vector<1280x160xf32>, vector<8x160xf32> -> vector<8x160xf32>
    %81 = arith.mulf %80, %75 : vector<8x160xf32>
    %82 = arith.mulf %81, %81 : vector<8x160xf32>
    %c0_65 = arith.constant 0 : index
    %c0_66 = arith.constant 0 : index
    %83 = vector.load %arg9[%c0_65, %c0_66] : memref<160x16xf32, #tpu.memory_space<vmem>>, vector<160x16xf32>
    %cst_67 = arith.constant dense<0.000000e+00> : vector<8x16xf32>
    %84 = tpu.matmul %82, %83, %cst_67 {dimension_numbers = #tpu.dot_dimension_numbers<[1], [0], [0], [1], [0, 0, 1, 1], [], []>} : vector<8x160xf32>, vector<160x16xf32>, vector<8x16xf32> -> vector<8x16xf32>
    %85 = math.sqrt %84 : vector<8x16xf32>
    %cst_68 = arith.constant 1.000000e+00 : f32
    %86 = vector.broadcast %cst_68 : f32 to vector<8x16xf32>
    %87 = arith.addf %86, %85 : vector<8x16xf32>
    %cst_69 = arith.constant 1.000000e+00 : f32
    %88 = vector.broadcast %cst_69 : f32 to vector<8x16xf32>
    %89 = arith.addf %88, %84 : vector<8x16xf32>
    %90 = arith.mulf %87, %89 : vector<8x16xf32>
    %91 = arith.divf %85, %90 : vector<8x16xf32>
    %c0_70 = arith.constant 0 : index
    %c0_71 = arith.constant 0 : index
    %92 = vector.load %arg10[%c0_70, %c0_71] : memref<16x160xf32, #tpu.memory_space<vmem>>, vector<16x160xf32>
    %cst_72 = arith.constant dense<0.000000e+00> : vector<8x160xf32>
    %93 = tpu.matmul %91, %92, %cst_72 {dimension_numbers = #tpu.dot_dimension_numbers<[1], [0], [0], [1], [0, 0, 1, 1], [], []>} : vector<8x16xf32>, vector<16x160xf32>, vector<8x160xf32> -> vector<8x160xf32>
    %94 = arith.mulf %81, %93 : vector<8x160xf32>
    %c0_73 = arith.constant 0 : index
    %c0_74 = arith.constant 0 : index
    %95 = vector.load %arg13[%c0_73, %c0_74] : memref<8x160xf32, #tpu.memory_space<vmem>>, vector<8x160xf32>
    tpu.vector_store %arg13[%c0_73, %c0_74], %94 {strides = array<i32>} : memref<8x160xf32, #tpu.memory_space<vmem>>, vector<8x160xf32>,
    return
  }
  func.func @transform_0(%arg0: i32) -> (i32, i32) {
    %c0_i32 = arith.constant 0 : i32
    %c0_i32_0 = arith.constant 0 : i32
    return %arg0, %c0_i32 : i32, i32
  }
  func.func @transform_1(%arg0: i32) -> (i32, i32) {
    %c0_i32 = arith.constant 0 : i32
    %c0_i32_0 = arith.constant 0 : i32
    %c0_i32_1 = arith.constant 0 : i32
    return %c0_i32, %c0_i32_0 : i32, i32
  }
  func.func @transform_2(%arg0: i32) -> (i32, i32) {
    %c0_i32 = arith.constant 0 : i32
    %c0_i32_0 = arith.constant 0 : i32
    %c0_i32_1 = arith.constant 0 : i32
    return %c0_i32, %c0_i32_0 : i32, i32
  }
  func.func @transform_3(%arg0: i32) -> (i32, i32) {
    %c0_i32 = arith.constant 0 : i32
    %c0_i32_0 = arith.constant 0 : i32
    %c0_i32_1 = arith.constant 0 : i32
    return %c0_i32, %c0_i32_0 : i32, i32
  }
  func.func @transform_4(%arg0: i32) -> (i32, i32) {
    %c0_i32 = arith.constant 0 : i32
    %c0_i32_0 = arith.constant 0 : i32
    %c0_i32_1 = arith.constant 0 : i32
    return %c0_i32, %c0_i32_0 : i32, i32
  }
  func.func @transform_5(%arg0: i32) -> (i32, i32) {
    %c0_i32 = arith.constant 0 : i32
    %c0_i32_0 = arith.constant 0 : i32
    %c0_i32_1 = arith.constant 0 : i32
    return %c0_i32, %c0_i32_0 : i32, i32
  }
  func.func @transform_6(%arg0: i32) -> (i32, i32) {
    %c0_i32 = arith.constant 0 : i32
    %c0_i32_0 = arith.constant 0 : i32
    %c0_i32_1 = arith.constant 0 : i32
    return %c0_i32, %c0_i32_0 : i32, i32
  }
  func.func @transform_7(%arg0: i32) -> (i32, i32) {
    %c0_i32 = arith.constant 0 : i32
    %c0_i32_0 = arith.constant 0 : i32
    %c0_i32_1 = arith.constant 0 : i32
    return %c0_i32, %c0_i32_0 : i32, i32
  }
  func.func @transform_8(%arg0: i32) -> (i32, i32) {
    %c0_i32 = arith.constant 0 : i32
    %c0_i32_0 = arith.constant 0 : i32
    %c0_i32_1 = arith.constant 0 : i32
    return %c0_i32, %c0_i32_0 : i32, i32
  }
  func.func @transform_9(%arg0: i32) -> (i32, i32) {
    %c0_i32 = arith.constant 0 : i32
    %c0_i32_0 = arith.constant 0 : i32
    %c0_i32_1 = arith.constant 0 : i32
    return %c0_i32, %c0_i32_0 : i32, i32
  }
  func.func @transform_10(%arg0: i32) -> (i32, i32) {
    %c0_i32 = arith.constant 0 : i32
    %c0_i32_0 = arith.constant 0 : i32
    %c0_i32_1 = arith.constant 0 : i32
    return %c0_i32, %c0_i32_0 : i32, i32
  }
  func.func @transform_11(%arg0: i32) -> (i32, i32) {
    %c0_i32 = arith.constant 0 : i32
    %c0_i32_0 = arith.constant 0 : i32
    %c0_i32_1 = arith.constant 0 : i32
    return %c0_i32, %c0_i32_0 : i32, i32
  }
  func.func @transform_12(%arg0: i32) -> (i32, i32) {
    %c0_i32 = arith.constant 0 : i32
    %c0_i32_0 = arith.constant 0 : i32
    return %arg0, %c0_i32 : i32, i32
  }
}

</mosaic_0001>

<bundles_post_ra>
// kernel: tpu_custom_call.1
= control target key start
LH: loop header
LB: loop body
LE: loop exit
PB: predicated region body
PF: predicated region fallthrough
CT: control target
= control target key end

     0   :  { %v11644_v3 = vmov 0.0|0.0   ;;  %vm7056_vm0 = vmmov 0   ;;  %v11642_v6 = vmov 0.0   ;;  %s11629_s0 = inlined_call_operand.vmem [shape: f32[8,64], index: 0, kind: input, shape index: {}]   ;;  %s11630_s1 = inlined_call_operand.vmem [shape: f32[64,128], index: 1, kind: input, shape index: {}]   ;;  %s11631_s2 = inlined_call_operand.vmem [shape: f32[1,128], index: 2, kind: input, shape index: {}]   ;;  %s11632_s3 = inlined_call_operand.vmem [shape: f32[128,160], index: 3, kind: input, shape index: {}]   ;;  %s11633_s4 = inlined_call_operand.vmem [shape: f32[80,1280], index: 4, kind: input, shape index: {}]   ;;  %s11634_s5 = inlined_call_operand.vmem [shape: f32[1280,160], index: 5, kind: input, shape index: {}]   ;;  %s11635_s6 = inlined_call_operand.vmem [shape: f32[80,10], index: 6, kind: input, shape index: {}]   ;;  %s11636_s7 = inlined_call_operand.vmem [shape: f32[10,160], index: 7, kind: input, shape index: {}]   ;;  %s11637_s8 = inlined_call_operand.vmem [shape: f32[160,16], index: 8, kind: input, shape index: {}]   ;;  %s11638_s9 = inlined_call_operand.vmem [shape: f32[16,160], index: 9, kind: input, shape index: {}]   ;;  %s11639_s10 = inlined_call_operand.vmem [shape: f32[160,1280], index: 10, kind: input, shape index: {}]   ;;  %s11640_s11 = inlined_call_operand.vmem [shape: f32[1280,80], index: 11, kind: input, shape index: {}]   ;;  %s11641_s12 = inlined_call_operand.hbm [shape: f32[8,160], index: 12, kind: output, shape index: {}]  }
   0x1   :  { %v43_v0 = vld [vmem:[%s11630_s1] sm:$0xff]  ;;  %v44_v1 = vld [vmem:[%s11630_s1 + $0x8] sm:$0xff]  ;;  %v45_v2 = vld [vmem:[%s11630_s1 + $0x10] sm:$0xff]  ;;  %5242 = vmatprep.subr.bf16.mxu0 %v11644_v3  ;;  %5193 = vmatprep.mubr.msk.f32.mxu0 %vm7056_vm0, %v11642_v6 }
   0x2   :  { %v5243_v4 = vpack.c.bf16 %v44_v1, %v43_v0  ;;  %v46_v5 = vld [vmem:[%s11630_s1 + $0x18] sm:$0xff]  ;;  %v47_v7 = vld [vmem:[%s11630_s1 + $0x20] sm:$0xff]  ;;  %v48_v8 = vld [vmem:[%s11630_s1 + $0x28] sm:$0xff]  ;;  %228 = vmatprep.mubr.f32.mxu1 %v11642_v6 }
   0x3   :  { %v5246_v9 = vpack.c.bf16 %v46_v5, %v45_v2  ;;  %v133_v10 = vld [vmem:[%s11632_s3 + $0x8] sm:$0xff]  ;;  %v135_v11 = vld [vmem:[%s11632_s3 + $0x18] sm:$0xff]  ;;  %v132_v12 = vld [vmem:[%s11632_s3] sm:$0xff]  ;;  %v5249_v23 = vpack.c.bf16 %v48_v8, %v47_v7 }
   0x4   :  { %5244 = vmatpush3.bf16.msra.mxu0 %v5243_v4  ;;  %v5254_v13 = vpack.c.bf16 %v135_v11, %v133_v10  ;;  %v134_v14 = vld [vmem:[%s11632_s3 + $0x10] sm:$0xff]  ;;  %v137_v15 = vld [vmem:[%s11632_s3 + $0x28] sm:$0xff]  ;;  %v139_v16 = vld [vmem:[%s11632_s3 + $0x38] sm:$0xff] }
   0x5   :  { %5245 = vmatprep.subr.bf16.mxu0 %v11644_v3  ;;  %v5256_v17 = vpack.c.bf16 %v134_v14, %v132_v12  ;;  %v5258_v18 = vpack.c.bf16 %v139_v16, %v137_v15  ;;  %v136_v19 = vld [vmem:[%s11632_s3 + $0x20] sm:$0xff]  ;;  %v138_v20 = vld [vmem:[%s11632_s3 + $0x30] sm:$0xff]  ;;  %v141_v21 = vld [vmem:[%s11632_s3 + $0x48] sm:$0xff] }
   0x6   :  { %5255 = vmatprep.subr.bf16.mxu1 %v5254_v13  ;;  %v143_v22 = vld [vmem:[%s11632_s3 + $0x58] sm:$0xff]  ;;  %v49_v24 = vld [vmem:[%s11630_s1 + $0x30] sm:$0xff]  ;;  %v5260_v25 = vpack.c.bf16 %v138_v20, %v136_v19  ;;  %v140_v28 = vld [vmem:[%s11632_s3 + $0x40] sm:$0xff] }
   0x7   :  { %5257 = vmatpush1.bf16.msra.mxu1 %v5256_v17  ;;  %v50_v26 = vld [vmem:[%s11630_s1 + $0x38] sm:$0xff]  ;;  %v5262_v27 = vpack.c.bf16 %v143_v22, %v141_v21  ;;  %v142_v29 = vld [vmem:[%s11632_s3 + $0x50] sm:$0xff]  ;;  %v145_v30 = vld [vmem:[%s11632_s3 + $0x68] sm:$0xff] }
   0x8   :  { %5247 = vmatpush3.bf16.msra.mxu0 %v5246_v9  ;;  %5259 = vmatprep.subr.bf16.mxu1 %v5258_v18  ;;  %v147_v31 = vld [vmem:[%s11632_s3 + $0x78] sm:$0xff]  ;;  %v5252_v32 = vpack.c.bf16 %v50_v26, %v49_v24  ;;  %v5264_v33 = vpack.c.bf16 %v142_v29, %v140_v28  ;;  %v144_v35 = vld [vmem:[%s11632_s3 + $0x60] sm:$0xff]  ;;  %v146_v36 = vld [vmem:[%s11632_s3 + $0x70] sm:$0xff] }
   0x9   :  { %5248 = vmatprep.subr.bf16.mxu0 %v11644_v3  ;;  %v5266_v34 = vpack.c.bf16 %v147_v31, %v145_v30  ;;  %v149_v37 = vld [vmem:[%s11632_s3 + $0x88] sm:$0xff]  ;;  %v151_v38 = vld [vmem:[%s11632_s3 + $0x98] sm:$0xff] }
   0xb   :  { %5261 = vmatpush1.bf16.msra.mxu1 %v5260_v25 }
   0xc   :  { %5250 = vmatpush3.bf16.msra.mxu0 %v5249_v23  ;;  %5263 = vmatprep.subr.bf16.mxu1 %v5262_v27 }
   0xd   :  { %5251 = vmatprep.subr.bf16.mxu0 %v11644_v3 }
   0xe   :  { %17 = vsyncpa [#allocation3], 0  ;;  %v42_v39 = vld [vmem:[%s11629_s0] sm:$0xff]  ;;  %vm58_vm1 = vcmask 523264   ;;  %v5268_v40 = vpack.c.bf16 %v146_v36, %v144_v35  ;;  %v5270_v41 = vpack.c.bf16 %v151_v38, %v149_v37  ;;  %v150_v43 = vld [vmem:[%s11632_s3 + $0x90] sm:$0xff]  ;;  %vm257_vm2 = vcmask 261120  }
   0xf   :  { %5265 = vmatpush1.bf16.msra.mxu1 %v5264_v33  ;;  %v148_v42 = vld [vmem:[%s11632_s3 + $0x80] sm:$0xff]  ;;  %v153_v44 = vld [vmem:[%s11632_s3 + $0xa8] sm:$0xff]  ;;  %v155_v45 = vld [vmem:[%s11632_s3 + $0xb8] sm:$0xff]  ;;  %vm347_vm5 = vcmask 130048   ;;  %vm1502_vm6 = vcmask 654336   ;;  %vm1602_vm7 = vcmask 1041408  }
  0x10   :  { %5253 = vmatpush3.bf16.msra.mxu0 %v5252_v32  ;;  %5267 = vmatprep.subr.bf16.mxu1 %v5266_v34  ;;  %v5272_v46 = vpack.c.bf16 %v150_v43, %v148_v42  ;;  %v5274_v47 = vpack.c.bf16 %v155_v45, %v153_v44  ;;  %v152_v48 = vld [vmem:[%s11632_s3 + $0xa0] sm:$0xff]  ;;  %v154_v49 = vld [vmem:[%s11632_s3 + $0xb0] sm:$0xff]  ;;  %v157_v50 = vld [vmem:[%s11632_s3 + $0xc8] sm:$0xff]  ;;  %vm7058_vm8 = vmmov 1   ;;  %vm1598_vm10 = vcmask 80896  }
  0x11   :  { %5286 = vmatprep.subr.bf16.mxu0 %v11644_v3  ;;  %v159_v51 = vld [vmem:[%s11632_s3 + $0xd8] sm:$0xff]  ;;  %v5276_v52 = vpack.c.bf16 %v154_v49, %v152_v48  ;;  %v156_v54 = vld [vmem:[%s11632_s3 + $0xc0] sm:$0xff]  ;;  %v158_v55 = vld [vmem:[%s11632_s3 + $0xd0] sm:$0xff] }
  0x12   :  { %v5278_v53 = vpack.c.bf16 %v159_v51, %v157_v50  ;;  %v161_v56 = vld [vmem:[%s11632_s3 + $0xe8] sm:$0xff]  ;;  %v163_v57 = vld [vmem:[%s11632_s3 + $0xf8] sm:$0xff]  ;;  %v5280_v58 = vpack.c.bf16 %v158_v55, %v156_v54  ;;  %v160_v60 = vld [vmem:[%s11632_s3 + $0xe0] sm:$0xff] }
  0x13   :  { %5194 = vmatmul.mubr.msk.f32.vlgmr.msra.gmra.mrb[0].mxu0 %vm58_vm1, %v42_v39  ;;  %5269 = vmatpush1.bf16.msra.mxu1 %v5268_v40  ;;  %v5282_v59 = vpack.c.bf16 %v163_v57, %v161_v56  ;;  %v162_v61 = vld [vmem:[%s11632_s3 + $0xf0] sm:$0xff]  ;;  %v237_v63 = vld [vmem:[%s11637_s8] sm:$0xff]  ;;  %v238_v0 = vld [vmem:[%s11637_s8 + $0x8] sm:$0xff] }
  0x14   :  { %5271 = vmatprep.subr.bf16.mxu1 %v5270_v41  ;;  %v5284_v62 = vpack.c.bf16 %v162_v61, %v160_v60  ;;  %v239_v1 = vld [vmem:[%s11637_s8 + $0x10] sm:$0xff]  ;;  %v7265_v2 = vpack.c.bf16 %v238_v0, %v237_v63  ;;  %v240_v4 = vld [vmem:[%s11637_s8 + $0x18] sm:$0xff]  ;;  %v241_v7 = vld [vmem:[%s11637_s8 + $0x20] sm:$0xff] }
  0x15   :  { %v7271_v5 = vpack.c.bf16 %v240_v4, %v239_v1  ;;  %v242_v8 = vld [vmem:[%s11637_s8 + $0x28] sm:$0xff]  ;;  %v243_v10 = vld [vmem:[%s11637_s8 + $0x30] sm:$0xff]  ;;  %v244_v11 = vld [vmem:[%s11637_s8 + $0x38] sm:$0xff] }
  0x16   :  { %5288 = vmatpush1.bf16.msra.mxu0 %v7265_v2  ;;  %v7281_v9 = vpack.c.bf16 %v242_v8, %v241_v7  ;;  %v7291_v12 = vpack.c.bf16 %v244_v11, %v243_v10  ;;  %v245_v13 = vld [vmem:[%s11637_s8 + $0x40] sm:$0xff]  ;;  %v246_v14 = vld [vmem:[%s11637_s8 + $0x48] sm:$0xff]  ;;  %v247_v16 = vld [vmem:[%s11637_s8 + $0x50] sm:$0xff] }
  0x17   :  { %5273 = vmatpush1.bf16.msra.mxu1 %v5272_v46  ;;  %5289 = vmatprep.subr.bf16.mxu0 %v11644_v3  ;;  %v7301_v15 = vpack.c.bf16 %v246_v14, %v245_v13  ;;  %v248_v17 = vld [vmem:[%s11637_s8 + $0x58] sm:$0xff]  ;;  %v249_v19 = vld [vmem:[%s11637_s8 + $0x60] sm:$0xff]  ;;  %v250_v20 = vld [vmem:[%s11637_s8 + $0x68] sm:$0xff] }
  0x18   :  { %5275 = vmatprep.subr.bf16.mxu1 %v5274_v47  ;;  %v7311_v18 = vpack.c.bf16 %v248_v17, %v247_v16  ;;  %v7321_v21 = vpack.c.bf16 %v250_v20, %v249_v19  ;;  %v251_v22 = vld [vmem:[%s11637_s8 + $0x70] sm:$0xff]  ;;  %v252_v23 = vld [vmem:[%s11637_s8 + $0x78] sm:$0xff]  ;;  %v253_v25 = vld [vmem:[%s11637_s8 + $0x80] sm:$0xff] }
  0x19   :  { %v7331_v24 = vpack.c.bf16 %v252_v23, %v251_v22  ;;  %v254_v26 = vld [vmem:[%s11637_s8 + $0x88] sm:$0xff]  ;;  %v4760_v28 = vld [vmem:[%s11631_s2] ss:$0 sm:$0xff]  ;;  %v255_v32 = vld [vmem:[%s11637_s8 + $0x90] sm:$0xff] }
  0x1a   :  { %5291 = vmatpush1.bf16.msra.mxu0 %v7271_v5  ;;  %v7341_v27 = vpack.c.bf16 %v254_v26, %v253_v25  ;;  %v256_v33 = vld [vmem:[%s11637_s8 + $0x98] sm:$0xff]  ;;  %v344_v39 = vld [vmem:[%s11638_s9 + $0x8] sm:$0xff]  ;;  %v343_v41 = vld [vmem:[%s11638_s9] sm:$0xff] }
  0x1b   :  { %5277 = vmatpush1.bf16.msra.mxu1 %v5276_v52  ;;  %5292 = vmatprep.subr.bf16.mxu0 %v11644_v3  ;;  %v7359_v34 = vpack.c.bf16 %v256_v33, %v255_v32  ;;  %v346_v40 = vld [vmem:[%s11638_s9 + $0x18] sm:$0xff]  ;;  %v345_v43 = vld [vmem:[%s11638_s9 + $0x10] sm:$0xff]  ;;  %v425_v45 = vld [vmem:[%s11639_s10 + $0x8] sm:$0xff] }
  0x1c   :  { %5279 = vmatprep.subr.bf16.mxu1 %v5278_v53  ;;  %v7380_v42 = vpack.c.bf16 %v346_v40, %v344_v39  ;;  %v7385_v44 = vpack.c.bf16 %v345_v43, %v343_v41  ;;  %v435_v46 = vld [vmem:[%s11639_s10 + $0x58] sm:$0xff]  ;;  %v437_v49 = vld [vmem:[%s11639_s10 + $0x68] sm:$0xff]  ;;  %v426_v51 = vld [vmem:[%s11639_s10 + $0x10] sm:$0xff] }
  0x1d   :  { %v427_v47 = vld [vmem:[%s11639_s10 + $0x18] sm:$0xff]  ;;  %v7398_v48 = vpack.c.bf16 %v435_v46, %v425_v45  ;;  %v436_v52 = vld [vmem:[%s11639_s10 + $0x60] sm:$0xff]  ;;  %v457_v55 = vld [vmem:[%s11639_s10 + $0x108] sm:$0xff] }
  0x1e   :  { %5294 = vmatpush1.bf16.msra.mxu0 %v7281_v9  ;;  %v7403_v50 = vpack.c.bf16 %v437_v49, %v427_v47  ;;  %v7412_v53 = vpack.c.bf16 %v436_v52, %v426_v51  ;;  %v447_v54 = vld [vmem:[%s11639_s10 + $0xb8] sm:$0xff]  ;;  %v446_v57 = vld [vmem:[%s11639_s10 + $0xb0] sm:$0xff]  ;;  %v477_v61 = vld [vmem:[%s11639_s10 + $0x1a8] sm:$0xff] }
  0x1f   :  { %5281 = vmatpush1.bf16.msra.mxu1 %v5280_v58  ;;  %5295 = vmatprep.subr.bf16.mxu0 %v11644_v3  ;;  %v7421_v56 = vpack.c.bf16 %v457_v55, %v447_v54  ;;  %v456_v58 = vld [vmem:[%s11639_s10 + $0x100] sm:$0xff]  ;;  %v467_v60 = vld [vmem:[%s11639_s10 + $0x158] sm:$0xff]  ;;  %v466_v63 = vld [vmem:[%s11639_s10 + $0x150] sm:$0xff] }
  0x20   :  { %5283 = vmatprep.subr.bf16.mxu1 %v5282_v59  ;;  %12006 = vst [vmem:[#allocation5_spill] sm:$0xff] %v7403_v50  ;;  %12007 = vst [vmem:[#allocation6_spill] sm:$0xff] %v7412_v53  ;;  %v7431_v59 = vpack.c.bf16 %v456_v58, %v446_v57  ;;  %v476_v0 = vld [vmem:[%s11639_s10 + $0x1a0] sm:$0xff]  ;;  %v487_v4 = vld [vmem:[%s11639_s10 + $0x1f8] sm:$0xff] }
  0x21   :  { %12008 = vst [vmem:[#allocation7_spill] sm:$0xff] %v7421_v56  ;;  %v7449_v1 = vpack.c.bf16 %v476_v0, %v466_v63  ;;  %v497_v7 = vld [vmem:[%s11639_s10 + $0x248] sm:$0xff]  ;;  %v486_v10 = vld [vmem:[%s11639_s10 + $0x1f0] sm:$0xff]  ;;  %v496_v11 = vld [vmem:[%s11639_s10 + $0x240] sm:$0xff] }
  0x22   :  { %5297 = vmatpush1.bf16.msra.mxu0 %v7291_v12  ;;  %12009 = vst [vmem:[#allocation8_spill] sm:$0xff] %v7431_v59  ;;  %v7457_v8 = vpack.c.bf16 %v497_v7, %v487_v4  ;;  %v7467_v13 = vpack.c.bf16 %v496_v11, %v486_v10  ;;  %v507_v14 = vld [vmem:[%s11639_s10 + $0x298] sm:$0xff]  ;;  %v517_v16 = vld [vmem:[%s11639_s10 + $0x2e8] sm:$0xff]  ;;  %v506_v19 = vld [vmem:[%s11639_s10 + $0x290] sm:$0xff] }
  0x23   :  { %5285 = vmatpush1.bf16.msra.mxu1 %v5284_v62  ;;  %5298 = vmatprep.subr.bf16.mxu0 %v11644_v3  ;;  %v7439_v62 = vpack.c.bf16 %v477_v61, %v467_v60  ;;  %12011 = vst [vmem:[#allocation10_spill] sm:$0xff] %v7449_v1  ;;  %v7475_v17 = vpack.c.bf16 %v517_v16, %v507_v14  ;;  %v516_v20 = vld [vmem:[%s11639_s10 + $0x2e0] sm:$0xff]  ;;  %v527_v23 = vld [vmem:[%s11639_s10 + $0x338] sm:$0xff]  ;;  %v537_v25 = vld [vmem:[%s11639_s10 + $0x388] sm:$0xff] }
  0x24   :  { %5317 = vmatprep.subr.bf16.mxu1 %v7380_v42  ;;  %12012 = vst [vmem:[#allocation11_spill] sm:$0xff] %v7457_v8  ;;  %12013 = vst [vmem:[#allocation12_spill] sm:$0xff] %v7467_v13  ;;  %v7485_v22 = vpack.c.bf16 %v516_v20, %v506_v19  ;;  %v7493_v26 = vpack.c.bf16 %v537_v25, %v527_v23  ;;  %v547_v32 = vld [vmem:[%s11639_s10 + $0x3d8] sm:$0xff]  ;;  %v557_v33 = vld [vmem:[%s11639_s10 + $0x428] sm:$0xff] }
  0x25   :  { %12010 = vst [vmem:[#allocation9_spill] sm:$0xff] %v7439_v62  ;;  %12014 = vst [vmem:[#allocation13_spill] sm:$0xff] %v7475_v17  ;;  %v556_v39 = vld [vmem:[%s11639_s10 + $0x420] sm:$0xff]  ;;  %v567_v41 = vld [vmem:[%s11639_s10 + $0x478] sm:$0xff] }
  0x26   :  { %5300 = vmatpush1.bf16.msra.mxu0 %v7301_v15  ;;  %12015 = vst [vmem:[#allocation14_spill] sm:$0xff] %v7485_v22  ;;  %12016 = vst [vmem:[#allocation15_spill] sm:$0xff] %v7493_v26  ;;  %v577_v43 = vld [vmem:[%s11639_s10 + $0x4c8] sm:$0xff]  ;;  %v566_v46 = vld [vmem:[%s11639_s10 + $0x470] sm:$0xff] }
  0x27   :  { %5301 = vmatprep.subr.bf16.mxu0 %v11644_v3  ;;  %v7529_v45 = vpack.c.bf16 %v577_v43, %v567_v41  ;;  %v576_v47 = vld [vmem:[%s11639_s10 + $0x4c0] sm:$0xff]  ;;  %v587_v51 = vld [vmem:[%s11639_s10 + $0x518] sm:$0xff]  ;;  %v597_v52 = vld [vmem:[%s11639_s10 + $0x568] sm:$0xff] }
  0x28   :  { %v7539_v49 = vpack.c.bf16 %v576_v47, %v566_v46  ;;  %v7547_v54 = vpack.c.bf16 %v597_v52, %v587_v51  ;;  %v586_v55 = vld [vmem:[%s11639_s10 + $0x510] sm:$0xff]  ;;  %v596_v57 = vld [vmem:[%s11639_s10 + $0x560] sm:$0xff]  ;;  %v445_v23 = vld [vmem:[%s11639_s10 + $0xa8] sm:$0xff] }
  0x29   :  { %12020 = vst [vmem:[#allocation19_spill] sm:$0xff] %v7529_v45  ;;  %v7557_v58 = vpack.c.bf16 %v596_v57, %v586_v55  ;;  %v424_v19 = vld [vmem:[%s11639_s10] sm:$0xff]  ;;  %v434_v20 = vld [vmem:[%s11639_s10 + $0x50] sm:$0xff]  ;;  %v455_v25 = vld [vmem:[%s11639_s10 + $0xf8] sm:$0xff] }
  0x2a   :  { %5303 = vmatpush1.bf16.msra.mxu0 %v7311_v18  ;;  %12021 = vst [vmem:[#allocation20_spill] sm:$0xff] %v7539_v49  ;;  %12022 = vst [vmem:[#allocation21_spill] sm:$0xff] %v7547_v54  ;;  %v465_v41 = vld [vmem:[%s11639_s10 + $0x148] sm:$0xff]  ;;  %v475_v43 = vld [vmem:[%s11639_s10 + $0x198] sm:$0xff] }
  0x2b   :  { %5304 = vmatprep.subr.bf16.mxu0 %v11644_v3  ;;  %12023 = vst [vmem:[#allocation22_spill] sm:$0xff] %v7557_v58  ;;  %v7593_v47 = vpack.c.bf16 %v475_v43, %v465_v41  ;;  %v464_v51 = vld [vmem:[%s11639_s10 + $0x140] sm:$0xff]  ;;  %v474_v52 = vld [vmem:[%s11639_s10 + $0x190] sm:$0xff]  ;;  %v485_v55 = vld [vmem:[%s11639_s10 + $0x1e8] sm:$0xff] }
  0x2c   :  { %v495_v57 = vld [vmem:[%s11639_s10 + $0x238] sm:$0xff]  ;;  %vm9300_vm9 = vmpackc.low %vm1602_vm7, %vm7058_vm8 }
  0x2e   :  { %5306 = vmatpush1.bf16.msra.mxu0 %v7321_v21 }
  0x2f   :  { %5307 = vmatprep.subr.bf16.mxu0 %v11644_v3 }
  0x32   :  { %5309 = vmatpush1.bf16.msra.mxu0 %v7331_v24 }
  0x33   :  { %5310 = vmatprep.subr.bf16.mxu0 %v11644_v3 }
  0x36   :  { %5312 = vmatpush1.bf16.msra.mxu0 %v7341_v27 }
  0x37   :  { %5313 = vmatprep.subr.bf16.mxu0 %v11644_v3 }
  0x3a   :  { %5315 = vmatpush1.bf16.msra.mxu0 %v7359_v34 }
  0x3b   :  { %5361 = vmatprep.subr.bf16.mxu0 %v7403_v50 }
  0xe6   :  { %v128_v29 = vpop.f32.mrb[0].mxu0 }
  0xe7   :  { %v7349_v30 = vadd.f32 %v4760_v28, %v128_v29  ;;  %v5195_v31 = vpop.f32.mrb[1].mxu0  ;;  %v526_v28 = vld [vmem:[%s11639_s10 + $0x330] sm:$0xff]  ;;  %v536_v29 = vld [vmem:[%s11639_s10 + $0x380] sm:$0xff] }
  0xe8   :  { %v7503_v31 = vpack.c.bf16 %v536_v29, %v526_v28  ;;  %v7572_v29 = vpack.c.bf16 %v434_v20, %v424_v19  ;;  %v525_v19 = vld [vmem:[%s11639_s10 + $0x328] sm:$0xff]  ;;  %v535_v20 = vld [vmem:[%s11639_s10 + $0x378] sm:$0xff] }
  0xe9   :  { %229 = vmatmul.mubr.f32.vlgmr.msra.gmra.mrb[0].mxu1 %v7349_v30 }
  0xea   :  { %415 = vmatprep.mubr.f32.mxu1 %v11642_v6  ;;  %5319 = vmatpush1.bf16.msra.mxu1 %v7385_v44  ;;  %12017 = vst [vmem:[#allocation16_spill] sm:$0xff] %v7503_v31  ;;  %v438_v6 = vld [vmem:[%s11639_s10 + $0x70] sm:$0xff] }
  0xeb   :  { %5321 = vmatprep.subr.bf16.mxu1 %v7398_v48 }
 0x1bc   :  { %v7362_v35 = vpop.f32.mrb[0].mxu1 }
 0x1bd   :  { %v7364_v36 = vpop.f32.mrb[1].mxu1  ;;  %v235_v38 = vmul.f32 %v7362_v35, %v7362_v35 }
 0x1be   :  { %v236_v37 = vmul.f32 %v7364_v36, %v7364_v36 }
 0x1c0   :  { %4762 = vmatprep.mubr.msk.f32.mxu0 %vm257_vm2, %v236_v37  ;;  %v7511_v37 = vpack.c.bf16 %v557_v33, %v547_v32  ;;  %v7574_v33 = vpack.c.bf16 %v455_v25, %v445_v23  ;;  %v7647_v25 = vpack.c.bf16 %v535_v20, %v525_v19 }
 0x1c1   :  { %326 = vmatmul.mubr.f32.vlgmr.msra.gmra.mrb[2].mxu0 %v235_v38  ;;  %v546_v38 = vld [vmem:[%s11639_s10 + $0x3d0] sm:$0xff] }
 0x1c2   :  { %5363 = vmatpush1.bf16.msra.mxu0 %v7412_v53  ;;  %12018 = vst [vmem:[#allocation17_spill] sm:$0xff] %v7511_v37  ;;  %v7521_v40 = vpack.c.bf16 %v556_v39, %v546_v38  ;;  %v444_v38 = vld [vmem:[%s11639_s10 + $0xa0] sm:$0xff]  ;;  %v454_v39 = vld [vmem:[%s11639_s10 + $0xf0] sm:$0xff]  ;;  %12026 = vst [vmem:[#allocation25_spill] sm:$0xff] %v7647_v25 }
 0x1c3   :  { %5365 = vmatprep.subr.bf16.mxu0 %v7421_v56  ;;  %v7590_v46 = vpack.c.bf16 %v454_v39, %v444_v38  ;;  %v545_v38 = vld [vmem:[%s11639_s10 + $0x3c8] sm:$0xff]  ;;  %v555_v39 = vld [vmem:[%s11639_s10 + $0x418] sm:$0xff] }
 0x1c4   :  { %12019 = vst [vmem:[#allocation18_spill] sm:$0xff] %v7521_v40  ;;  %v7665_v43 = vpack.c.bf16 %v555_v39, %v545_v38  ;;  %v605_v39 = vld [vmem:[%s11639_s10 + $0x5a8] sm:$0xff] }
 0x1c6   :  { %5367 = vmatpush1.bf16.msra.mxu0 %v7431_v59  ;;  %12028 = vst [vmem:[#allocation27_spill] sm:$0xff] %v7665_v43 }
 0x1c7   :  { %5369 = vmatprep.subr.bf16.mxu0 %v7439_v62 }
 0x1ca   :  { %5371 = vmatpush1.bf16.msra.mxu0 %v7449_v1 }
 0x1cb   :  { %5373 = vmatprep.subr.bf16.mxu0 %v7457_v8 }
 0x1ce   :  { %5375 = vmatpush1.bf16.msra.mxu0 %v7467_v13 }
 0x1cf   :  { %5377 = vmatprep.subr.bf16.mxu0 %v7475_v17 }
 0x1d2   :  { %5379 = vmatpush1.bf16.msra.mxu0 %v7485_v22 }
 0x1d3   :  { %5381 = vmatprep.subr.bf16.mxu0 %v7493_v26 }
 0x1d6   :  { %5383 = vmatpush1.bf16.msra.mxu0 %v7503_v31 }
 0x1d7   :  { %5385 = vmatprep.subr.bf16.mxu0 %v7511_v37 }
 0x1da   :  { %5387 = vmatpush1.bf16.msra.mxu0 %v7521_v40  ;;  %v481_v40 = vld [vmem:[%s11639_s10 + $0x1c8] sm:$0xff] }
 0x1db   :  { %5389 = vmatprep.subr.bf16.mxu0 %v7529_v45  ;;  %v450_v45 = vld [vmem:[%s11639_s10 + $0xd0] sm:$0xff] }
 0x1de   :  { %5391 = vmatpush1.bf16.msra.mxu0 %v7539_v49  ;;  %v458_v49 = vld [vmem:[%s11639_s10 + $0x110] sm:$0xff] }
 0x1df   :  { %5393 = vmatprep.subr.bf16.mxu0 %v7547_v54 }
 0x1e2   :  { %5395 = vmatpush1.bf16.msra.mxu0 %v7557_v58 }
 0x294   :  { %v327_v60 = vpop.f32.mrb[2].mxu0 }
 0x295   :  { %7011 = vrsqrt.f32 %v327_v60  ;;  %v329_v61 = vpop.f32.mrb[3].mxu0  ;;  %vm333_vm3 = vcmp.eq.f32.partialorder %v327_v60, inf  ;;  %v336_v4 = vand.u32 2147483648, %v327_v60  ;;  %vm335_vm4 = vcmp.eq.f32.partialorder %v327_v60, 0.0 }
 0x296   :  { %v339_v11 = vadd.f32 1.0, %v327_v60  ;;  %v7611_v61 = vpack.c.bf16 %v495_v57, %v485_v55  ;;  %v565_v55 = vld [vmem:[%s11639_s10 + $0x468] sm:$0xff]  ;;  %v575_v57 = vld [vmem:[%s11639_s10 + $0x4b8] sm:$0xff] }
 0x29f   :  { %v7012_v63 = vpop.eup %7011 }
 0x2a0   :  { %v332_v0 = vmul.f32 %v7012_v63, %v327_v60  ;;  %v484_v63 = vld [vmem:[%s11639_s10 + $0x1e0] sm:$0xff] }
 0x2a2   :  { %v334_v7 = vsel %vm333_vm3, %v327_v60, %v332_v0  ;;  %v7608_v60 = vpack.c.bf16 %v474_v52, %v464_v51  ;;  %v494_v0 = vld [vmem:[%s11639_s10 + $0x230] sm:$0xff]  ;;  %v544_v51 = vld [vmem:[%s11639_s10 + $0x3c0] sm:$0xff] }
 0x2a3   :  { %v337_v10 = vsel %vm335_vm4, %v336_v4, %v334_v7  ;;  %v505_v4 = vld [vmem:[%s11639_s10 + $0x288] sm:$0xff]  ;;  %v515_v7 = vld [vmem:[%s11639_s10 + $0x2d8] sm:$0xff]  ;;  %v554_v52 = vld [vmem:[%s11639_s10 + $0x410] sm:$0xff] }
 0x2a4   :  { %v338_v14 = vadd.f32 1.0, %v337_v10 }
 0x2a6   :  { %v340_v16 = vmul.f32 %v339_v11, %v338_v14  ;;  %v7629_v11 = vpack.c.bf16 %v515_v7, %v505_v4  ;;  %v504_v14 = vld [vmem:[%s11639_s10 + $0x280] sm:$0xff]  ;;  %v574_v7 = vld [vmem:[%s11639_s10 + $0x4b0] sm:$0xff] }
 0x2a7   :  { %v564_v4 = vld [vmem:[%s11639_s10 + $0x460] sm:$0xff] }
 0x2a8   :  { %7013 = vrcp.f32 %v340_v16  ;;  %12024 = vst [vmem:[#allocation23_spill] sm:$0xff] %v7629_v11  ;;  %v514_v16 = vld [vmem:[%s11639_s10 + $0x2d0] sm:$0xff]  ;;  %v7698_v19 = vpack.c.bf16 %v574_v7, %v564_v4  ;;  %v604_v4 = vld [vmem:[%s11639_s10 + $0x5a0] sm:$0xff] }
 0x2a9   :  { %v7644_v23 = vpack.c.bf16 %v514_v16, %v504_v14  ;;  %v585_v14 = vld [vmem:[%s11639_s10 + $0x508] sm:$0xff]  ;;  %v595_v16 = vld [vmem:[%s11639_s10 + $0x558] sm:$0xff]  ;;  %v614_v7 = vld [vmem:[%s11639_s10 + $0x5f0] sm:$0xff] }
 0x2aa   :  { %12031 = vst [vmem:[#allocation30_spill] sm:$0xff] %v7698_v19  ;;  %v7701_v20 = vpack.c.bf16 %v595_v16, %v585_v14  ;;  %v7736_v16 = vpack.c.bf16 %v614_v7, %v604_v4  ;;  %v441_v7 = vld [vmem:[%s11639_s10 + $0x88] sm:$0xff] }
 0x2ab   :  { %12025 = vst [vmem:[#allocation24_spill] sm:$0xff] %v7644_v23 }
 0x2ac   :  { %12032 = vst [vmem:[#allocation31_spill] sm:$0xff] %v7701_v20  ;;  %12036 = vst [vmem:[#allocation35_spill] sm:$0xff] %v7736_v16 }
 0x2b2   :  { %v7014_v28 = vpop.eup %7013 }
 0x2b3   :  { %v342_v32 = vmul.f32 %v7014_v28, %v337_v10  ;;  %v7626_v10 = vpack.c.bf16 %v494_v0, %v484_v63  ;;  %v524_v28 = vld [vmem:[%s11639_s10 + $0x320] sm:$0xff]  ;;  %v7680_v63 = vpack.c.bf16 %v554_v52, %v544_v51  ;;  %v7683_v0 = vpack.c.bf16 %v575_v57, %v565_v55  ;;  %v615_v51 = vld [vmem:[%s11639_s10 + $0x5f8] sm:$0xff]  ;;  %v617_v57 = vld [vmem:[%s11639_s10 + $0x608] sm:$0xff] }
 0x2b4   :  { %v607_v52 = vld [vmem:[%s11639_s10 + $0x5b8] sm:$0xff]  ;;  %v7723_v55 = vpack.c.bf16 %v615_v51, %v605_v39  ;;  %v429_v51 = vld [vmem:[%s11639_s10 + $0x28] sm:$0xff] }
 0x2b5   :  { %4763 = vmatmul.mubr.msk.f32.vlgmr.msra.gmra.mrb[2].mxu1 %vm347_vm5, %v342_v32  ;;  %v534_v32 = vld [vmem:[%s11639_s10 + $0x370] sm:$0xff]  ;;  %12029 = vst [vmem:[#allocation28_spill] sm:$0xff] %v7680_v63  ;;  %12030 = vst [vmem:[#allocation29_spill] sm:$0xff] %v7683_v0  ;;  %v7734_v14 = vpack.c.bf16 %v617_v57, %v607_v52  ;;  %v439_v52 = vld [vmem:[%s11639_s10 + $0x78] sm:$0xff] }
 0x2b6   :  { %5323 = vmatpush1.bf16.msra.mxu1 %v7572_v29  ;;  %v7662_v41 = vpack.c.bf16 %v534_v32, %v524_v28  ;;  %v584_v28 = vld [vmem:[%s11639_s10 + $0x500] sm:$0xff]  ;;  %v594_v32 = vld [vmem:[%s11639_s10 + $0x550] sm:$0xff]  ;;  %12034 = vst [vmem:[#allocation33_spill] sm:$0xff] %v7723_v55  ;;  %v431_v57 = vld [vmem:[%s11639_s10 + $0x38] sm:$0xff]  ;;  %v7759_v4 = vpack.c.bf16 %v439_v52, %v429_v51 }
 0x2b7   :  { %5325 = vmatprep.subr.bf16.mxu1 %v7574_v33  ;;  %v7710_v38 = vpack.c.bf16 %v594_v32, %v584_v28  ;;  %12035 = vst [vmem:[#allocation34_spill] sm:$0xff] %v7734_v14  ;;  %v606_v28 = vld [vmem:[%s11639_s10 + $0x5b0] sm:$0xff]  ;;  %v616_v32 = vld [vmem:[%s11639_s10 + $0x600] sm:$0xff]  ;;  %5397 = vmatprep.subr.bf16.mxu0 %v7734_v14  ;;  %v461_v14 = vld [vmem:[%s11639_s10 + $0x128] sm:$0xff] }
 0x2b8   :  { %12027 = vst [vmem:[#allocation26_spill] sm:$0xff] %v7662_v41  ;;  %v7745_v39 = vpack.c.bf16 %v616_v32, %v606_v28  ;;  %12038 = vst [vmem:[#allocation37_spill] sm:$0xff] %v7759_v4  ;;  %v7764_v28 = vpack.c.bf16 %v441_v7, %v431_v57  ;;  %v428_v32 = vld [vmem:[%s11639_s10 + $0x20] sm:$0xff]  ;;  %v430_v51 = vld [vmem:[%s11639_s10 + $0x30] sm:$0xff] }
 0x2b9   :  { %12033 = vst [vmem:[#allocation32_spill] sm:$0xff] %v7710_v38  ;;  %v440_v52 = vld [vmem:[%s11639_s10 + $0x80] sm:$0xff]  ;;  %v449_v7 = vld [vmem:[%s11639_s10 + $0xc8] sm:$0xff]  ;;  %v7798_v54 = vpack.c.bf16 %v438_v6, %v428_v32 }
 0x2ba   :  { %5327 = vmatpush1.bf16.msra.mxu1 %v7590_v46  ;;  %12037 = vst [vmem:[#allocation36_spill] sm:$0xff] %v7745_v39  ;;  %5399 = vmatpush1.bf16.msra.mxu0 %v7745_v39  ;;  %12039 = vst [vmem:[#allocation38_spill] sm:$0xff] %v7764_v28  ;;  %v451_v39 = vld [vmem:[%s11639_s10 + $0xd8] sm:$0xff]  ;;  %v469_v6 = vld [vmem:[%s11639_s10 + $0x168] sm:$0xff] }
 0x2bb   :  { %5329 = vmatprep.subr.bf16.mxu1 %v7593_v47  ;;  %5441 = vmatprep.subr.bf16.mxu0 %v7764_v28  ;;  %12040 = vst [vmem:[#allocation39_spill] sm:$0xff] %v7798_v54  ;;  %v7823_v32 = vpack.c.bf16 %v461_v14, %v451_v39 }
 0x2bd   :  { %12043 = vst [vmem:[#allocation42_spill] sm:$0xff] %v7823_v32 }
 0x2be   :  { %5331 = vmatpush1.bf16.msra.mxu1 %v7608_v60 }
 0x2bf   :  { %5333 = vmatprep.subr.bf16.mxu1 %v7611_v61 }
 0x2c2   :  { %5335 = vmatpush1.bf16.msra.mxu1 %v7626_v10 }
 0x2c3   :  { %5337 = vmatprep.subr.bf16.mxu1 %v7629_v11 }
 0x2c6   :  { %5339 = vmatpush1.bf16.msra.mxu1 %v7644_v23 }
 0x2c7   :  { %5341 = vmatprep.subr.bf16.mxu1 %v7647_v25  ;;  %v2235_v25 = vld [vmem:[%s11634_s5 + $0x2d0] sm:$0xff] }
 0x2ca   :  { %5343 = vmatpush1.bf16.msra.mxu1 %v7662_v41  ;;  %v2233_v41 = vld [vmem:[%s11634_s5 + $0x2c0] sm:$0xff] }
 0x2cb   :  { %5345 = vmatprep.subr.bf16.mxu1 %v7665_v43 }
 0x2ce   :  { %5347 = vmatpush1.bf16.msra.mxu1 %v7680_v63 }
 0x2cf   :  { %5349 = vmatprep.subr.bf16.mxu1 %v7683_v0 }
 0x2d2   :  { %5351 = vmatpush1.bf16.msra.mxu1 %v7698_v19 }
 0x2d3   :  { %5353 = vmatprep.subr.bf16.mxu1 %v7701_v20 }
 0x2d6   :  { %5355 = vmatpush1.bf16.msra.mxu1 %v7710_v38  ;;  %v1123_v38 = vld [vmem:[%s11640_s11 + $0x418] sm:$0xff] }
 0x2d7   :  { %5357 = vmatprep.subr.bf16.mxu1 %v7723_v55  ;;  %v1122_v55 = vld [vmem:[%s11640_s11 + $0x410] sm:$0xff] }
 0x2da   :  { %5359 = vmatpush1.bf16.msra.mxu1 %v7736_v16 }
 0x2db   :  { %5401 = vmatprep.subr.bf16.mxu1 %v7759_v4  ;;  %v459_v4 = vld [vmem:[%s11639_s10 + $0x118] sm:$0xff] }
 0x388   :  { %v417_v57 = vpop.f32.mrb[2].mxu1 }
 0x389   :  { %v7784_v3 = vmul.f32 %v417_v57, %v7362_v35  ;;  %v419_v28 = vpop.f32.mrb[3].mxu1  ;;  %v7800_v35 = vpack.c.bf16 %v440_v52, %v430_v51  ;;  %v448_v57 = vld [vmem:[%s11639_s10 + $0xc0] sm:$0xff]  ;;  %v479_v51 = vld [vmem:[%s11639_s10 + $0x1b8] sm:$0xff] }
 0x38a   :  { %v7796_v58 = vmul.f32 %v419_v28, %v7364_v36  ;;  %v460_v36 = vld [vmem:[%s11639_s10 + $0x120] sm:$0xff]  ;;  %v7821_v28 = vpack.c.bf16 %v459_v4, %v449_v7  ;;  %v471_v52 = vld [vmem:[%s11639_s10 + $0x178] sm:$0xff]  ;;  %v7838_v14 = vpack.c.bf16 %v458_v49, %v448_v57  ;;  %v478_v7 = vld [vmem:[%s11639_s10 + $0x1b0] sm:$0xff] }
 0x38b   :  { %12041 = vst [vmem:[#allocation40_spill] sm:$0xff] %v7800_v35  ;;  %v7840_v39 = vpack.c.bf16 %v460_v36, %v450_v45  ;;  %v468_v4 = vld [vmem:[%s11639_s10 + $0x160] sm:$0xff]  ;;  %v7854_v49 = vpack.c.bf16 %v481_v40, %v471_v52  ;;  %v470_v45 = vld [vmem:[%s11639_s10 + $0x170] sm:$0xff]  ;;  %v489_v36 = vld [vmem:[%s11639_s10 + $0x208] sm:$0xff] }
 0x38c   :  { %4764 = vmatprep.mubr.msk.f32.mxu1 %vm257_vm2, %v7796_v58  ;;  %4765 = vmatprep.mubr.msk.f32.mxu0 %vm257_vm2, %v7796_v58  ;;  %12042 = vst [vmem:[#allocation41_spill] sm:$0xff] %v7821_v28  ;;  %12044 = vst [vmem:[#allocation43_spill] sm:$0xff] %v7838_v14  ;;  %v480_v57 = vld [vmem:[%s11639_s10 + $0x1c0] sm:$0xff]  ;;  %v499_v40 = vld [vmem:[%s11639_s10 + $0x258] sm:$0xff]  ;;  %v7878_v52 = vpack.c.bf16 %v478_v7, %v468_v4 }
 0x38d   :  { %692 = vmatmul.mubr.f32.vlgmr.msra.gmra.mrb[4].mxu1 %v7784_v3  ;;  %763 = vmatmul.mubr.f32.vlgmr.msra.gmra.mrb[4].mxu0 %v7784_v3  ;;  %12045 = vst [vmem:[#allocation44_spill] sm:$0xff] %v7840_v39  ;;  %12047 = vst [vmem:[#allocation46_spill] sm:$0xff] %v7854_v49  ;;  %v7890_v37 = vpack.c.bf16 %v499_v40, %v489_v36  ;;  %v490_v4 = vld [vmem:[%s11639_s10 + $0x210] sm:$0xff]  ;;  %v500_v7 = vld [vmem:[%s11639_s10 + $0x260] sm:$0xff] }
 0x38e   :  { %5403 = vmatpush1.bf16.msra.mxu1 %v7798_v54  ;;  %5443 = vmatpush1.bf16.msra.mxu0 %v7800_v35  ;;  %v7852_v54 = vpack.c.bf16 %v479_v51, %v469_v6  ;;  %v491_v6 = vld [vmem:[%s11639_s10 + $0x218] sm:$0xff]  ;;  %v501_v51 = vld [vmem:[%s11639_s10 + $0x268] sm:$0xff]  ;;  %12048 = vst [vmem:[#allocation47_spill] sm:$0xff] %v7878_v52  ;;  %v7880_v35 = vpack.c.bf16 %v480_v57, %v470_v45 }
 0x38f   :  { %4766 = vmatprep.mubr.msk.f32.mxu1 %vm257_vm2, %v7796_v58  ;;  %4767 = vmatprep.mubr.msk.f32.mxu0 %vm257_vm2, %v7796_v58  ;;  %12050 = vst [vmem:[#allocation49_spill] sm:$0xff] %v7890_v37  ;;  %v509_v45 = vld [vmem:[%s11639_s10 + $0x2a8] sm:$0xff]  ;;  %v519_v57 = vld [vmem:[%s11639_s10 + $0x2f8] sm:$0xff] }
 0x390   :  { %12046 = vst [vmem:[#allocation45_spill] sm:$0xff] %v7852_v54  ;;  %5405 = vmatprep.subr.bf16.mxu1 %v7821_v28  ;;  %5445 = vmatprep.subr.bf16.mxu0 %v7823_v32  ;;  %12049 = vst [vmem:[#allocation48_spill] sm:$0xff] %v7880_v35  ;;  %v488_v32 = vld [vmem:[%s11639_s10 + $0x200] sm:$0xff]  ;;  %v498_v28 = vld [vmem:[%s11639_s10 + $0x250] sm:$0xff] }
 0x391   :  { %v511_v36 = vld [vmem:[%s11639_s10 + $0x2b8] sm:$0xff]  ;;  %v521_v40 = vld [vmem:[%s11639_s10 + $0x308] sm:$0xff] }
 0x392   :  { %5407 = vmatpush1.bf16.msra.mxu1 %v7838_v14  ;;  %5447 = vmatpush1.bf16.msra.mxu0 %v7840_v39  ;;  %v7892_v14 = vpack.c.bf16 %v501_v51, %v491_v6  ;;  %v7914_v6 = vpack.c.bf16 %v498_v28, %v488_v32  ;;  %v7916_v51 = vpack.c.bf16 %v500_v7, %v490_v4  ;;  %v518_v39 = vld [vmem:[%s11639_s10 + $0x2f0] sm:$0xff]  ;;  %v520_v32 = vld [vmem:[%s11639_s10 + $0x300] sm:$0xff]  ;;  %v529_v4 = vld [vmem:[%s11639_s10 + $0x348] sm:$0xff] }
 0x393   :  { %5409 = vmatprep.subr.bf16.mxu1 %v7852_v54  ;;  %5449 = vmatprep.subr.bf16.mxu0 %v7854_v49  ;;  %v508_v49 = vld [vmem:[%s11639_s10 + $0x2a0] sm:$0xff]  ;;  %v7926_v54 = vpack.c.bf16 %v519_v57, %v509_v45  ;;  %v510_v28 = vld [vmem:[%s11639_s10 + $0x2b0] sm:$0xff]  ;;  %v539_v7 = vld [vmem:[%s11639_s10 + $0x398] sm:$0xff] }
 0x394   :  { %12051 = vst [vmem:[#allocation50_spill] sm:$0xff] %v7892_v14  ;;  %12052 = vst [vmem:[#allocation51_spill] sm:$0xff] %v7914_v6  ;;  %v531_v45 = vld [vmem:[%s11639_s10 + $0x358] sm:$0xff]  ;;  %v541_v57 = vld [vmem:[%s11639_s10 + $0x3a8] sm:$0xff] }
 0x395   :  { %12053 = vst [vmem:[#allocation52_spill] sm:$0xff] %v7916_v51  ;;  %12054 = vst [vmem:[#allocation53_spill] sm:$0xff] %v7926_v54 }
 0x396   :  { %5411 = vmatpush1.bf16.msra.mxu1 %v7878_v52  ;;  %5451 = vmatpush1.bf16.msra.mxu0 %v7880_v35  ;;  %v7928_v52 = vpack.c.bf16 %v521_v40, %v511_v36  ;;  %v7950_v36 = vpack.c.bf16 %v518_v39, %v508_v49  ;;  %v7952_v40 = vpack.c.bf16 %v520_v32, %v510_v28  ;;  %v538_v35 = vld [vmem:[%s11639_s10 + $0x390] sm:$0xff]  ;;  %v540_v49 = vld [vmem:[%s11639_s10 + $0x3a0] sm:$0xff]  ;;  %v549_v28 = vld [vmem:[%s11639_s10 + $0x3e8] sm:$0xff] }
 0x397   :  { %5413 = vmatprep.subr.bf16.mxu1 %v7890_v37  ;;  %5453 = vmatprep.subr.bf16.mxu0 %v7892_v14  ;;  %v528_v14 = vld [vmem:[%s11639_s10 + $0x340] sm:$0xff]  ;;  %v7962_v37 = vpack.c.bf16 %v539_v7, %v529_v4  ;;  %v530_v39 = vld [vmem:[%s11639_s10 + $0x350] sm:$0xff]  ;;  %v559_v32 = vld [vmem:[%s11639_s10 + $0x438] sm:$0xff] }
 0x398   :  { %12055 = vst [vmem:[#allocation54_spill] sm:$0xff] %v7928_v52  ;;  %12056 = vst [vmem:[#allocation55_spill] sm:$0xff] %v7950_v36  ;;  %v551_v4 = vld [vmem:[%s11639_s10 + $0x3f8] sm:$0xff]  ;;  %v561_v7 = vld [vmem:[%s11639_s10 + $0x448] sm:$0xff] }
 0x399   :  { %12057 = vst [vmem:[#allocation56_spill] sm:$0xff] %v7952_v40  ;;  %12058 = vst [vmem:[#allocation57_spill] sm:$0xff] %v7962_v37 }
 0x39a   :  { %5415 = vmatpush1.bf16.msra.mxu1 %v7914_v6  ;;  %5455 = vmatpush1.bf16.msra.mxu0 %v7916_v51  ;;  %v7964_v6 = vpack.c.bf16 %v541_v57, %v531_v45  ;;  %v7986_v45 = vpack.c.bf16 %v538_v35, %v528_v14  ;;  %v7988_v57 = vpack.c.bf16 %v540_v49, %v530_v39  ;;  %v558_v51 = vld [vmem:[%s11639_s10 + $0x430] sm:$0xff]  ;;  %v560_v14 = vld [vmem:[%s11639_s10 + $0x440] sm:$0xff]  ;;  %v569_v39 = vld [vmem:[%s11639_s10 + $0x488] sm:$0xff] }
 0x39b   :  { %5417 = vmatprep.subr.bf16.mxu1 %v7926_v54  ;;  %5457 = vmatprep.subr.bf16.mxu0 %v7928_v52  ;;  %v548_v52 = vld [vmem:[%s11639_s10 + $0x3e0] sm:$0xff]  ;;  %v7998_v54 = vpack.c.bf16 %v559_v32, %v549_v28  ;;  %v550_v35 = vld [vmem:[%s11639_s10 + $0x3f0] sm:$0xff]  ;;  %v579_v49 = vld [vmem:[%s11639_s10 + $0x4d8] sm:$0xff] }
 0x39c   :  { %12059 = vst [vmem:[#allocation58_spill] sm:$0xff] %v7964_v6  ;;  %12060 = vst [vmem:[#allocation59_spill] sm:$0xff] %v7986_v45  ;;  %v571_v28 = vld [vmem:[%s11639_s10 + $0x498] sm:$0xff]  ;;  %v581_v32 = vld [vmem:[%s11639_s10 + $0x4e8] sm:$0xff] }
 0x39d   :  { %12061 = vst [vmem:[#allocation60_spill] sm:$0xff] %v7988_v57  ;;  %12062 = vst [vmem:[#allocation61_spill] sm:$0xff] %v7998_v54 }
 0x39e   :  { %5419 = vmatpush1.bf16.msra.mxu1 %v7950_v36  ;;  %5459 = vmatpush1.bf16.msra.mxu0 %v7952_v40  ;;  %v8000_v36 = vpack.c.bf16 %v561_v7, %v551_v4  ;;  %v8022_v4 = vpack.c.bf16 %v558_v51, %v548_v52  ;;  %v8024_v7 = vpack.c.bf16 %v560_v14, %v550_v35  ;;  %v578_v40 = vld [vmem:[%s11639_s10 + $0x4d0] sm:$0xff]  ;;  %v580_v51 = vld [vmem:[%s11639_s10 + $0x4e0] sm:$0xff]  ;;  %v589_v35 = vld [vmem:[%s11639_s10 + $0x528] sm:$0xff] }
 0x39f   :  { %5421 = vmatprep.subr.bf16.mxu1 %v7962_v37  ;;  %5461 = vmatprep.subr.bf16.mxu0 %v7964_v6  ;;  %v568_v6 = vld [vmem:[%s11639_s10 + $0x480] sm:$0xff]  ;;  %v8034_v37 = vpack.c.bf16 %v579_v49, %v569_v39  ;;  %v570_v52 = vld [vmem:[%s11639_s10 + $0x490] sm:$0xff]  ;;  %v599_v14 = vld [vmem:[%s11639_s10 + $0x578] sm:$0xff] }
 0x3a0   :  { %12063 = vst [vmem:[#allocation62_spill] sm:$0xff] %v8000_v36  ;;  %12064 = vst [vmem:[#allocation63_spill] sm:$0xff] %v8022_v4  ;;  %v591_v39 = vld [vmem:[%s11639_s10 + $0x538] sm:$0xff]  ;;  %v601_v49 = vld [vmem:[%s11639_s10 + $0x588] sm:$0xff] }
 0x3a1   :  { %12065 = vst [vmem:[#allocation64_spill] sm:$0xff] %v8024_v7  ;;  %12066 = vst [vmem:[#allocation65_spill] sm:$0xff] %v8034_v37 }
 0x3a2   :  { %5423 = vmatpush1.bf16.msra.mxu1 %v7986_v45  ;;  %5463 = vmatpush1.bf16.msra.mxu0 %v7988_v57  ;;  %v8036_v45 = vpack.c.bf16 %v581_v32, %v571_v28  ;;  %v8058_v28 = vpack.c.bf16 %v578_v40, %v568_v6  ;;  %v8060_v32 = vpack.c.bf16 %v580_v51, %v570_v52  ;;  %v598_v57 = vld [vmem:[%s11639_s10 + $0x570] sm:$0xff]  ;;  %v600_v40 = vld [vmem:[%s11639_s10 + $0x580] sm:$0xff]  ;;  %v609_v52 = vld [vmem:[%s11639_s10 + $0x5c8] sm:$0xff] }
 0x3a3   :  { %5425 = vmatprep.subr.bf16.mxu1 %v7998_v54  ;;  %5465 = vmatprep.subr.bf16.mxu0 %v8000_v36  ;;  %v588_v36 = vld [vmem:[%s11639_s10 + $0x520] sm:$0xff]  ;;  %v8070_v54 = vpack.c.bf16 %v599_v14, %v589_v35  ;;  %v590_v6 = vld [vmem:[%s11639_s10 + $0x530] sm:$0xff]  ;;  %v619_v51 = vld [vmem:[%s11639_s10 + $0x618] sm:$0xff] }
 0x3a4   :  { %12067 = vst [vmem:[#allocation66_spill] sm:$0xff] %v8036_v45  ;;  %12068 = vst [vmem:[#allocation67_spill] sm:$0xff] %v8058_v28  ;;  %v611_v35 = vld [vmem:[%s11639_s10 + $0x5d8] sm:$0xff]  ;;  %v621_v14 = vld [vmem:[%s11639_s10 + $0x628] sm:$0xff] }
 0x3a5   :  { %12069 = vst [vmem:[#allocation68_spill] sm:$0xff] %v8060_v32  ;;  %12070 = vst [vmem:[#allocation69_spill] sm:$0xff] %v8070_v54 }
 0x3a6   :  { %5427 = vmatpush1.bf16.msra.mxu1 %v8022_v4  ;;  %5467 = vmatpush1.bf16.msra.mxu0 %v8024_v7  ;;  %v8072_v4 = vpack.c.bf16 %v601_v49, %v591_v39  ;;  %v8094_v39 = vpack.c.bf16 %v598_v57, %v588_v36  ;;  %v8096_v49 = vpack.c.bf16 %v600_v40, %v590_v6  ;;  %v618_v7 = vld [vmem:[%s11639_s10 + $0x610] sm:$0xff]  ;;  %v620_v57 = vld [vmem:[%s11639_s10 + $0x620] sm:$0xff]  ;;  %v433_v6 = vld [vmem:[%s11639_s10 + $0x48] sm:$0xff] }
 0x3a7   :  { %5429 = vmatprep.subr.bf16.mxu1 %v8034_v37  ;;  %5469 = vmatprep.subr.bf16.mxu0 %v8036_v45  ;;  %v608_v45 = vld [vmem:[%s11639_s10 + $0x5c0] sm:$0xff]  ;;  %v8106_v37 = vpack.c.bf16 %v619_v51, %v609_v52  ;;  %v610_v36 = vld [vmem:[%s11639_s10 + $0x5d0] sm:$0xff]  ;;  %v443_v40 = vld [vmem:[%s11639_s10 + $0x98] sm:$0xff] }
 0x3a8   :  { %12071 = vst [vmem:[#allocation70_spill] sm:$0xff] %v8072_v4  ;;  %12072 = vst [vmem:[#allocation71_spill] sm:$0xff] %v8094_v39  ;;  %v1008_v52 = vld [vmem:[%s11640_s11 + $0x80] sm:$0xff]  ;;  %v1009_v51 = vld [vmem:[%s11640_s11 + $0x88] sm:$0xff] }
 0x3a9   :  { %12073 = vst [vmem:[#allocation72_spill] sm:$0xff] %v8096_v49  ;;  %12074 = vst [vmem:[#allocation73_spill] sm:$0xff] %v8106_v37 }
 0x3aa   :  { %5431 = vmatpush1.bf16.msra.mxu1 %v8058_v28  ;;  %5471 = vmatpush1.bf16.msra.mxu0 %v8060_v32  ;;  %v8108_v28 = vpack.c.bf16 %v621_v14, %v611_v35  ;;  %v8130_v35 = vpack.c.bf16 %v618_v7, %v608_v45  ;;  %v8132_v14 = vpack.c.bf16 %v620_v57, %v610_v36  ;;  %v432_v32 = vld [vmem:[%s11639_s10 + $0x40] sm:$0xff]  ;;  %v453_v45 = vld [vmem:[%s11639_s10 + $0xe8] sm:$0xff]  ;;  %v463_v36 = vld [vmem:[%s11639_s10 + $0x138] sm:$0xff] }
 0x3ab   :  { %5433 = vmatprep.subr.bf16.mxu1 %v8070_v54  ;;  %5473 = vmatprep.subr.bf16.mxu0 %v8072_v4  ;;  %v8136_v4 = vpack.c.bf16 %v443_v40, %v433_v6  ;;  %v8147_v7 = vpack.c.bf16 %v1009_v51, %v1008_v52  ;;  %v992_v57 = vld [vmem:[%s11640_s11] sm:$0xff]  ;;  %v993_v6 = vld [vmem:[%s11640_s11 + $0x8] sm:$0xff]  ;;  %v1010_v40 = vld [vmem:[%s11640_s11 + $0x90] sm:$0xff] }
 0x3ac   :  { %12075 = vst [vmem:[#allocation74_spill] sm:$0xff] %v8108_v28  ;;  %12076 = vst [vmem:[#allocation75_spill] sm:$0xff] %v8130_v35  ;;  %v1011_v52 = vld [vmem:[%s11640_s11 + $0x98] sm:$0xff] }
 0x3ad   :  { %12077 = vst [vmem:[#allocation76_spill] sm:$0xff] %v8132_v14  ;;  %12078 = vst [vmem:[#allocation77_spill] sm:$0xff] %v8136_v4  ;;  %v1059_v54 = vld [vmem:[%s11640_s11 + $0x218] sm:$0xff] }
 0x3ae   :  { %5435 = vmatpush1.bf16.msra.mxu1 %v8094_v39  ;;  %5475 = vmatpush1.bf16.msra.mxu0 %v8096_v49  ;;  %v442_v39 = vld [vmem:[%s11639_s10 + $0x90] sm:$0xff]  ;;  %12079 = vst [vmem:[#allocation78_spill] sm:$0xff] %v8147_v7  ;;  %v452_v49 = vld [vmem:[%s11639_s10 + $0xe0] sm:$0xff] }
 0x3af   :  { %5437 = vmatprep.subr.bf16.mxu1 %v8106_v37  ;;  %5477 = vmatprep.subr.bf16.mxu0 %v8108_v28  ;;  %v8166_v51 = vpack.c.bf16 %v442_v39, %v432_v32  ;;  %v8169_v28 = vpack.c.bf16 %v463_v36, %v453_v45  ;;  %v462_v37 = vld [vmem:[%s11639_s10 + $0x130] sm:$0xff]  ;;  %v8181_v32 = vpack.c.bf16 %v993_v6, %v992_v57  ;;  %v483_v39 = vld [vmem:[%s11639_s10 + $0x1d8] sm:$0xff]  ;;  %v1012_v57 = vld [vmem:[%s11640_s11 + $0xa0] sm:$0xff] }
 0x3b0   :  { %v8186_v45 = vpack.c.bf16 %v1011_v52, %v1010_v40  ;;  %v994_v36 = vld [vmem:[%s11640_s11 + $0x10] sm:$0xff]  ;;  %v1013_v6 = vld [vmem:[%s11640_s11 + $0xa8] sm:$0xff]  ;;  %v8205_v40 = vpack.c.bf16 %v462_v37, %v452_v49 }
 0x3b1   :  { %12080 = vst [vmem:[#allocation79_spill] sm:$0xff] %v8166_v51  ;;  %12081 = vst [vmem:[#allocation80_spill] sm:$0xff] %v8169_v28  ;;  %v8226_v49 = vpack.c.bf16 %v1013_v6, %v1012_v57 }
 0x3b2   :  { %5439 = vmatpush1.bf16.msra.mxu1 %v8130_v35  ;;  %5479 = vmatpush1.bf16.msra.mxu0 %v8132_v14  ;;  %v473_v35 = vld [vmem:[%s11639_s10 + $0x188] sm:$0xff]  ;;  %12082 = vst [vmem:[#allocation81_spill] sm:$0xff] %v8181_v32  ;;  %12083 = vst [vmem:[#allocation82_spill] sm:$0xff] %v8186_v45  ;;  %v482_v14 = vld [vmem:[%s11639_s10 + $0x1d0] sm:$0xff] }
 0x3b3   :  { %5481 = vmatprep.subr.bf16.mxu1 %v8136_v4  ;;  %5521 = vmatprep.subr.bf16.mxu0 %v8147_v7  ;;  %v995_v4 = vld [vmem:[%s11640_s11 + $0x18] sm:$0xff]  ;;  %12084 = vst [vmem:[#allocation83_spill] sm:$0xff] %v8205_v40  ;;  %v8208_v52 = vpack.c.bf16 %v483_v39, %v473_v35  ;;  %v472_v7 = vld [vmem:[%s11639_s10 + $0x180] sm:$0xff]  ;;  %12087 = vst [vmem:[#allocation86_spill] sm:$0xff] %v8226_v49 }
 0x3b4   :  { %v8220_v37 = vpack.c.bf16 %v995_v4, %v994_v36  ;;  %v996_v35 = vld [vmem:[%s11640_s11 + $0x20] sm:$0xff]  ;;  %v997_v39 = vld [vmem:[%s11640_s11 + $0x28] sm:$0xff]  ;;  %v1014_v4 = vld [vmem:[%s11640_s11 + $0xb0] sm:$0xff]  ;;  %v8241_v57 = vpack.c.bf16 %v482_v14, %v472_v7 }
 0x3b5   :  { %834 = vmatmul.mubr.f32.vlgmr.msra.gmra.mrb[6].mxu1 %v7784_v3  ;;  %905 = vmatmul.mubr.f32.vlgmr.msra.gmra.mrb[6].mxu0 %v7784_v3  ;;  %12085 = vst [vmem:[#allocation84_spill] sm:$0xff] %v8208_v52  ;;  %v1015_v36 = vld [vmem:[%s11640_s11 + $0xb8] sm:$0xff]  ;;  %v8256_v14 = vpack.c.bf16 %v997_v39, %v996_v35  ;;  %v1016_v35 = vld [vmem:[%s11640_s11 + $0xc0] sm:$0xff]  ;;  %v1017_v39 = vld [vmem:[%s11640_s11 + $0xc8] sm:$0xff] }
 0x3b6   :  { %5483 = vmatpush1.bf16.msra.mxu1 %v8166_v51  ;;  %4768 = vmatprep.mubr.msk.f32.mxu1 %vm257_vm2, %v7796_v58  ;;  %v493_v51 = vld [vmem:[%s11639_s10 + $0x228] sm:$0xff]  ;;  %12086 = vst [vmem:[#allocation85_spill] sm:$0xff] %v8220_v37  ;;  %v503_v58 = vld [vmem:[%s11639_s10 + $0x278] sm:$0xff]  ;;  %12088 = vst [vmem:[#allocation87_spill] sm:$0xff] %v8241_v57 }
 0x3b7   :  { %5485 = vmatprep.subr.bf16.mxu1 %v8169_v28  ;;  %5523 = vmatpush3.bf16.msra.mxu0 %v8181_v32  ;;  %v8244_v6 = vpack.c.bf16 %v503_v58, %v493_v51  ;;  %v502_v32 = vld [vmem:[%s11639_s10 + $0x270] sm:$0xff]  ;;  %v513_v28 = vld [vmem:[%s11639_s10 + $0x2c8] sm:$0xff]  ;;  %12090 = vst [vmem:[#allocation89_spill] sm:$0xff] %v8256_v14  ;;  %v523_v7 = vld [vmem:[%s11639_s10 + $0x318] sm:$0xff]  ;;  %v8262_v51 = vpack.c.bf16 %v1015_v36, %v1014_v4 }
 0x3b8   :  { %5525 = vmatprep.subr.bf16.mxu0 %v8186_v45  ;;  %v492_v45 = vld [vmem:[%s11639_s10 + $0x220] sm:$0xff]  ;;  %v998_v58 = vld [vmem:[%s11640_s11 + $0x30] sm:$0xff]  ;;  %v8280_v36 = vpack.c.bf16 %v523_v7, %v513_v28  ;;  %v543_v28 = vld [vmem:[%s11639_s10 + $0x3b8] sm:$0xff] }
 0x3b9   :  { %12089 = vst [vmem:[#allocation88_spill] sm:$0xff] %v8244_v6  ;;  %12091 = vst [vmem:[#allocation90_spill] sm:$0xff] %v8262_v51  ;;  %v8277_v4 = vpack.c.bf16 %v502_v32, %v492_v45  ;;  %v8298_v45 = vpack.c.bf16 %v1017_v39, %v1016_v35  ;;  %v1000_v7 = vld [vmem:[%s11640_s11 + $0x40] sm:$0xff] }
 0x3ba   :  { %5487 = vmatpush1.bf16.msra.mxu1 %v8205_v40  ;;  %12093 = vst [vmem:[#allocation92_spill] sm:$0xff] %v8280_v36  ;;  %v533_v40 = vld [vmem:[%s11639_s10 + $0x368] sm:$0xff] }
 0x3bb   :  { %5489 = vmatprep.subr.bf16.mxu1 %v8208_v52  ;;  %5527 = vmatpush3.bf16.msra.mxu0 %v8220_v37  ;;  %v999_v52 = vld [vmem:[%s11640_s11 + $0x38] sm:$0xff]  ;;  %12092 = vst [vmem:[#allocation91_spill] sm:$0xff] %v8277_v4  ;;  %v522_v37 = vld [vmem:[%s11639_s10 + $0x310] sm:$0xff]  ;;  %12095 = vst [vmem:[#allocation94_spill] sm:$0xff] %v8298_v45  ;;  %v8316_v39 = vpack.c.bf16 %v543_v28, %v533_v40 }
 0x3bc   :  { %5529 = vmatprep.subr.bf16.mxu0 %v8226_v49  ;;  %v512_v49 = vld [vmem:[%s11639_s10 + $0x2c0] sm:$0xff]  ;;  %v8292_v32 = vpack.c.bf16 %v999_v52, %v998_v58  ;;  %v1018_v52 = vld [vmem:[%s11640_s11 + $0xd0] sm:$0xff]  ;;  %v1019_v58 = vld [vmem:[%s11640_s11 + $0xd8] sm:$0xff] }
 0x3bd   :  { %v8313_v35 = vpack.c.bf16 %v522_v37, %v512_v49  ;;  %12097 = vst [vmem:[#allocation96_spill] sm:$0xff] %v8316_v39  ;;  %v563_v40 = vld [vmem:[%s11639_s10 + $0x458] sm:$0xff]  ;;  %v8334_v49 = vpack.c.bf16 %v1019_v58, %v1018_v52  ;;  %v1002_v28 = vld [vmem:[%s11640_s11 + $0x50] sm:$0xff] }
 0x3be   :  { %5491 = vmatpush1.bf16.msra.mxu1 %v8241_v57  ;;  %12094 = vst [vmem:[#allocation93_spill] sm:$0xff] %v8292_v32  ;;  %v553_v57 = vld [vmem:[%s11639_s10 + $0x408] sm:$0xff] }
 0x3bf   :  { %5493 = vmatprep.subr.bf16.mxu1 %v8244_v6  ;;  %5531 = vmatpush3.bf16.msra.mxu0 %v8256_v14  ;;  %v1001_v6 = vld [vmem:[%s11640_s11 + $0x48] sm:$0xff]  ;;  %12096 = vst [vmem:[#allocation95_spill] sm:$0xff] %v8313_v35  ;;  %v542_v14 = vld [vmem:[%s11639_s10 + $0x3b0] sm:$0xff]  ;;  %12099 = vst [vmem:[#allocation98_spill] sm:$0xff] %v8334_v49  ;;  %v8352_v58 = vpack.c.bf16 %v563_v40, %v553_v57 }
 0x3c0   :  { %5533 = vmatprep.subr.bf16.mxu0 %v8262_v51  ;;  %v532_v51 = vld [vmem:[%s11639_s10 + $0x360] sm:$0xff]  ;;  %v8328_v37 = vpack.c.bf16 %v1001_v6, %v1000_v7  ;;  %v1021_v7 = vld [vmem:[%s11640_s11 + $0xe8] sm:$0xff]  ;;  %v583_v57 = vld [vmem:[%s11639_s10 + $0x4f8] sm:$0xff] }
 0x3c1   :  { %v1020_v6 = vld [vmem:[%s11640_s11 + $0xe0] sm:$0xff]  ;;  %v8349_v52 = vpack.c.bf16 %v542_v14, %v532_v51  ;;  %12101 = vst [vmem:[#allocation100_spill] sm:$0xff] %v8352_v58 }
 0x3c2   :  { %5495 = vmatpush1.bf16.msra.mxu1 %v8277_v4  ;;  %12098 = vst [vmem:[#allocation97_spill] sm:$0xff] %v8328_v37  ;;  %v573_v4 = vld [vmem:[%s11639_s10 + $0x4a8] sm:$0xff]  ;;  %v8370_v51 = vpack.c.bf16 %v1021_v7, %v1020_v6  ;;  %v1004_v40 = vld [vmem:[%s11640_s11 + $0x60] sm:$0xff]  ;;  %v582_v7 = vld [vmem:[%s11639_s10 + $0x4f0] sm:$0xff] }
 0x3c3   :  { %5497 = vmatprep.subr.bf16.mxu1 %v8280_v36  ;;  %5535 = vmatpush3.bf16.msra.mxu0 %v8292_v32  ;;  %v1003_v36 = vld [vmem:[%s11640_s11 + $0x58] sm:$0xff]  ;;  %12100 = vst [vmem:[#allocation99_spill] sm:$0xff] %v8349_v52  ;;  %v562_v32 = vld [vmem:[%s11639_s10 + $0x450] sm:$0xff]  ;;  %v572_v6 = vld [vmem:[%s11639_s10 + $0x4a0] sm:$0xff] }
 0x3c4   :  { %5537 = vmatprep.subr.bf16.mxu0 %v8298_v45  ;;  %v552_v45 = vld [vmem:[%s11639_s10 + $0x400] sm:$0xff]  ;;  %v8364_v14 = vpack.c.bf16 %v1003_v36, %v1002_v28  ;;  %12103 = vst [vmem:[#allocation102_spill] sm:$0xff] %v8370_v51  ;;  %v8382_v28 = vpack.c.bf16 %v583_v57, %v573_v4  ;;  %v603_v4 = vld [vmem:[%s11639_s10 + $0x598] sm:$0xff] }
 0x3c5   :  { %v8379_v36 = vpack.c.bf16 %v562_v32, %v552_v45  ;;  %v593_v32 = vld [vmem:[%s11639_s10 + $0x548] sm:$0xff]  ;;  %v8401_v45 = vpack.c.bf16 %v582_v7, %v572_v6  ;;  %v623_v6 = vld [vmem:[%s11639_s10 + $0x638] sm:$0xff] }
 0x3c6   :  { %5499 = vmatpush1.bf16.msra.mxu1 %v8313_v35  ;;  %12102 = vst [vmem:[#allocation101_spill] sm:$0xff] %v8364_v14  ;;  %12105 = vst [vmem:[#allocation104_spill] sm:$0xff] %v8382_v28  ;;  %v8404_v57 = vpack.c.bf16 %v603_v4, %v593_v32  ;;  %v612_v4 = vld [vmem:[%s11639_s10 + $0x5e0] sm:$0xff]  ;;  %v1058_v35 = vld [vmem:[%s11640_s11 + $0x210] sm:$0xff] }
 0x3c7   :  { %5501 = vmatprep.subr.bf16.mxu1 %v8316_v39  ;;  %5539 = vmatpush3.bf16.msra.mxu0 %v8328_v37  ;;  %v1005_v39 = vld [vmem:[%s11640_s11 + $0x68] sm:$0xff]  ;;  %12104 = vst [vmem:[#allocation103_spill] sm:$0xff] %v8379_v36  ;;  %12107 = vst [vmem:[#allocation106_spill] sm:$0xff] %v8401_v45 }
 0x3c8   :  { %5541 = vmatprep.subr.bf16.mxu0 %v8334_v49  ;;  %v8391_v49 = vpack.c.bf16 %v1005_v39, %v1004_v40  ;;  %12108 = vst [vmem:[#allocation107_spill] sm:$0xff] %v8404_v57  ;;  %v592_v39 = vld [vmem:[%s11639_s10 + $0x540] sm:$0xff]  ;;  %v602_v40 = vld [vmem:[%s11639_s10 + $0x590] sm:$0xff]  ;;  %v1025_v37 = vld [vmem:[%s11640_s11 + $0x108] sm:$0xff] }
 0x3c9   :  { %v8420_v7 = vpack.c.bf16 %v602_v40, %v592_v39  ;;  %v1041_v39 = vld [vmem:[%s11640_s11 + $0x188] sm:$0xff] }
 0x3ca   :  { %5503 = vmatpush1.bf16.msra.mxu1 %v8349_v52  ;;  %12106 = vst [vmem:[#allocation105_spill] sm:$0xff] %v8391_v49 }
 0x3cb   :  { %5505 = vmatprep.subr.bf16.mxu1 %v8352_v58  ;;  %5543 = vmatpush3.bf16.msra.mxu0 %v8364_v14  ;;  %12109 = vst [vmem:[#allocation108_spill] sm:$0xff] %v8420_v7  ;;  %v1040_v14 = vld [vmem:[%s11640_s11 + $0x180] sm:$0xff] }
 0x3cc   :  { %5545 = vmatprep.subr.bf16.mxu0 %v8370_v51  ;;  %v613_v51 = vld [vmem:[%s11639_s10 + $0x5e8] sm:$0xff]  ;;  %v8441_v40 = vpack.c.bf16 %v1041_v39, %v1040_v14  ;;  %v1026_v39 = vld [vmem:[%s11640_s11 + $0x110] sm:$0xff] }
 0x3cd   :  { %v8423_v32 = vpack.c.bf16 %v623_v6, %v613_v51  ;;  %v1024_v6 = vld [vmem:[%s11640_s11 + $0x100] sm:$0xff] }
 0x3ce   :  { %5507 = vmatpush1.bf16.msra.mxu1 %v8379_v36  ;;  %12112 = vst [vmem:[#allocation111_spill] sm:$0xff] %v8441_v40  ;;  %v8456_v14 = vpack.c.bf16 %v1025_v37, %v1024_v6  ;;  %v1045_v37 = vld [vmem:[%s11640_s11 + $0x1a8] sm:$0xff]  ;;  %v1028_v6 = vld [vmem:[%s11640_s11 + $0x120] sm:$0xff] }
 0x3cf   :  { %5509 = vmatprep.subr.bf16.mxu1 %v8382_v28  ;;  %5547 = vmatpush3.bf16.msra.mxu0 %v8391_v49  ;;  %12110 = vst [vmem:[#allocation109_spill] sm:$0xff] %v8423_v32  ;;  %v622_v49 = vld [vmem:[%s11639_s10 + $0x630] sm:$0xff]  ;;  %v1031_v28 = vld [vmem:[%s11640_s11 + $0x138] sm:$0xff] }
 0x3d0   :  { %v8438_v51 = vpack.c.bf16 %v622_v49, %v612_v4  ;;  %v1043_v49 = vld [vmem:[%s11640_s11 + $0x198] sm:$0xff]  ;;  %12113 = vst [vmem:[#allocation112_spill] sm:$0xff] %v8456_v14 }
 0x3d2   :  { %5511 = vmatpush1.bf16.msra.mxu1 %v8401_v45  ;;  %12111 = vst [vmem:[#allocation110_spill] sm:$0xff] %v8438_v51 }
 0x3d3   :  { %5513 = vmatprep.subr.bf16.mxu1 %v8404_v57  ;;  %v1042_v57 = vld [vmem:[%s11640_s11 + $0x190] sm:$0xff] }
 0x3d4   :  { %v8459_v4 = vpack.c.bf16 %v1043_v49, %v1042_v57  ;;  %v1029_v49 = vld [vmem:[%s11640_s11 + $0x128] sm:$0xff] }
 0x3d5   :  { %v8509_v45 = vpack.c.bf16 %v1029_v49, %v1028_v6  ;;  %v1048_v6 = vld [vmem:[%s11640_s11 + $0x1c0] sm:$0xff]  ;;  %v1049_v49 = vld [vmem:[%s11640_s11 + $0x1c8] sm:$0xff] }
 0x3d6   :  { %5515 = vmatpush1.bf16.msra.mxu1 %v8420_v7  ;;  %12114 = vst [vmem:[#allocation113_spill] sm:$0xff] %v8459_v4  ;;  %v1044_v7 = vld [vmem:[%s11640_s11 + $0x1a0] sm:$0xff] }
 0x3d7   :  { %5517 = vmatprep.subr.bf16.mxu1 %v8423_v32  ;;  %v1027_v32 = vld [vmem:[%s11640_s11 + $0x118] sm:$0xff]  ;;  %12119 = vst [vmem:[#allocation118_spill] sm:$0xff] %v8509_v45 }
 0x3d8   :  { %v8475_v57 = vpack.c.bf16 %v1027_v32, %v1026_v39  ;;  %v1022_v32 = vld [vmem:[%s11640_s11 + $0xf0] sm:$0xff]  ;;  %v1023_v39 = vld [vmem:[%s11640_s11 + $0xf8] sm:$0xff] }
 0x3da   :  { %5519 = vmatpush1.bf16.msra.mxu1 %v8438_v51  ;;  %12115 = vst [vmem:[#allocation114_spill] sm:$0xff] %v8475_v57  ;;  %v8498_v51 = vpack.c.bf16 %v1023_v39, %v1022_v32  ;;  %v1030_v39 = vld [vmem:[%s11640_s11 + $0x130] sm:$0xff] }
 0x3db   :  { %5553 = vmatprep.subr.bf16.mxu1 %v8441_v40  ;;  %v8484_v40 = vpack.c.bf16 %v1045_v37, %v1044_v7  ;;  %v1006_v7 = vld [vmem:[%s11640_s11 + $0x70] sm:$0xff]  ;;  %v1007_v37 = vld [vmem:[%s11640_s11 + $0x78] sm:$0xff] }
 0x3dc   :  { %12117 = vst [vmem:[#allocation116_spill] sm:$0xff] %v8498_v51  ;;  %5549 = vmatprep.subr.bf16.mxu0 %v8498_v51 }
 0x3dd   :  { %976 = vmatmul.mubr.f32.vlgmr.msra.gmra.mrb[8].mxu1 %v7784_v3  ;;  %12116 = vst [vmem:[#allocation115_spill] sm:$0xff] %v8484_v40  ;;  %v1046_v3 = vld [vmem:[%s11640_s11 + $0x1b0] sm:$0xff] }
 0x3de   :  { %5555 = vmatpush3.bf16.msra.mxu1 %v8456_v14  ;;  %v1047_v14 = vld [vmem:[%s11640_s11 + $0x1b8] sm:$0xff] }
 0x3df   :  { %5557 = vmatprep.subr.bf16.mxu1 %v8459_v4  ;;  %v8506_v4 = vpack.c.bf16 %v1007_v37, %v1006_v7  ;;  %v8513_v32 = vpack.c.bf16 %v1047_v14, %v1046_v3  ;;  %v1072_v14 = vld [vmem:[%s11640_s11 + $0x280] sm:$0xff]  ;;  %v1073_v3 = vld [vmem:[%s11640_s11 + $0x288] sm:$0xff]  ;;  %v8535_v7 = vpack.c.bf16 %v1031_v28, %v1030_v39  ;;  %v1051_v28 = vld [vmem:[%s11640_s11 + $0x1d8] sm:$0xff] }
 0x3e0   :  { %v8537_v37 = vpack.c.bf16 %v1073_v3, %v1072_v14  ;;  %v1035_v14 = vld [vmem:[%s11640_s11 + $0x158] sm:$0xff]  ;;  %v1052_v3 = vld [vmem:[%s11640_s11 + $0x1e0] sm:$0xff] }
 0x3e1   :  { %12118 = vst [vmem:[#allocation117_spill] sm:$0xff] %v8506_v4  ;;  %12120 = vst [vmem:[#allocation119_spill] sm:$0xff] %v8513_v32  ;;  %5551 = vmatpush3.bf16.msra.mxu0 %v8506_v4  ;;  %v1033_v4 = vld [vmem:[%s11640_s11 + $0x148] sm:$0xff] }
 0x3e2   :  { %5559 = vmatpush3.bf16.msra.mxu1 %v8475_v57  ;;  %12121 = vst [vmem:[#allocation120_spill] sm:$0xff] %v8535_v7  ;;  %v1032_v57 = vld [vmem:[%s11640_s11 + $0x140] sm:$0xff]  ;;  %5585 = vmatprep.subr.bf16.mxu0 %v8537_v37 }
 0x3e3   :  { %5561 = vmatprep.subr.bf16.mxu1 %v8484_v40  ;;  %v8540_v40 = vpack.c.bf16 %v1049_v49, %v1048_v6  ;;  %v8556_v39 = vpack.c.bf16 %v1033_v4, %v1032_v57  ;;  %v1034_v49 = vld [vmem:[%s11640_s11 + $0x150] sm:$0xff]  ;;  %v1053_v4 = vld [vmem:[%s11640_s11 + $0x1e8] sm:$0xff] }
 0x3e4   :  { %v8577_v57 = vpack.c.bf16 %v1053_v4, %v1052_v3  ;;  %v1038_v4 = vld [vmem:[%s11640_s11 + $0x170] sm:$0xff] }
 0x3e5   :  { %12122 = vst [vmem:[#allocation121_spill] sm:$0xff] %v8540_v40  ;;  %12123 = vst [vmem:[#allocation122_spill] sm:$0xff] %v8556_v39 }
 0x3e6   :  { %5563 = vmatpush3.bf16.msra.mxu1 %v8509_v45  ;;  %v1050_v45 = vld [vmem:[%s11640_s11 + $0x1d0] sm:$0xff]  ;;  %12126 = vst [vmem:[#allocation125_spill] sm:$0xff] %v8577_v57 }
 0x3e7   :  { %5565 = vmatprep.subr.bf16.mxu1 %v8513_v32  ;;  %v8559_v6 = vpack.c.bf16 %v1051_v28, %v1050_v45  ;;  %v8574_v45 = vpack.c.bf16 %v1035_v14, %v1034_v49  ;;  %v1036_v28 = vld [vmem:[%s11640_s11 + $0x160] sm:$0xff]  ;;  %v1055_v49 = vld [vmem:[%s11640_s11 + $0x1f8] sm:$0xff] }
 0x3e9   :  { %12124 = vst [vmem:[#allocation123_spill] sm:$0xff] %v8559_v6  ;;  %12125 = vst [vmem:[#allocation124_spill] sm:$0xff] %v8574_v45 }
 0x3ea   :  { %5567 = vmatpush3.bf16.msra.mxu1 %v8535_v7  ;;  %v1054_v7 = vld [vmem:[%s11640_s11 + $0x1f0] sm:$0xff] }
 0x3eb   :  { %5569 = vmatprep.subr.bf16.mxu1 %v8540_v40  ;;  %v1037_v40 = vld [vmem:[%s11640_s11 + $0x168] sm:$0xff]  ;;  %v8595_v3 = vpack.c.bf16 %v1055_v49, %v1054_v7  ;;  %v1056_v49 = vld [vmem:[%s11640_s11 + $0x200] sm:$0xff] }
 0x3ec   :  { %v8592_v14 = vpack.c.bf16 %v1037_v40, %v1036_v28  ;;  %v1105_v40 = vld [vmem:[%s11640_s11 + $0x388] sm:$0xff] }
 0x3ed   :  { %12128 = vst [vmem:[#allocation127_spill] sm:$0xff] %v8595_v3 }
 0x3ee   :  { %5571 = vmatpush3.bf16.msra.mxu1 %v8556_v39  ;;  %12127 = vst [vmem:[#allocation126_spill] sm:$0xff] %v8592_v14  ;;  %v1104_v39 = vld [vmem:[%s11640_s11 + $0x380] sm:$0xff] }
 0x3ef   :  { %5573 = vmatprep.subr.bf16.mxu1 %v8559_v6  ;;  %v1039_v6 = vld [vmem:[%s11640_s11 + $0x178] sm:$0xff]  ;;  %v8613_v28 = vpack.c.bf16 %v1105_v40, %v1104_v39  ;;  %v1089_v39 = vld [vmem:[%s11640_s11 + $0x308] sm:$0xff] }
 0x3f0   :  { %v8610_v7 = vpack.c.bf16 %v1039_v6, %v1038_v4  ;;  %v1088_v6 = vld [vmem:[%s11640_s11 + $0x300] sm:$0xff]  ;;  %v1074_v4 = vld [vmem:[%s11640_s11 + $0x290] sm:$0xff] }
 0x3f1   :  { %12130 = vst [vmem:[#allocation129_spill] sm:$0xff] %v8613_v28  ;;  %v8645_v52 = vpack.c.bf16 %v1089_v39, %v1088_v6  ;;  %v1061_v6 = vld [vmem:[%s11640_s11 + $0x228] sm:$0xff]  ;;  %v1078_v39 = vld [vmem:[%s11640_s11 + $0x2b0] sm:$0xff] }
 0x3f2   :  { %5575 = vmatpush3.bf16.msra.mxu1 %v8574_v45  ;;  %12129 = vst [vmem:[#allocation128_spill] sm:$0xff] %v8610_v7 }
 0x3f3   :  { %5577 = vmatprep.subr.bf16.mxu1 %v8577_v57  ;;  %v1057_v57 = vld [vmem:[%s11640_s11 + $0x208] sm:$0xff]  ;;  %12131 = vst [vmem:[#allocation130_spill] sm:$0xff] %v8645_v52 }
 0x3f4   :  { %v8643_v58 = vpack.c.bf16 %v1057_v57, %v1056_v49  ;;  %v1091_v57 = vld [vmem:[%s11640_s11 + $0x318] sm:$0xff]  ;;  %v1076_v49 = vld [vmem:[%s11640_s11 + $0x2a0] sm:$0xff] }
 0x3f6   :  { %5579 = vmatpush3.bf16.msra.mxu1 %v8592_v14  ;;  %v1107_v14 = vld [vmem:[%s11640_s11 + $0x398] sm:$0xff] }
 0x3f7   :  { %5581 = vmatprep.subr.bf16.mxu1 %v8595_v3  ;;  %v1106_v3 = vld [vmem:[%s11640_s11 + $0x390] sm:$0xff] }
 0x3fa   :  { %5583 = vmatpush3.bf16.msra.mxu1 %v8610_v7  ;;  %v1075_v7 = vld [vmem:[%s11640_s11 + $0x298] sm:$0xff] }
 0x3fb   :  { %5617 = vmatprep.subr.bf16.mxu1 %v8613_v28  ;;  %v8655_v22 = vpack.c.bf16 %v1075_v7, %v1074_v4  ;;  %v1077_v7 = vld [vmem:[%s11640_s11 + $0x2a8] sm:$0xff]  ;;  %v1079_v4 = vld [vmem:[%s11640_s11 + $0x2b8] sm:$0xff] }
 0x460   :  { %v693_v40 = vpop.f32.mrb[4].mxu1  ;;  %v764_v28 = vpop.f32.mrb[4].mxu0 }
 0x461   :  { %v695_v45 = vpop.f32.mrb[5].mxu1  ;;  %v766_v32 = vpop.f32.mrb[5].mxu0  ;;  %v982_v31 = vmul.f32 %v693_v40, %v7349_v30  ;;  %v984_v26 = vmul.f32 %v764_v28, %v7349_v30  ;;  %v1060_v28 = vld [vmem:[%s11640_s11 + $0x220] sm:$0xff]  ;;  %v1110_v40 = vld [vmem:[%s11640_s11 + $0x3b0] sm:$0xff] }
 0x462   :  { %v983_v51 = vmul.f32 %v695_v45, %v7349_v30  ;;  %v985_v36 = vmul.f32 %v766_v32, %v7349_v30  ;;  %v8657_v45 = vpack.c.bf16 %v1107_v14, %v1106_v3  ;;  %v1090_v32 = vld [vmem:[%s11640_s11 + $0x310] sm:$0xff]  ;;  %v1108_v14 = vld [vmem:[%s11640_s11 + $0x3a0] sm:$0xff]  ;;  %v1109_v3 = vld [vmem:[%s11640_s11 + $0x3a8] sm:$0xff] }
 0x464   :  { %12132 = vst [vmem:[#allocation131_spill] sm:$0xff] %v8657_v45  ;;  %1216 = vmatprep.mubr.f32.mxu0 %v983_v51  ;;  %1286 = vmatprep.mubr.f32.mxu1 %v985_v36  ;;  %v8679_v51 = vpack.c.bf16 %v1059_v54, %v1058_v35  ;;  %v8681_v36 = vpack.c.bf16 %v1091_v57, %v1090_v32  ;;  %v1092_v54 = vld [vmem:[%s11640_s11 + $0x320] sm:$0xff]  ;;  %v1093_v35 = vld [vmem:[%s11640_s11 + $0x328] sm:$0xff]  ;;  %v1111_v32 = vld [vmem:[%s11640_s11 + $0x3b8] sm:$0xff] }
 0x465   :  { %1217 = vmatmul.mubr.f32.vlgmr.msra.gmra.mrb[8].mxu0 %v982_v31  ;;  %1287 = vmatmul.mubr.f32.vlgmr.msra.gmra.mrb[10].mxu1 %v984_v26  ;;  %v8691_v26 = vpack.c.bf16 %v1077_v7, %v1076_v49  ;;  %v8693_v31 = vpack.c.bf16 %v1109_v3, %v1108_v14  ;;  %v8715_v57 = vpack.c.bf16 %v1061_v6, %v1060_v28  ;;  %v1062_v7 = vld [vmem:[%s11640_s11 + $0x230] sm:$0xff]  ;;  %v1063_v14 = vld [vmem:[%s11640_s11 + $0x238] sm:$0xff] }
 0x466   :  { %5587 = vmatpush3.bf16.msra.mxu0 %v8643_v58  ;;  %5619 = vmatpush3.bf16.msra.mxu1 %v8645_v52  ;;  %12133 = vst [vmem:[#allocation132_spill] sm:$0xff] %v8681_v36  ;;  %v8717_v49 = vpack.c.bf16 %v1093_v35, %v1092_v54  ;;  %v8727_v3 = vpack.c.bf16 %v1079_v4, %v1078_v39  ;;  %v1094_v28 = vld [vmem:[%s11640_s11 + $0x330] sm:$0xff]  ;;  %v1095_v6 = vld [vmem:[%s11640_s11 + $0x338] sm:$0xff]  ;;  %v1080_v54 = vld [vmem:[%s11640_s11 + $0x2c0] sm:$0xff] }
 0x467   :  { %5589 = vmatprep.subr.bf16.mxu0 %v8655_v22  ;;  %5621 = vmatprep.subr.bf16.mxu1 %v8657_v45  ;;  %12134 = vst [vmem:[#allocation133_spill] sm:$0xff] %v8693_v31  ;;  %v8729_v45 = vpack.c.bf16 %v1111_v32, %v1110_v40  ;;  %v1081_v35 = vld [vmem:[%s11640_s11 + $0x2c8] sm:$0xff]  ;;  %v1112_v39 = vld [vmem:[%s11640_s11 + $0x3c0] sm:$0xff]  ;;  %v8751_v40 = vpack.c.bf16 %v1063_v14, %v1062_v7 }
 0x468   :  { %12135 = vst [vmem:[#allocation134_spill] sm:$0xff] %v8717_v49  ;;  %v1113_v4 = vld [vmem:[%s11640_s11 + $0x3c8] sm:$0xff]  ;;  %v8753_v32 = vpack.c.bf16 %v1095_v6, %v1094_v28  ;;  %v8763_v52 = vpack.c.bf16 %v1081_v35, %v1080_v54  ;;  %v1096_v7 = vld [vmem:[%s11640_s11 + $0x340] sm:$0xff]  ;;  %v1082_v28 = vld [vmem:[%s11640_s11 + $0x2d0] sm:$0xff] }
 0x469   :  { %12136 = vst [vmem:[#allocation135_spill] sm:$0xff] %v8729_v45  ;;  %v8765_v17 = vpack.c.bf16 %v1113_v4, %v1112_v39  ;;  %v1097_v14 = vld [vmem:[%s11640_s11 + $0x348] sm:$0xff]  ;;  %v1083_v6 = vld [vmem:[%s11640_s11 + $0x2d8] sm:$0xff]  ;;  %v1114_v54 = vld [vmem:[%s11640_s11 + $0x3d0] sm:$0xff] }
 0x46a   :  { %5591 = vmatpush3.bf16.msra.mxu0 %v8679_v51  ;;  %5623 = vmatpush3.bf16.msra.mxu1 %v8681_v36  ;;  %12137 = vst [vmem:[#allocation136_spill] sm:$0xff] %v8753_v32  ;;  %v1065_v36 = vld [vmem:[%s11640_s11 + $0x248] sm:$0xff]  ;;  %v1115_v35 = vld [vmem:[%s11640_s11 + $0x3d8] sm:$0xff]  ;;  %v8789_v4 = vpack.c.bf16 %v1097_v14, %v1096_v7  ;;  %v8799_v13 = vpack.c.bf16 %v1083_v6, %v1082_v28  ;;  %v1084_v7 = vld [vmem:[%s11640_s11 + $0x2e0] sm:$0xff] }
 0x46b   :  { %5593 = vmatprep.subr.bf16.mxu0 %v8691_v26  ;;  %5625 = vmatprep.subr.bf16.mxu1 %v8693_v31  ;;  %v1064_v31 = vld [vmem:[%s11640_s11 + $0x240] sm:$0xff]  ;;  %12138 = vst [vmem:[#allocation137_spill] sm:$0xff] %v8765_v17  ;;  %v8801_v8 = vpack.c.bf16 %v1115_v35, %v1114_v54  ;;  %v1085_v14 = vld [vmem:[%s11640_s11 + $0x2e8] sm:$0xff] }
 0x46c   :  { %v8787_v39 = vpack.c.bf16 %v1065_v36, %v1064_v31  ;;  %12139 = vst [vmem:[#allocation138_spill] sm:$0xff] %v8789_v4  ;;  %v1098_v36 = vld [vmem:[%s11640_s11 + $0x350] sm:$0xff]  ;;  %v1099_v31 = vld [vmem:[%s11640_s11 + $0x358] sm:$0xff]  ;;  %v1116_v28 = vld [vmem:[%s11640_s11 + $0x3e0] sm:$0xff]  ;;  %v8835_v1 = vpack.c.bf16 %v1085_v14, %v1084_v7 }
 0x46d   :  { %12140 = vst [vmem:[#allocation139_spill] sm:$0xff] %v8801_v8  ;;  %v1117_v6 = vld [vmem:[%s11640_s11 + $0x3e8] sm:$0xff]  ;;  %v8825_v35 = vpack.c.bf16 %v1099_v31, %v1098_v36  ;;  %v1086_v36 = vld [vmem:[%s11640_s11 + $0x2f0] sm:$0xff]  ;;  %v1087_v31 = vld [vmem:[%s11640_s11 + $0x2f8] sm:$0xff] }
 0x46e   :  { %5595 = vmatpush3.bf16.msra.mxu0 %v8715_v57  ;;  %5627 = vmatpush3.bf16.msra.mxu1 %v8717_v49  ;;  %v1067_v49 = vld [vmem:[%s11640_s11 + $0x258] sm:$0xff]  ;;  %v8837_v62 = vpack.c.bf16 %v1117_v6, %v1116_v28  ;;  %v1118_v7 = vld [vmem:[%s11640_s11 + $0x3f0] sm:$0xff] }
 0x46f   :  { %5597 = vmatprep.subr.bf16.mxu0 %v8727_v3  ;;  %5629 = vmatprep.subr.bf16.mxu1 %v8729_v45  ;;  %v1066_v45 = vld [vmem:[%s11640_s11 + $0x250] sm:$0xff]  ;;  %12141 = vst [vmem:[#allocation140_spill] sm:$0xff] %v8825_v35  ;;  %v1119_v14 = vld [vmem:[%s11640_s11 + $0x3f8] sm:$0xff] }
 0x470   :  { %v8823_v54 = vpack.c.bf16 %v1067_v49, %v1066_v45  ;;  %12142 = vst [vmem:[#allocation141_spill] sm:$0xff] %v8837_v62  ;;  %v1100_v45 = vld [vmem:[%s11640_s11 + $0x360] sm:$0xff]  ;;  %v1101_v49 = vld [vmem:[%s11640_s11 + $0x368] sm:$0xff]  ;;  %v8870_v59 = vpack.c.bf16 %v1119_v14, %v1118_v7  ;;  %v12146_v14 = vmov 0.0|0.0  }
 0x471   :  { %v8861_v6 = vpack.c.bf16 %v1101_v49, %v1100_v45  ;;  %v1136_v45 = vld [vmem:[%s11640_s11 + $0x480] sm:$0xff]  ;;  %v1137_v49 = vld [vmem:[%s11640_s11 + $0x488] sm:$0xff] }
 0x472   :  { %5599 = vmatpush3.bf16.msra.mxu0 %v8751_v40  ;;  %5631 = vmatpush3.bf16.msra.mxu1 %v8753_v32  ;;  %v1069_v32 = vld [vmem:[%s11640_s11 + $0x268] sm:$0xff]  ;;  %12144 = vst [vmem:[#allocation143_spill] sm:$0xff] %v8870_v59  ;;  %v8895_v7 = vpack.c.bf16 %v1137_v49, %v1136_v45  ;;  %v1138_v45 = vld [vmem:[%s11640_s11 + $0x490] sm:$0xff]  ;;  %v1139_v49 = vld [vmem:[%s11640_s11 + $0x498] sm:$0xff] }
 0x473   :  { %5601 = vmatprep.subr.bf16.mxu0 %v8763_v52  ;;  %5633 = vmatprep.subr.bf16.mxu1 %v8765_v17  ;;  %v1068_v17 = vld [vmem:[%s11640_s11 + $0x260] sm:$0xff]  ;;  %12143 = vst [vmem:[#allocation142_spill] sm:$0xff] %v8861_v6  ;;  %v8919_v16 = vpack.c.bf16 %v1139_v49, %v1138_v45  ;;  %v1127_v45 = vld [vmem:[%s11640_s11 + $0x438] sm:$0xff] }
 0x474   :  { %v8859_v28 = vpack.c.bf16 %v1069_v32, %v1068_v17  ;;  %v1102_v17 = vld [vmem:[%s11640_s11 + $0x370] sm:$0xff]  ;;  %v1103_v32 = vld [vmem:[%s11640_s11 + $0x378] sm:$0xff]  ;;  %v1144_v49 = vld [vmem:[%s11640_s11 + $0x4c0] sm:$0xff] }
 0x475   :  { %12148 = vst [vmem:[#allocation146_spill] sm:$0xff] %v8919_v16 }
 0x476   :  { %5603 = vmatpush3.bf16.msra.mxu0 %v8787_v39  ;;  %5635 = vmatpush3.bf16.msra.mxu1 %v8789_v4  ;;  %v8868_v4 = vpack.c.bf16 %v1087_v31, %v1086_v36  ;;  %v8891_v31 = vpack.c.bf16 %v1103_v32, %v1102_v17 }
 0x477   :  { %5605 = vmatprep.subr.bf16.mxu0 %v8799_v13  ;;  %5637 = vmatprep.subr.bf16.mxu1 %v8801_v8  ;;  %v1070_v8 = vld [vmem:[%s11640_s11 + $0x270] sm:$0xff] }
 0x478   :  { %12145 = vst [vmem:[#allocation144_spill] sm:$0xff] %v8891_v31 }
 0x47a   :  { %5607 = vmatpush3.bf16.msra.mxu0 %v8823_v54  ;;  %5639 = vmatpush3.bf16.msra.mxu1 %v8825_v35  ;;  %v1071_v35 = vld [vmem:[%s11640_s11 + $0x278] sm:$0xff] }
 0x47b   :  { %5609 = vmatprep.subr.bf16.mxu0 %v8835_v1  ;;  %5641 = vmatprep.subr.bf16.mxu1 %v8837_v62  ;;  %v8889_v36 = vpack.c.bf16 %v1071_v35, %v1070_v8  ;;  %v1120_v8 = vld [vmem:[%s11640_s11 + $0x400] sm:$0xff]  ;;  %v1121_v35 = vld [vmem:[%s11640_s11 + $0x408] sm:$0xff] }
 0x47c   :  { %v8915_v56 = vpack.c.bf16 %v1121_v35, %v1120_v8  ;;  %v8934_v8 = vpack.c.bf16 %v1123_v38, %v1122_v55  ;;  %v12150_v35 = vmov 0.0   ;;  %v1143_v38 = vld [vmem:[%s11640_s11 + $0x4b8] sm:$0xff] }
 0x47e   :  { %5611 = vmatpush3.bf16.msra.mxu0 %v8859_v28  ;;  %5643 = vmatpush3.bf16.msra.mxu1 %v8861_v6  ;;  %12147 = vst [vmem:[#allocation145_spill] sm:$0xff] %v8915_v56  ;;  %12149 = vst [vmem:[#allocation147_spill] sm:$0xff] %v8934_v8 }
 0x47f   :  { %5613 = vmatprep.subr.bf16.mxu0 %v8868_v4  ;;  %5645 = vmatprep.subr.bf16.mxu1 %v8870_v59 }
 0x482   :  { %5615 = vmatpush3.bf16.msra.mxu0 %v8889_v36  ;;  %5647 = vmatpush3.bf16.msra.mxu1 %v8891_v31 }
 0x483   :  { %5649 = vmatprep.subr.bf16.mxu0 %v8895_v7  ;;  %5680 = vmatprep.subr.bf16.mxu1 %v12146_v14 }
 0x488   :  { %v835_v17 = vpop.f32.mrb[6].mxu1  ;;  %v906_v32 = vpop.f32.mrb[6].mxu0 }
 0x489   :  { %v837_v31 = vpop.f32.mrb[7].mxu1  ;;  %v908_v59 = vpop.f32.mrb[7].mxu0  ;;  %v986_v53 = vmul.f32 %v835_v17, %v7349_v30  ;;  %v988_v50 = vmul.f32 %v906_v32, %v7349_v30  ;;  %v1126_v32 = vld [vmem:[%s11640_s11 + $0x430] sm:$0xff] }
 0x48a   :  { %v987_v6 = vmul.f32 %v837_v31, %v7349_v30  ;;  %v989_v62 = vmul.f32 %v908_v59, %v7349_v30  ;;  %v1140_v59 = vld [vmem:[%s11640_s11 + $0x4a0] sm:$0xff]  ;;  %v1141_v31 = vld [vmem:[%s11640_s11 + $0x4a8] sm:$0xff] }
 0x48c   :  { %1356 = vmatprep.mubr.f32.mxu0 %v987_v6  ;;  %1426 = vmatprep.mubr.f32.mxu1 %v989_v62  ;;  %v8939_v62 = vpack.c.bf16 %v1141_v31, %v1140_v59  ;;  %v1124_v6 = vld [vmem:[%s11640_s11 + $0x420] sm:$0xff]  ;;  %v1145_v59 = vld [vmem:[%s11640_s11 + $0x4c8] sm:$0xff]  ;;  %v8972_v31 = vpack.c.bf16 %v1127_v45, %v1126_v32  ;;  %v1147_v32 = vld [vmem:[%s11640_s11 + $0x4d8] sm:$0xff] }
 0x48d   :  { %1357 = vmatmul.mubr.f32.vlgmr.msra.gmra.mrb[10].mxu0 %v986_v53  ;;  %1427 = vmatmul.mubr.f32.vlgmr.msra.gmra.mrb[12].mxu1 %v988_v50  ;;  %v1125_v53 = vld [vmem:[%s11640_s11 + $0x428] sm:$0xff]  ;;  %v1142_v50 = vld [vmem:[%s11640_s11 + $0x4b0] sm:$0xff] }
 0x48e   :  { %5651 = vmatpush3.bf16.msra.mxu0 %v8915_v56  ;;  %5216 = vmatprep.mubr.msk.f32.mxu1 %vm7056_vm0, %v12150_v35  ;;  %12151 = vst [vmem:[#allocation148_spill] sm:$0xff] %v8939_v62  ;;  %v8954_v55 = vpack.c.bf16 %v1125_v53, %v1124_v6  ;;  %v8957_v17 = vpack.c.bf16 %v1143_v38, %v1142_v50  ;;  %12154 = vst [vmem:[#allocation151_spill] sm:$0xff] %v8972_v31  ;;  %v1128_v53 = vld [vmem:[%s11640_s11 + $0x440] sm:$0xff]  ;;  %v1129_v50 = vld [vmem:[%s11640_s11 + $0x448] sm:$0xff] }
 0x48f   :  { %5653 = vmatprep.subr.bf16.mxu0 %v8919_v16  ;;  %v8975_v6 = vpack.c.bf16 %v1145_v59, %v1144_v49  ;;  %v1146_v38 = vld [vmem:[%s11640_s11 + $0x4d0] sm:$0xff]  ;;  %v8990_v45 = vpack.c.bf16 %v1129_v50, %v1128_v53  ;;  %v1149_v53 = vld [vmem:[%s11640_s11 + $0x4e8] sm:$0xff] }
 0x490   :  { %12152 = vst [vmem:[#allocation149_spill] sm:$0xff] %v8954_v55  ;;  %12153 = vst [vmem:[#allocation150_spill] sm:$0xff] %v8957_v17  ;;  %v8993_v49 = vpack.c.bf16 %v1147_v32, %v1146_v38  ;;  %v1130_v59 = vld [vmem:[%s11640_s11 + $0x450] sm:$0xff]  ;;  %v1132_v32 = vld [vmem:[%s11640_s11 + $0x460] sm:$0xff] }
 0x491   :  { %12155 = vst [vmem:[#allocation152_spill] sm:$0xff] %v8975_v6  ;;  %12156 = vst [vmem:[#allocation153_spill] sm:$0xff] %v8990_v45 }
 0x492   :  { %5655 = vmatpush3.bf16.msra.mxu0 %v8934_v8  ;;  %12157 = vst [vmem:[#allocation154_spill] sm:$0xff] %v8993_v49 }
 0x493   :  { %5657 = vmatprep.subr.bf16.mxu0 %v8939_v62 }
 0x496   :  { %5659 = vmatpush3.bf16.msra.mxu0 %v8954_v55  ;;  %v1148_v55 = vld [vmem:[%s11640_s11 + $0x4e0] sm:$0xff] }
 0x497   :  { %5661 = vmatprep.subr.bf16.mxu0 %v8957_v17  ;;  %v1131_v17 = vld [vmem:[%s11640_s11 + $0x458] sm:$0xff]  ;;  %v9011_v38 = vpack.c.bf16 %v1149_v53, %v1148_v55  ;;  %v1134_v53 = vld [vmem:[%s11640_s11 + $0x470] sm:$0xff] }
 0x498   :  { %v9008_v50 = vpack.c.bf16 %v1131_v17, %v1130_v59  ;;  %v1151_v17 = vld [vmem:[%s11640_s11 + $0x4f8] sm:$0xff] }
 0x499   :  { %12159 = vst [vmem:[#allocation156_spill] sm:$0xff] %v9011_v38 }
 0x49a   :  { %5663 = vmatpush3.bf16.msra.mxu0 %v8972_v31  ;;  %12158 = vst [vmem:[#allocation155_spill] sm:$0xff] %v9008_v50  ;;  %v1150_v31 = vld [vmem:[%s11640_s11 + $0x4f0] sm:$0xff] }
 0x49b   :  { %5665 = vmatprep.subr.bf16.mxu0 %v8975_v6  ;;  %v1133_v6 = vld [vmem:[%s11640_s11 + $0x468] sm:$0xff]  ;;  %v9029_v59 = vpack.c.bf16 %v1151_v17, %v1150_v31 }
 0x49c   :  { %v9026_v55 = vpack.c.bf16 %v1133_v6, %v1132_v32 }
 0x49d   :  { %12161 = vst [vmem:[#allocation158_spill] sm:$0xff] %v9029_v59 }
 0x49e   :  { %5667 = vmatpush3.bf16.msra.mxu0 %v8990_v45  ;;  %12160 = vst [vmem:[#allocation157_spill] sm:$0xff] %v9026_v55 }
 0x49f   :  { %5669 = vmatprep.subr.bf16.mxu0 %v8993_v49  ;;  %v1135_v49 = vld [vmem:[%s11640_s11 + $0x478] sm:$0xff] }
 0x4a0   :  { %v9038_v45 = vpack.c.bf16 %v1135_v49, %v1134_v53  ;;  %v1510_v49 = vld [vmem:[%s11635_s6 + $0x8] sm:$0xff]  ;;  %v1511_v53 = vld [vmem:[%s11635_s6 + $0x10] sm:$0xff] }
 0x4a2   :  { %5671 = vmatpush3.bf16.msra.mxu0 %v9008_v50  ;;  %12162 = vst [vmem:[#allocation159_spill] sm:$0xff] %v9038_v45 }
 0x4a3   :  { %5673 = vmatprep.subr.bf16.mxu0 %v9011_v38 }
 0x4a6   :  { %5675 = vmatpush3.bf16.msra.mxu0 %v9026_v55  ;;  %v1509_v55 = vld [vmem:[%s11635_s6] sm:$0xff] }
 0x4a7   :  { %5677 = vmatprep.subr.bf16.mxu0 %v9029_v59 }
 0x4aa   :  { %5679 = vmatpush3.bf16.msra.mxu0 %v9038_v45  ;;  %v9054_v45 = vpack.c.bf16 %v1510_v49, %v1509_v55 }
 0x4ac   :  { %12163 = vst [vmem:[#allocation160_spill] sm:$0xff] %v9054_v45  ;;  %5682 = vmatpush3.bf16.msra.mxu1 %v9054_v45 }
 0x4ad   :  { %5683 = vmatprep.subr.bf16.mxu1 %v12146_v14 }
 0x4b0   :  { %v977_v6 = vpop.f32.mrb[8].mxu1 }
 0x4b1   :  { %v979_v32 = vpop.f32.mrb[9].mxu1  ;;  %v990_v17 = vmul.f32 %v977_v6, %v7349_v30  ;;  %v1512_v6 = vld [vmem:[%s11635_s6 + $0x18] sm:$0xff] }
 0x4b2   :  { %v991_v31 = vmul.f32 %v979_v32, %v7349_v30  ;;  %v9060_v32 = vpack.c.bf16 %v1512_v6, %v1511_v53 }
 0x4b4   :  { %1496 = vmatprep.mubr.f32.mxu0 %v991_v31  ;;  %12164 = vst [vmem:[#allocation161_spill] sm:$0xff] %v9060_v32  ;;  %5685 = vmatpush3.bf16.msra.mxu1 %v9060_v32 }
 0x4b5   :  { %1497 = vmatmul.mubr.f32.vlgmr.msra.gmra.mrb[12].mxu0 %v990_v17  ;;  %5686 = vmatprep.subr.bf16.mxu1 %v12146_v14 }
 0x4b6   :  { %1673 = vmatprep.mubr.f32.mxu0 %v12150_v35 }
 0x538   :  { %v4837_v31 = vpop.f32.mrb[8].mxu0  ;;  %v4872_v17 = vpop.f32.mrb[10].mxu1 }
 0x539   :  { %v4838_v59 = vpop.f32.mrb[9].mxu0  ;;  %v4873_v38 = vpop.f32.mrb[11].mxu1 }
 0x53a   :  { %v4839_v55 = vadd.f32 %v4838_v59, %v4837_v31  ;;  %v4874_v49 = vadd.f32 %v4873_v38, %v4872_v17  ;;  %v1513_v38 = vld [vmem:[%s11635_s6 + $0x20] sm:$0xff] }
 0x53c   :  { %v1289_v50 = vadd.f32 %v4874_v49, %v4839_v55  ;;  %v1682_v55 = vld [vmem:[%s11633_s4 + $0x10] sm:$0xff]  ;;  %v1692_v49 = vld [vmem:[%s11633_s4 + $0x60] sm:$0xff] }
 0x560   :  { %v4907_v62 = vpop.f32.mrb[10].mxu0  ;;  %v4942_v8 = vpop.f32.mrb[12].mxu1 }
 0x561   :  { %v4908_v16 = vpop.f32.mrb[11].mxu0  ;;  %v4943_v56 = vpop.f32.mrb[13].mxu1 }
 0x562   :  { %v4909_v45 = vadd.f32 %v4908_v16, %v4907_v62  ;;  %v4944_v53 = vadd.f32 %v4943_v56, %v4942_v8  ;;  %v1514_v56 = vld [vmem:[%s11635_s6 + $0x28] sm:$0xff]  ;;  %v1683_v62 = vld [vmem:[%s11633_s4 + $0x18] sm:$0xff] }
 0x563   :  { %v9075_v16 = vpack.c.bf16 %v1514_v56, %v1513_v38  ;;  %v1518_v8 = vld [vmem:[%s11635_s6 + $0x48] sm:$0xff]  ;;  %v9120_v38 = vpack.c.bf16 %v1692_v49, %v1682_v55  ;;  %v1743_v55 = vld [vmem:[%s11633_s4 + $0x1f8] sm:$0xff] }
 0x564   :  { %v1359_v6 = vadd.f32 %v4909_v45, %v1289_v50  ;;  %v1693_v45 = vld [vmem:[%s11633_s4 + $0x68] sm:$0xff] }
 0x565   :  { %12166 = vst [vmem:[#allocation163_spill] sm:$0xff] %v9075_v16  ;;  %5688 = vmatpush3.bf16.msra.mxu1 %v9075_v16  ;;  %v9103_v59 = vpack.c.bf16 %v1693_v45, %v1683_v62  ;;  %12170 = vst [vmem:[#allocation167_spill] sm:$0xff] %v9120_v38  ;;  %v1733_v62 = vld [vmem:[%s11633_s4 + $0x1a8] sm:$0xff]  ;;  %v2183_v16 = vld [vmem:[%s11634_s5 + $0x130] sm:$0xff] }
 0x566   :  { %v1429_v20 = vadd.f32 %v4944_v53, %v1359_v6  ;;  %5689 = vmatprep.subr.bf16.mxu1 %v12146_v14  ;;  %v1703_v53 = vld [vmem:[%s11633_s4 + $0xb8] sm:$0xff]  ;;  %v1713_v6 = vld [vmem:[%s11633_s4 + $0x108] sm:$0xff] }
 0x567   :  { %12169 = vst [vmem:[#allocation166_spill] sm:$0xff] %v9103_v59  ;;  %v9122_v56 = vpack.c.bf16 %v1713_v6, %v1703_v53  ;;  %v1753_v49 = vld [vmem:[%s11633_s4 + $0x248] sm:$0xff] }
 0x568   :  { %v9163_v6 = vpack.c.bf16 %v1753_v49, %v1743_v55  ;;  %v1762_v55 = vld [vmem:[%s11633_s4 + $0x290] sm:$0xff]  ;;  %v1772_v49 = vld [vmem:[%s11633_s4 + $0x2e0] sm:$0xff] }
 0x569   :  { %12171 = vst [vmem:[#allocation168_spill] sm:$0xff] %v9122_v56 }
 0x56a   :  { %12175 = vst [vmem:[#allocation172_spill] sm:$0xff] %v9163_v6 }
 0x588   :  { %v4977_v19 = vpop.f32.mrb[12].mxu0 }
 0x589   :  { %v4978_v0 = vpop.f32.mrb[13].mxu0 }
 0x58a   :  { %v4979_v32 = vadd.f32 %v4978_v0, %v4977_v19  ;;  %v1515_v0 = vld [vmem:[%s11635_s6 + $0x30] sm:$0xff]  ;;  %v1517_v19 = vld [vmem:[%s11635_s6 + $0x40] sm:$0xff] }
 0x58b   :  { %v9100_v50 = vpack.c.bf16 %v1518_v8, %v1517_v19  ;;  %v1723_v8 = vld [vmem:[%s11633_s4 + $0x158] sm:$0xff] }
 0x58c   :  { %v9065_v63 = vadd.f32 %v4979_v32, %v1429_v20 }
 0x58d   :  { %12168 = vst [vmem:[#allocation165_spill] sm:$0xff] %v9100_v50 }
 0x58e   :  { %12165 = vst [vmem:[#allocation162_spill] sm:$0xff] %v9065_v63  ;;  %v1503_v43 = vsel %vm1502_vm6, %v9065_v63, -inf }
 0x58f   :  { %1504 = vmax.xlane.f32.xlu0 %v1503_v43  ;;  %v1516_v43 = vld [vmem:[%s11635_s6 + $0x38] sm:$0xff] }
 0x590   :  { %v9088_v20 = vpack.c.bf16 %v1516_v43, %v1515_v0  ;;  %v1702_v0 = vld [vmem:[%s11633_s4 + $0xb0] sm:$0xff]  ;;  %v1712_v43 = vld [vmem:[%s11633_s4 + $0x100] sm:$0xff] }
 0x591   :  { %v9141_v45 = vpack.c.bf16 %v1712_v43, %v1702_v0  ;;  %v1742_v0 = vld [vmem:[%s11633_s4 + $0x1f0] sm:$0xff]  ;;  %v1752_v43 = vld [vmem:[%s11633_s4 + $0x240] sm:$0xff] }
 0x592   :  { %12167 = vst [vmem:[#allocation164_spill] sm:$0xff] %v9088_v20  ;;  %5691 = vmatpush3.bf16.msra.mxu1 %v9088_v20  ;;  %v2301_v20 = vld [vmem:[%s11634_s5 + $0x4e0] sm:$0xff] }
 0x593   :  { %5692 = vmatprep.subr.bf16.mxu1 %v12146_v14  ;;  %12172 = vst [vmem:[#allocation169_spill] sm:$0xff] %v9141_v45 }
 0x596   :  { %5694 = vmatpush3.bf16.msra.mxu1 %v9100_v50  ;;  %v2179_v50 = vld [vmem:[%s11634_s5 + $0x110] sm:$0xff] }
 0x597   :  { %5722 = vmatprep.subr.bf16.mxu1 %v9103_v59 }
 0x61c   :  { %v1505_v32 = vpop.xlane.xlu0 %1504 }
 0x61d   :  { %v1506_v31 = vsub.f32 %v9065_v63, %v1505_v32  ;;  %v9145_v32 = vpack.c.bf16 %v1733_v62, %v1723_v8  ;;  %v1763_v8 = vld [vmem:[%s11633_s4 + $0x298] sm:$0xff]  ;;  %v1773_v62 = vld [vmem:[%s11633_s4 + $0x2e8] sm:$0xff] }
 0x61e   :  { %v1687_v63 = vld [vmem:[%s11633_s4 + $0x38] sm:$0xff] }
 0x61f   :  { %v1507_v17 = vmul.f32 1.442695, %v1506_v31  ;;  %12173 = vst [vmem:[#allocation170_spill] sm:$0xff] %v9145_v32  ;;  %v1722_v31 = vld [vmem:[%s11633_s4 + $0x150] sm:$0xff] }
 0x621   :  { %7015 = vpow2.f32 %v1507_v17  ;;  %v1732_v17 = vld [vmem:[%s11633_s4 + $0x1a0] sm:$0xff] }
 0x622   :  { %v9160_v53 = vpack.c.bf16 %v1732_v17, %v1722_v31  ;;  %v9178_v31 = vpack.c.bf16 %v1752_v43, %v1742_v0  ;;  %v9181_v17 = vpack.c.bf16 %v1773_v62, %v1763_v8  ;;  %v1697_v0 = vld [vmem:[%s11633_s4 + $0x88] sm:$0xff]  ;;  %v9196_v43 = vpack.c.bf16 %v1772_v49, %v1762_v55  ;;  %v1686_v62 = vld [vmem:[%s11633_s4 + $0x30] sm:$0xff] }
 0x623   :  { %v9199_v8 = vpack.c.bf16 %v1697_v0, %v1687_v63  ;;  %v1717_v55 = vld [vmem:[%s11633_s4 + $0x128] sm:$0xff]  ;;  %v1706_v0 = vld [vmem:[%s11633_s4 + $0xd0] sm:$0xff] }
 0x624   :  { %12174 = vst [vmem:[#allocation171_spill] sm:$0xff] %v9160_v53  ;;  %12176 = vst [vmem:[#allocation173_spill] sm:$0xff] %v9178_v31 }
 0x625   :  { %12177 = vst [vmem:[#allocation174_spill] sm:$0xff] %v9181_v17  ;;  %12178 = vst [vmem:[#allocation175_spill] sm:$0xff] %v9196_v43 }
 0x626   :  { %12179 = vst [vmem:[#allocation176_spill] sm:$0xff] %v9199_v8 }
 0x62b   :  { %v9130_v19 = vpop.eup %7015 }
 0x62c   :  { %5217 = vmatmul.mubr.msk.f32.vlgmr.msra.gmra.mrb[14].mxu1 %vm1502_vm6, %v9130_v19 }
 0x62d   :  { %5724 = vmatpush1.bf16.msra.mxu1 %v9120_v38  ;;  %1915 = vmatprep.mubr.f32.mxu1 %v12150_v35  ;;  %v1705_v38 = vld [vmem:[%s11633_s4 + $0xc8] sm:$0xff] }
 0x62e   :  { %5726 = vmatprep.subr.bf16.mxu1 %v9122_v56  ;;  %v1770_v56 = vld [vmem:[%s11633_s4 + $0x2d0] sm:$0xff] }
 0x631   :  { %5728 = vmatpush1.bf16.msra.mxu1 %v9141_v45  ;;  %v1730_v45 = vld [vmem:[%s11633_s4 + $0x190] sm:$0xff] }
 0x632   :  { %5730 = vmatprep.subr.bf16.mxu1 %v9145_v32  ;;  %v1721_v32 = vld [vmem:[%s11633_s4 + $0x148] sm:$0xff] }
 0x635   :  { %5732 = vmatpush1.bf16.msra.mxu1 %v9160_v53  ;;  %v1707_v53 = vld [vmem:[%s11633_s4 + $0xd8] sm:$0xff] }
 0x636   :  { %5734 = vmatprep.subr.bf16.mxu1 %v9163_v6  ;;  %v1696_v6 = vld [vmem:[%s11633_s4 + $0x80] sm:$0xff]  ;;  %v9217_v49 = vpack.c.bf16 %v1717_v55, %v1707_v53  ;;  %v1726_v55 = vld [vmem:[%s11633_s4 + $0x170] sm:$0xff] }
 0x637   :  { %v9214_v63 = vpack.c.bf16 %v1696_v6, %v1686_v62  ;;  %v1737_v6 = vld [vmem:[%s11633_s4 + $0x1c8] sm:$0xff] }
 0x638   :  { %12181 = vst [vmem:[#allocation178_spill] sm:$0xff] %v9217_v49 }
 0x639   :  { %5736 = vmatpush1.bf16.msra.mxu1 %v9178_v31  ;;  %12180 = vst [vmem:[#allocation177_spill] sm:$0xff] %v9214_v63  ;;  %v1727_v31 = vld [vmem:[%s11633_s4 + $0x178] sm:$0xff] }
 0x63a   :  { %5738 = vmatprep.subr.bf16.mxu1 %v9181_v17  ;;  %v1716_v17 = vld [vmem:[%s11633_s4 + $0x120] sm:$0xff]  ;;  %v9238_v62 = vpack.c.bf16 %v1737_v6, %v1727_v31  ;;  %v1746_v6 = vld [vmem:[%s11633_s4 + $0x210] sm:$0xff] }
 0x63b   :  { %v9234_v53 = vpack.c.bf16 %v1716_v17, %v1706_v0  ;;  %v1757_v17 = vld [vmem:[%s11633_s4 + $0x268] sm:$0xff] }
 0x63c   :  { %12183 = vst [vmem:[#allocation180_spill] sm:$0xff] %v9238_v62 }
 0x63d   :  { %5740 = vmatpush1.bf16.msra.mxu1 %v9196_v43  ;;  %12182 = vst [vmem:[#allocation179_spill] sm:$0xff] %v9234_v53  ;;  %v1767_v43 = vld [vmem:[%s11633_s4 + $0x2b8] sm:$0xff] }
 0x63e   :  { %5762 = vmatprep.subr.bf16.mxu1 %v9199_v8  ;;  %v1736_v8 = vld [vmem:[%s11633_s4 + $0x1c0] sm:$0xff] }
 0x63f   :  { %v9253_v31 = vpack.c.bf16 %v1736_v8, %v1726_v55  ;;  %v1777_v8 = vld [vmem:[%s11633_s4 + $0x308] sm:$0xff] }
 0x640   :  { %4774 = vmatmul.mubr.msk.f32.vlgmr.msra.gmra.mrb[16].mxu1 %vm1502_vm6, %v9130_v19  ;;  %v9274_v55 = vpack.c.bf16 %v1777_v8, %v1767_v43  ;;  %v1595_v43 = vld [vmem:[%s11636_s7 + $0x8] sm:$0xff]  ;;  %v12190_v8 = vmov 0 }
 0x641   :  { %5764 = vmatpush1.bf16.msra.mxu1 %v9214_v63  ;;  %2057 = vmatprep.mubr.f32.mxu1 %v12150_v35  ;;  %v1747_v63 = vld [vmem:[%s11633_s4 + $0x218] sm:$0xff]  ;;  %12184 = vst [vmem:[#allocation181_spill] sm:$0xff] %v9253_v31  ;;  %v12191_v8 = vsel %vm9300_vm9, 4294967295, %v12190_v8 }
 0x642   :  { %5766 = vmatprep.subr.bf16.mxu1 %v9217_v49  ;;  %v9256_v0 = vpack.c.bf16 %v1757_v17, %v1747_v63  ;;  %v1756_v49 = vld [vmem:[%s11633_s4 + $0x260] sm:$0xff]  ;;  %12187 = vst [vmem:[#allocation184_spill] sm:$0xff] %v9274_v55  ;;  %v1766_v17 = vld [vmem:[%s11633_s4 + $0x2b0] sm:$0xff]  ;;  %12192 = vst [vmem:[#allocation187_spill] sm:$0xff] %v12191_v8 }
 0x643   :  { %v9271_v63 = vpack.c.bf16 %v1756_v49, %v1746_v6  ;;  %v1597_v49 = vld [vmem:[%s11636_s7 + $0x18] sm:$0x3]  ;;  %v1774_v8 = vld [vmem:[%s11633_s4 + $0x2f0] sm:$0xff] }
 0x644   :  { %12185 = vst [vmem:[#allocation182_spill] sm:$0xff] %v9256_v0  ;;  %v9298_v6 = vpack.c.bf16 %v1597_v49, %v1595_v43  ;;  %v1691_v43 = vld [vmem:[%s11633_s4 + $0x58] sm:$0xff] }
 0x645   :  { %5768 = vmatpush1.bf16.msra.mxu1 %v9234_v53  ;;  %12186 = vst [vmem:[#allocation183_spill] sm:$0xff] %v9271_v63 }
 0x646   :  { %5770 = vmatprep.subr.bf16.mxu1 %v9238_v62  ;;  %v1776_v62 = vld [vmem:[%s11633_s4 + $0x300] sm:$0xff]  ;;  %12189 = vst [vmem:[#allocation186_spill] sm:$0xff] %v9298_v6  ;;  %5697 = vmatprep.subr.msk.bf16.mxu0 %vm9300_vm9, %v9298_v6  ;;  %v1709_v6 = vld [vmem:[%s11633_s4 + $0xe8] sm:$0xff] }
 0x647   :  { %v9283_v53 = vpack.c.bf16 %v1776_v62, %v1766_v17  ;;  %v1594_v62 = vld [vmem:[%s11636_s7] sm:$0xff]  ;;  %v1596_v17 = vld [vmem:[%s11636_s7 + $0x10] sm:$0x3] }
 0x649   :  { %5772 = vmatpush1.bf16.msra.mxu1 %v9253_v31  ;;  %12188 = vst [vmem:[#allocation185_spill] sm:$0xff] %v9283_v53  ;;  %v2278_v31 = vld [vmem:[%s11634_s5 + $0x428] sm:$0xff] }
 0x64a   :  { %5774 = vmatprep.subr.bf16.mxu1 %v9256_v0 }
 0x64d   :  { %5776 = vmatpush1.bf16.msra.mxu1 %v9271_v63 }
 0x64e   :  { %5778 = vmatprep.subr.bf16.mxu1 %v9274_v55  ;;  %v9310_v55 = vpack.c.bf16 %v1596_v17, %v1594_v62  ;;  %v2274_v62 = vld [vmem:[%s11634_s5 + $0x408] sm:$0xff]  ;;  %v2276_v17 = vld [vmem:[%s11634_s5 + $0x418] sm:$0xff] }
 0x64f   :  { %v9330_v63 = vpack.c.bf16 %v2276_v17, %v2274_v62  ;;  %v2280_v62 = vld [vmem:[%s11634_s5 + $0x438] sm:$0xff] }
 0x650   :  { %12193 = vst [vmem:[#allocation188_spill] sm:$0xff] %v9310_v55  ;;  %5700 = vmatpush1.bf16.msk.msra.mxu0 %vm9300_vm9, %v9310_v55  ;;  %v9347_v17 = vpack.c.bf16 %v2280_v62, %v2278_v31  ;;  %v2284_v31 = vld [vmem:[%s11634_s5 + $0x458] sm:$0xff] }
 0x651   :  { %5780 = vmatpush1.bf16.msra.mxu1 %v9283_v53  ;;  %v1681_v53 = vld [vmem:[%s11633_s4 + $0x8] sm:$0xff]  ;;  %12195 = vst [vmem:[#allocation190_spill] sm:$0xff] %v9330_v63 }
 0x652   :  { %v9318_v49 = vpack.c.bf16 %v1691_v43, %v1681_v53  ;;  %5930 = vmatprep.subr.bf16.mxu1 %v9330_v63  ;;  %v2273_v53 = vld [vmem:[%s11634_s5 + $0x400] sm:$0xff]  ;;  %v2275_v43 = vld [vmem:[%s11634_s5 + $0x410] sm:$0xff]  ;;  %12197 = vst [vmem:[#allocation192_spill] sm:$0xff] %v9347_v17 }
 0x653   :  { %v9339_v0 = vpack.c.bf16 %v2275_v43, %v2273_v53  ;;  %v2277_v63 = vld [vmem:[%s11634_s5 + $0x420] sm:$0xff]  ;;  %v2279_v53 = vld [vmem:[%s11634_s5 + $0x430] sm:$0xff] }
 0x654   :  { %4776 = vmatmul.mubr.msk.f32.vlgmr.msra.gmra.mrb[18].mxu1 %vm1502_vm6, %v9130_v19  ;;  %12194 = vst [vmem:[#allocation189_spill] sm:$0xff] %v9318_v49  ;;  %5702 = vmatprep.subr.bf16.mxu0 %v9318_v49  ;;  %v9357_v43 = vpack.c.bf16 %v2279_v53, %v2277_v63  ;;  %v2282_v49 = vld [vmem:[%s11634_s5 + $0x448] sm:$0xff]  ;;  %v2283_v63 = vld [vmem:[%s11634_s5 + $0x450] sm:$0xff] }
 0x655   :  { %12196 = vst [vmem:[#allocation191_spill] sm:$0xff] %v9339_v0  ;;  %5932 = vmatpush1.bf16.msra.mxu1 %v9339_v0  ;;  %v9365_v62 = vpack.c.bf16 %v2284_v31, %v2282_v49  ;;  %v2286_v0 = vld [vmem:[%s11634_s5 + $0x468] sm:$0xff]  ;;  %v2288_v49 = vld [vmem:[%s11634_s5 + $0x478] sm:$0xff] }
 0x656   :  { %5934 = vmatprep.subr.bf16.mxu1 %v9347_v17  ;;  %12198 = vst [vmem:[#allocation193_spill] sm:$0xff] %v9357_v43  ;;  %v2281_v17 = vld [vmem:[%s11634_s5 + $0x440] sm:$0xff]  ;;  %v9383_v31 = vpack.c.bf16 %v2288_v49, %v2286_v0  ;;  %v2292_v0 = vld [vmem:[%s11634_s5 + $0x498] sm:$0xff] }
 0x657   :  { %12199 = vst [vmem:[#allocation194_spill] sm:$0xff] %v9365_v62  ;;  %v9375_v53 = vpack.c.bf16 %v2283_v63, %v2281_v17  ;;  %v2287_v17 = vld [vmem:[%s11634_s5 + $0x470] sm:$0xff] }
 0x658   :  { %12201 = vst [vmem:[#allocation196_spill] sm:$0xff] %v9383_v31 }
 0x659   :  { %5936 = vmatpush1.bf16.msra.mxu1 %v9357_v43  ;;  %12200 = vst [vmem:[#allocation195_spill] sm:$0xff] %v9375_v53  ;;  %v2290_v43 = vld [vmem:[%s11634_s5 + $0x488] sm:$0xff] }
 0x65a   :  { %5938 = vmatprep.subr.bf16.mxu1 %v9365_v62  ;;  %v2285_v62 = vld [vmem:[%s11634_s5 + $0x460] sm:$0xff]  ;;  %v9401_v49 = vpack.c.bf16 %v2292_v0, %v2290_v43  ;;  %v2296_v43 = vld [vmem:[%s11634_s5 + $0x4b8] sm:$0xff] }
 0x65b   :  { %v9393_v63 = vpack.c.bf16 %v2287_v17, %v2285_v62  ;;  %v2291_v62 = vld [vmem:[%s11634_s5 + $0x490] sm:$0xff] }
 0x65c   :  { %12203 = vst [vmem:[#allocation198_spill] sm:$0xff] %v9401_v49 }
 0x65d   :  { %5940 = vmatpush1.bf16.msra.mxu1 %v9375_v53  ;;  %12202 = vst [vmem:[#allocation197_spill] sm:$0xff] %v9393_v63  ;;  %v2294_v53 = vld [vmem:[%s11634_s5 + $0x4a8] sm:$0xff] }
 0x65e   :  { %5942 = vmatprep.subr.bf16.mxu1 %v9383_v31  ;;  %v2289_v31 = vld [vmem:[%s11634_s5 + $0x480] sm:$0xff]  ;;  %v9419_v0 = vpack.c.bf16 %v2296_v43, %v2294_v53  ;;  %v1701_v53 = vld [vmem:[%s11633_s4 + $0xa8] sm:$0xff]  ;;  %v1711_v43 = vld [vmem:[%s11633_s4 + $0xf8] sm:$0xff] }
 0x65f   :  { %v9411_v17 = vpack.c.bf16 %v2291_v62, %v2289_v31  ;;  %v1680_v31 = vld [vmem:[%s11633_s4] sm:$0xff]  ;;  %v1690_v62 = vld [vmem:[%s11633_s4 + $0x50] sm:$0xff] }
 0x660   :  { %12205 = vst [vmem:[#allocation200_spill] sm:$0xff] %v9419_v0 }
 0x661   :  { %5944 = vmatpush1.bf16.msra.mxu1 %v9393_v63  ;;  %12204 = vst [vmem:[#allocation199_spill] sm:$0xff] %v9411_v17 }
 0x662   :  { %5946 = vmatprep.subr.bf16.mxu1 %v9401_v49 }
 0x665   :  { %5948 = vmatpush1.bf16.msra.mxu1 %v9411_v17  ;;  %v1710_v17 = vld [vmem:[%s11633_s4 + $0xf0] sm:$0xff] }
 0x666   :  { %5950 = vmatprep.subr.bf16.mxu1 %v9419_v0  ;;  %v9435_v0 = vpack.c.bf16 %v1690_v62, %v1680_v31  ;;  %v1731_v31 = vld [vmem:[%s11633_s4 + $0x198] sm:$0xff] }
 0x668   :  { %12206 = vst [vmem:[#allocation201_spill] sm:$0xff] %v9435_v0 }
 0x6ff   :  { %v1588_v49 = vpop.f32.mrb[14].mxu1 }
 0x700   :  { %7017 = vrcp.f32 %v1588_v49  ;;  %v5218_v63 = vpop.f32.mrb[15].mxu1  ;;  %v1700_v49 = vld [vmem:[%s11633_s4 + $0xa0] sm:$0xff] }
 0x701   :  { %v9437_v63 = vpack.c.bf16 %v1711_v43, %v1701_v53  ;;  %v9453_v62 = vpack.c.bf16 %v1710_v17, %v1700_v49  ;;  %v9457_v53 = vpack.c.bf16 %v1731_v31, %v1721_v32  ;;  %v1720_v43 = vld [vmem:[%s11633_s4 + $0x140] sm:$0xff]  ;;  %v1751_v17 = vld [vmem:[%s11633_s4 + $0x238] sm:$0xff] }
 0x702   :  { %v9472_v32 = vpack.c.bf16 %v1730_v45, %v1720_v43  ;;  %v1740_v31 = vld [vmem:[%s11633_s4 + $0x1e0] sm:$0xff]  ;;  %v1771_v45 = vld [vmem:[%s11633_s4 + $0x2d8] sm:$0xff] }
 0x703   :  { %12207 = vst [vmem:[#allocation202_spill] sm:$0xff] %v9437_v63  ;;  %12208 = vst [vmem:[#allocation203_spill] sm:$0xff] %v9453_v62 }
 0x704   :  { %12209 = vst [vmem:[#allocation204_spill] sm:$0xff] %v9457_v53  ;;  %12210 = vst [vmem:[#allocation205_spill] sm:$0xff] %v9472_v32 }
 0x70a   :  { %v7018_v55 = vpop.eup %7017 }
 0x70b   :  { %4772 = vmatmul.mubr.msk.f32.vlgmr.msra.gmra.mrb[14].mxu0 %vm1598_vm10, %v7018_v55  ;;  %v1741_v55 = vld [vmem:[%s11633_s4 + $0x1e8] sm:$0xff] }
 0x70c   :  { %5704 = vmatpush1.bf16.msra.mxu0 %v9435_v0  ;;  %1844 = vmatprep.mubr.f32.mxu0 %v12150_v35  ;;  %v9475_v49 = vpack.c.bf16 %v1751_v17, %v1741_v55  ;;  %v1761_v0 = vld [vmem:[%s11633_s4 + $0x288] sm:$0xff] }
 0x70d   :  { %5706 = vmatprep.subr.bf16.mxu0 %v9437_v63  ;;  %v1750_v63 = vld [vmem:[%s11633_s4 + $0x230] sm:$0xff] }
 0x70e   :  { %12211 = vst [vmem:[#allocation206_spill] sm:$0xff] %v9475_v49  ;;  %v9494_v17 = vpack.c.bf16 %v1750_v63, %v1740_v31  ;;  %v1695_v63 = vld [vmem:[%s11633_s4 + $0x78] sm:$0xff] }
 0x710   :  { %5708 = vmatpush1.bf16.msra.mxu0 %v9453_v62  ;;  %12212 = vst [vmem:[#allocation207_spill] sm:$0xff] %v9494_v17  ;;  %v1760_v62 = vld [vmem:[%s11633_s4 + $0x280] sm:$0xff] }
 0x711   :  { %5710 = vmatprep.subr.bf16.mxu0 %v9457_v53  ;;  %v9497_v53 = vpack.c.bf16 %v1771_v45, %v1761_v0  ;;  %v9512_v0 = vpack.c.bf16 %v1770_v56, %v1760_v62  ;;  %v1684_v45 = vld [vmem:[%s11633_s4 + $0x20] sm:$0xff]  ;;  %v1715_v56 = vld [vmem:[%s11633_s4 + $0x118] sm:$0xff] }
 0x713   :  { %v9489_v43 = vpop.f32.mrb[16].mxu1  ;;  %12213 = vst [vmem:[#allocation208_spill] sm:$0xff] %v9497_v53  ;;  %12214 = vst [vmem:[#allocation209_spill] sm:$0xff] %v9512_v0 }
 0x714   :  { %5712 = vmatpush1.bf16.msra.mxu0 %v9472_v32  ;;  %v9492_v55 = vpop.f32.mrb[17].mxu1  ;;  %v1685_v32 = vld [vmem:[%s11633_s4 + $0x28] sm:$0xff] }
 0x715   :  { %5714 = vmatprep.subr.bf16.mxu0 %v9475_v49  ;;  %v9515_v31 = vpack.c.bf16 %v1695_v63, %v1685_v32  ;;  %v1694_v49 = vld [vmem:[%s11633_s4 + $0x70] sm:$0xff]  ;;  %v9533_v32 = vpack.c.bf16 %v1715_v56, %v1705_v38  ;;  %v1704_v63 = vld [vmem:[%s11633_s4 + $0xc0] sm:$0xff] }
 0x716   :  { %v9530_v62 = vpack.c.bf16 %v1694_v49, %v1684_v45  ;;  %v1735_v49 = vld [vmem:[%s11633_s4 + $0x1b8] sm:$0xff]  ;;  %v1724_v56 = vld [vmem:[%s11633_s4 + $0x160] sm:$0xff] }
 0x717   :  { %12215 = vst [vmem:[#allocation210_spill] sm:$0xff] %v9515_v31  ;;  %12217 = vst [vmem:[#allocation212_spill] sm:$0xff] %v9533_v32 }
 0x718   :  { %5716 = vmatpush1.bf16.msra.mxu0 %v9494_v17  ;;  %12216 = vst [vmem:[#allocation211_spill] sm:$0xff] %v9530_v62  ;;  %v1725_v17 = vld [vmem:[%s11633_s4 + $0x168] sm:$0xff] }
 0x719   :  { %5718 = vmatprep.subr.bf16.mxu0 %v9497_v53  ;;  %v1714_v53 = vld [vmem:[%s11633_s4 + $0x110] sm:$0xff]  ;;  %v9554_v45 = vpack.c.bf16 %v1735_v49, %v1725_v17  ;;  %v1744_v49 = vld [vmem:[%s11633_s4 + $0x200] sm:$0xff] }
 0x71a   :  { %v9550_v38 = vpack.c.bf16 %v1714_v53, %v1704_v63  ;;  %v1755_v53 = vld [vmem:[%s11633_s4 + $0x258] sm:$0xff] }
 0x71b   :  { %12219 = vst [vmem:[#allocation214_spill] sm:$0xff] %v9554_v45 }
 0x71c   :  { %5720 = vmatpush1.bf16.msra.mxu0 %v9512_v0  ;;  %12218 = vst [vmem:[#allocation213_spill] sm:$0xff] %v9550_v38  ;;  %v1765_v0 = vld [vmem:[%s11633_s4 + $0x2a8] sm:$0xff] }
 0x71d   :  { %5742 = vmatprep.subr.bf16.mxu0 %v9515_v31  ;;  %v1734_v31 = vld [vmem:[%s11633_s4 + $0x1b0] sm:$0xff] }
 0x71e   :  { %v9569_v17 = vpack.c.bf16 %v1734_v31, %v1724_v56  ;;  %v1775_v31 = vld [vmem:[%s11633_s4 + $0x2f8] sm:$0xff] }
 0x71f   :  { %4773 = vmatmul.mubr.msk.f32.vlgmr.msra.gmra.mrb[16].mxu0 %vm1502_vm6, %v9130_v19 }
 0x720   :  { %5744 = vmatpush1.bf16.msra.mxu0 %v9530_v62  ;;  %1986 = vmatprep.mubr.f32.mxu0 %v12150_v35  ;;  %v1745_v62 = vld [vmem:[%s11633_s4 + $0x208] sm:$0xff]  ;;  %12220 = vst [vmem:[#allocation215_spill] sm:$0xff] %v9569_v17 }
 0x721   :  { %5746 = vmatprep.subr.bf16.mxu0 %v9533_v32  ;;  %v9572_v63 = vpack.c.bf16 %v1755_v53, %v1745_v62  ;;  %v1754_v32 = vld [vmem:[%s11633_s4 + $0x250] sm:$0xff] }
 0x722   :  { %v9591_v53 = vpack.c.bf16 %v1754_v32, %v1744_v49  ;;  %v1699_v32 = vld [vmem:[%s11633_s4 + $0x98] sm:$0xff] }
 0x723   :  { %12221 = vst [vmem:[#allocation216_spill] sm:$0xff] %v9572_v63 }
 0x724   :  { %5748 = vmatpush1.bf16.msra.mxu0 %v9550_v38  ;;  %12222 = vst [vmem:[#allocation217_spill] sm:$0xff] %v9591_v53  ;;  %v1764_v38 = vld [vmem:[%s11633_s4 + $0x2a0] sm:$0xff] }
 0x725   :  { %5750 = vmatprep.subr.bf16.mxu0 %v9554_v45  ;;  %v9594_v45 = vpack.c.bf16 %v1775_v31, %v1765_v0  ;;  %v9609_v0 = vpack.c.bf16 %v1774_v8, %v1764_v38  ;;  %v1688_v31 = vld [vmem:[%s11633_s4 + $0x40] sm:$0xff]  ;;  %v1719_v8 = vld [vmem:[%s11633_s4 + $0x138] sm:$0xff] }
 0x727   :  { %v9586_v56 = vpop.f32.mrb[18].mxu1  ;;  %12223 = vst [vmem:[#allocation218_spill] sm:$0xff] %v9594_v45  ;;  %12224 = vst [vmem:[#allocation219_spill] sm:$0xff] %v9609_v0 }
 0x728   :  { %5752 = vmatpush1.bf16.msra.mxu0 %v9569_v17  ;;  %v9589_v62 = vpop.f32.mrb[19].mxu1  ;;  %v1689_v17 = vld [vmem:[%s11633_s4 + $0x48] sm:$0xff] }
 0x729   :  { %5754 = vmatprep.subr.bf16.mxu0 %v9572_v63  ;;  %v9612_v49 = vpack.c.bf16 %v1699_v32, %v1689_v17  ;;  %v1698_v63 = vld [vmem:[%s11633_s4 + $0x90] sm:$0xff]  ;;  %v9630_v17 = vpack.c.bf16 %v1719_v8, %v1709_v6  ;;  %v1708_v32 = vld [vmem:[%s11633_s4 + $0xe0] sm:$0xff] }
 0x72a   :  { %v9627_v38 = vpack.c.bf16 %v1698_v63, %v1688_v31  ;;  %v1739_v63 = vld [vmem:[%s11633_s4 + $0x1d8] sm:$0xff]  ;;  %v1728_v8 = vld [vmem:[%s11633_s4 + $0x180] sm:$0xff] }
 0x72b   :  { %12225 = vst [vmem:[#allocation220_spill] sm:$0xff] %v9612_v49  ;;  %12227 = vst [vmem:[#allocation222_spill] sm:$0xff] %v9630_v17 }
 0x72c   :  { %5756 = vmatpush1.bf16.msra.mxu0 %v9591_v53  ;;  %12226 = vst [vmem:[#allocation221_spill] sm:$0xff] %v9627_v38  ;;  %v1729_v53 = vld [vmem:[%s11633_s4 + $0x188] sm:$0xff] }
 0x72d   :  { %5758 = vmatprep.subr.bf16.mxu0 %v9594_v45  ;;  %v1718_v45 = vld [vmem:[%s11633_s4 + $0x130] sm:$0xff]  ;;  %v9651_v31 = vpack.c.bf16 %v1739_v63, %v1729_v53  ;;  %v1748_v63 = vld [vmem:[%s11633_s4 + $0x220] sm:$0xff] }
 0x72e   :  { %v9647_v6 = vpack.c.bf16 %v1718_v45, %v1708_v32  ;;  %v1759_v45 = vld [vmem:[%s11633_s4 + $0x278] sm:$0xff] }
 0x72f   :  { %12229 = vst [vmem:[#allocation224_spill] sm:$0xff] %v9651_v31 }
 0x730   :  { %5760 = vmatpush1.bf16.msra.mxu0 %v9609_v0  ;;  %12228 = vst [vmem:[#allocation223_spill] sm:$0xff] %v9647_v6  ;;  %v1769_v0 = vld [vmem:[%s11633_s4 + $0x2c8] sm:$0xff] }
 0x731   :  { %5782 = vmatprep.subr.bf16.mxu0 %v9612_v49  ;;  %v1738_v49 = vld [vmem:[%s11633_s4 + $0x1d0] sm:$0xff] }
 0x732   :  { %v9666_v53 = vpack.c.bf16 %v1738_v49, %v1728_v8  ;;  %v1779_v49 = vld [vmem:[%s11633_s4 + $0x318] sm:$0xff] }
 0x733   :  { %4775 = vmatmul.mubr.msk.f32.vlgmr.msra.gmra.mrb[18].mxu0 %vm1502_vm6, %v9130_v19  ;;  %v9687_v8 = vpack.c.bf16 %v1779_v49, %v1769_v0  ;;  %v2145_v49 = vld [vmem:[%s11634_s5] sm:$0xff] }
 0x734   :  { %5784 = vmatpush1.bf16.msra.mxu0 %v9627_v38  ;;  %2128 = vmatprep.mubr.f32.mxu0 %v12150_v35  ;;  %v1749_v38 = vld [vmem:[%s11633_s4 + $0x228] sm:$0xff]  ;;  %12230 = vst [vmem:[#allocation225_spill] sm:$0xff] %v9666_v53 }
 0x735   :  { %5786 = vmatprep.subr.bf16.mxu0 %v9630_v17  ;;  %v9669_v32 = vpack.c.bf16 %v1759_v45, %v1749_v38  ;;  %v1758_v17 = vld [vmem:[%s11633_s4 + $0x270] sm:$0xff]  ;;  %12233 = vst [vmem:[#allocation228_spill] sm:$0xff] %v9687_v8  ;;  %v1768_v45 = vld [vmem:[%s11633_s4 + $0x2c0] sm:$0xff] }
 0x736   :  { %v9684_v38 = vpack.c.bf16 %v1758_v17, %v1748_v63  ;;  %v2148_v17 = vld [vmem:[%s11634_s5 + $0x18] sm:$0xff] }
 0x737   :  { %12231 = vst [vmem:[#allocation226_spill] sm:$0xff] %v9669_v32 }
 0x738   :  { %5788 = vmatpush1.bf16.msra.mxu0 %v9647_v6  ;;  %12232 = vst [vmem:[#allocation227_spill] sm:$0xff] %v9684_v38  ;;  %v2146_v6 = vld [vmem:[%s11634_s5 + $0x8] sm:$0xff] }
 0x739   :  { %5790 = vmatprep.subr.bf16.mxu0 %v9651_v31  ;;  %v1778_v31 = vld [vmem:[%s11633_s4 + $0x310] sm:$0xff]  ;;  %v9705_v63 = vpack.c.bf16 %v2148_v17, %v2146_v6  ;;  %v2149_v17 = vld [vmem:[%s11634_s5 + $0x20] sm:$0xff] }
 0x73a   :  { %v9702_v0 = vpack.c.bf16 %v1778_v31, %v1768_v45  ;;  %v2152_v31 = vld [vmem:[%s11634_s5 + $0x38] sm:$0xff] }
 0x73b   :  { %12235 = vst [vmem:[#allocation230_spill] sm:$0xff] %v9705_v63 }
 0x73c   :  { %5792 = vmatpush1.bf16.msra.mxu0 %v9666_v53  ;;  %12234 = vst [vmem:[#allocation229_spill] sm:$0xff] %v9702_v0  ;;  %v2150_v53 = vld [vmem:[%s11634_s5 + $0x28] sm:$0xff] }
 0x73d   :  { %5794 = vmatprep.subr.bf16.mxu0 %v9669_v32  ;;  %v2147_v32 = vld [vmem:[%s11634_s5 + $0x10] sm:$0xff]  ;;  %v9723_v45 = vpack.c.bf16 %v2152_v31, %v2150_v53  ;;  %v2153_v31 = vld [vmem:[%s11634_s5 + $0x40] sm:$0xff] }
 0x73e   :  { %v9720_v6 = vpack.c.bf16 %v2147_v32, %v2145_v49  ;;  %v2156_v32 = vld [vmem:[%s11634_s5 + $0x58] sm:$0xff] }
 0x73f   :  { %12237 = vst [vmem:[#allocation232_spill] sm:$0xff] %v9723_v45 }
 0x740   :  { %5796 = vmatpush1.bf16.msra.mxu0 %v9684_v38  ;;  %12236 = vst [vmem:[#allocation231_spill] sm:$0xff] %v9720_v6  ;;  %v2154_v38 = vld [vmem:[%s11634_s5 + $0x48] sm:$0xff] }
 0x741   :  { %5798 = vmatprep.subr.bf16.mxu0 %v9687_v8  ;;  %v2151_v8 = vld [vmem:[%s11634_s5 + $0x30] sm:$0xff]  ;;  %v9743_v49 = vpack.c.bf16 %v2156_v32, %v2154_v38  ;;  %v2157_v32 = vld [vmem:[%s11634_s5 + $0x60] sm:$0xff] }
 0x742   :  { %v9740_v53 = vpack.c.bf16 %v2151_v8, %v2149_v17  ;;  %v2160_v8 = vld [vmem:[%s11634_s5 + $0x78] sm:$0xff] }
 0x743   :  { %12239 = vst [vmem:[#allocation234_spill] sm:$0xff] %v9743_v49 }
 0x744   :  { %5800 = vmatpush1.bf16.msra.mxu0 %v9702_v0  ;;  %12238 = vst [vmem:[#allocation233_spill] sm:$0xff] %v9740_v53  ;;  %v2155_v0 = vld [vmem:[%s11634_s5 + $0x50] sm:$0xff] }
 0x745   :  { %5802 = vmatprep.subr.bf16.mxu0 %v9705_v63  ;;  %v9758_v38 = vpack.c.bf16 %v2155_v0, %v2153_v31  ;;  %v2164_v0 = vld [vmem:[%s11634_s5 + $0x98] sm:$0xff]  ;;  %v2177_v63 = vld [vmem:[%s11634_s5 + $0x100] sm:$0xff] }
 0x747   :  { %4777 = vmatmul.mubr.msk.f32.vlgmr.msra.gmra.mrb[20].mxu0 %vm1502_vm6, %v9130_v19  ;;  %v2158_v19 = vld [vmem:[%s11634_s5 + $0x68] sm:$0xff]  ;;  %12240 = vst [vmem:[#allocation235_spill] sm:$0xff] %v9758_v38 }
 0x748   :  { %5804 = vmatpush1.bf16.msra.mxu0 %v9720_v6  ;;  %v9761_v17 = vpack.c.bf16 %v2160_v8, %v2158_v19  ;;  %v2162_v6 = vld [vmem:[%s11634_s5 + $0x88] sm:$0xff]  ;;  %v2161_v8 = vld [vmem:[%s11634_s5 + $0x80] sm:$0xff] }
 0x749   :  { %5806 = vmatprep.subr.bf16.mxu0 %v9723_v45  ;;  %v2159_v45 = vld [vmem:[%s11634_s5 + $0x70] sm:$0xff]  ;;  %v9779_v19 = vpack.c.bf16 %v2164_v0, %v2162_v6  ;;  %v2165_v0 = vld [vmem:[%s11634_s5 + $0xa0] sm:$0xff] }
 0x74a   :  { %12241 = vst [vmem:[#allocation236_spill] sm:$0xff] %v9761_v17  ;;  %v9776_v31 = vpack.c.bf16 %v2159_v45, %v2157_v32  ;;  %v2168_v45 = vld [vmem:[%s11634_s5 + $0xb8] sm:$0xff] }
 0x74b   :  { %12243 = vst [vmem:[#allocation238_spill] sm:$0xff] %v9779_v19 }
 0x74c   :  { %5808 = vmatpush1.bf16.msra.mxu0 %v9740_v53  ;;  %12242 = vst [vmem:[#allocation237_spill] sm:$0xff] %v9776_v31  ;;  %v2166_v53 = vld [vmem:[%s11634_s5 + $0xa8] sm:$0xff] }
 0x74d   :  { %5810 = vmatprep.subr.bf16.mxu0 %v9743_v49  ;;  %v2163_v49 = vld [vmem:[%s11634_s5 + $0x90] sm:$0xff]  ;;  %v9797_v32 = vpack.c.bf16 %v2168_v45, %v2166_v53  ;;  %v2169_v45 = vld [vmem:[%s11634_s5 + $0xc0] sm:$0xff] }
 0x74e   :  { %v9794_v6 = vpack.c.bf16 %v2163_v49, %v2161_v8  ;;  %v2172_v49 = vld [vmem:[%s11634_s5 + $0xd8] sm:$0xff] }
 0x74f   :  { %12245 = vst [vmem:[#allocation240_spill] sm:$0xff] %v9797_v32 }
 0x750   :  { %5812 = vmatpush1.bf16.msra.mxu0 %v9758_v38  ;;  %12244 = vst [vmem:[#allocation239_spill] sm:$0xff] %v9794_v6  ;;  %v2170_v38 = vld [vmem:[%s11634_s5 + $0xc8] sm:$0xff] }
 0x751   :  { %5814 = vmatprep.subr.bf16.mxu0 %v9761_v17  ;;  %v2167_v17 = vld [vmem:[%s11634_s5 + $0xb0] sm:$0xff]  ;;  %v9815_v8 = vpack.c.bf16 %v2172_v49, %v2170_v38 }
 0x752   :  { %v9812_v53 = vpack.c.bf16 %v2167_v17, %v2165_v0  ;;  %v2176_v17 = vld [vmem:[%s11634_s5 + $0xf8] sm:$0xff]  ;;  %v2293_v0 = vld [vmem:[%s11634_s5 + $0x4a0] sm:$0xff] }
 0x753   :  { %12247 = vst [vmem:[#allocation242_spill] sm:$0xff] %v9815_v8 }
 0x754   :  { %5816 = vmatpush1.bf16.msra.mxu0 %v9776_v31  ;;  %12246 = vst [vmem:[#allocation241_spill] sm:$0xff] %v9812_v53  ;;  %v2174_v31 = vld [vmem:[%s11634_s5 + $0xe8] sm:$0xff] }
 0x755   :  { %5818 = vmatprep.subr.bf16.mxu0 %v9779_v19  ;;  %v2171_v19 = vld [vmem:[%s11634_s5 + $0xd0] sm:$0xff]  ;;  %v9836_v49 = vpack.c.bf16 %v2176_v17, %v2174_v31  ;;  %v2180_v31 = vld [vmem:[%s11634_s5 + $0x118] sm:$0xff] }
 0x756   :  { %v9830_v38 = vpack.c.bf16 %v2171_v19, %v2169_v45  ;;  %v2295_v19 = vld [vmem:[%s11634_s5 + $0x4b0] sm:$0xff]  ;;  %v2178_v45 = vld [vmem:[%s11634_s5 + $0x108] sm:$0xff] }
 0x757   :  { %12249 = vst [vmem:[#allocation244_spill] sm:$0xff] %v9836_v49  ;;  %v9853_v17 = vpack.c.bf16 %v2295_v19, %v2293_v0  ;;  %v2300_v0 = vld [vmem:[%s11634_s5 + $0x4d8] sm:$0xff]  ;;  %v9872_v19 = vpack.c.bf16 %v2180_v31, %v2178_v45  ;;  %v2302_v31 = vld [vmem:[%s11634_s5 + $0x4e8] sm:$0xff] }
 0x758   :  { %5820 = vmatpush1.bf16.msra.mxu0 %v9794_v6  ;;  %12248 = vst [vmem:[#allocation243_spill] sm:$0xff] %v9830_v38  ;;  %v2175_v6 = vld [vmem:[%s11634_s5 + $0xf0] sm:$0xff] }
 0x759   :  { %5822 = vmatprep.subr.bf16.mxu0 %v9797_v32  ;;  %v2173_v32 = vld [vmem:[%s11634_s5 + $0xe0] sm:$0xff]  ;;  %12250 = vst [vmem:[#allocation245_spill] sm:$0xff] %v9853_v17  ;;  %5952 = vmatpush1.bf16.msra.mxu1 %v9853_v17  ;;  %12252 = vst [vmem:[#allocation247_spill] sm:$0xff] %v9872_v19  ;;  %v2299_v17 = vld [vmem:[%s11634_s5 + $0x4d0] sm:$0xff] }
 0x75c   :  { %5824 = vmatpush1.bf16.msra.mxu0 %v9812_v53  ;;  %v9859_v53 = vpack.c.bf16 %v2175_v6, %v2173_v32  ;;  %v2182_v6 = vld [vmem:[%s11634_s5 + $0x128] sm:$0xff] }
 0x75d   :  { %5826 = vmatprep.subr.bf16.mxu0 %v9815_v8  ;;  %v2298_v8 = vld [vmem:[%s11634_s5 + $0x4c8] sm:$0xff] }
 0x75e   :  { %12251 = vst [vmem:[#allocation246_spill] sm:$0xff] %v9859_v53  ;;  %v9877_v32 = vpack.c.bf16 %v2300_v0, %v2298_v8  ;;  %v2304_v8 = vld [vmem:[%s11634_s5 + $0x4f8] sm:$0xff] }
 0x75f   :  { %v9897_v0 = vpack.c.bf16 %v2304_v8, %v2302_v31  ;;  %v2303_v31 = vld [vmem:[%s11634_s5 + $0x4f0] sm:$0xff] }
 0x760   :  { %5828 = vmatpush1.bf16.msra.mxu0 %v9830_v38  ;;  %12253 = vst [vmem:[#allocation248_spill] sm:$0xff] %v9877_v32  ;;  %v2297_v38 = vld [vmem:[%s11634_s5 + $0x4c0] sm:$0xff]  ;;  %5954 = vmatprep.subr.bf16.mxu1 %v9877_v32  ;;  %v2308_v32 = vld [vmem:[%s11634_s5 + $0x518] sm:$0xff] }
 0x761   :  { %5830 = vmatprep.subr.bf16.mxu0 %v9836_v49  ;;  %v2184_v49 = vld [vmem:[%s11634_s5 + $0x138] sm:$0xff]  ;;  %v9888_v45 = vpack.c.bf16 %v2299_v17, %v2297_v38  ;;  %12255 = vst [vmem:[#allocation250_spill] sm:$0xff] %v9897_v0  ;;  %v9903_v38 = vpack.c.bf16 %v2179_v50, %v2177_v63  ;;  %v2181_v17 = vld [vmem:[%s11634_s5 + $0x120] sm:$0xff]  ;;  %v2186_v50 = vld [vmem:[%s11634_s5 + $0x148] sm:$0xff]  ;;  %v9922_v63 = vpack.c.bf16 %v2303_v31, %v2301_v20 }
 0x762   :  { %v9916_v8 = vpack.c.bf16 %v2184_v49, %v2182_v6  ;;  %v2188_v49 = vld [vmem:[%s11634_s5 + $0x158] sm:$0xff]  ;;  %v2307_v20 = vld [vmem:[%s11634_s5 + $0x510] sm:$0xff]  ;;  %v2310_v31 = vld [vmem:[%s11634_s5 + $0x528] sm:$0xff] }
 0x763   :  { %12254 = vst [vmem:[#allocation249_spill] sm:$0xff] %v9888_v45  ;;  %12256 = vst [vmem:[#allocation251_spill] sm:$0xff] %v9903_v38  ;;  %5956 = vmatpush1.bf16.msra.mxu1 %v9888_v45  ;;  %v2306_v45 = vld [vmem:[%s11634_s5 + $0x508] sm:$0xff]  ;;  %v9957_v59 = vpack.c.bf16 %v2188_v49, %v2186_v50  ;;  %v2192_v49 = vld [vmem:[%s11634_s5 + $0x178] sm:$0xff] }
 0x764   :  { %5832 = vmatpush1.bf16.msra.mxu0 %v9859_v53  ;;  %12257 = vst [vmem:[#allocation252_spill] sm:$0xff] %v9916_v8  ;;  %5958 = vmatprep.subr.bf16.mxu1 %v9897_v0  ;;  %12258 = vst [vmem:[#allocation253_spill] sm:$0xff] %v9922_v63  ;;  %v9933_v6 = vpack.c.bf16 %v2308_v32, %v2306_v45  ;;  %v2305_v0 = vld [vmem:[%s11634_s5 + $0x500] sm:$0xff]  ;;  %v2312_v53 = vld [vmem:[%s11634_s5 + $0x538] sm:$0xff] }
 0x765   :  { %5834 = vmatprep.subr.bf16.mxu0 %v9872_v19  ;;  %v9945_v19 = vpack.c.bf16 %v2183_v16, %v2181_v17  ;;  %v2185_v32 = vld [vmem:[%s11634_s5 + $0x140] sm:$0xff]  ;;  %v9951_v45 = vpack.c.bf16 %v2307_v20, %v2305_v0  ;;  %12262 = vst [vmem:[#allocation257_spill] sm:$0xff] %v9957_v59  ;;  %v2187_v16 = vld [vmem:[%s11634_s5 + $0x150] sm:$0xff]  ;;  %v9963_v17 = vpack.c.bf16 %v2312_v53, %v2310_v31  ;;  %v2190_v50 = vld [vmem:[%s11634_s5 + $0x168] sm:$0xff] }
 0x766   :  { %12259 = vst [vmem:[#allocation254_spill] sm:$0xff] %v9933_v6  ;;  %v2309_v0 = vld [vmem:[%s11634_s5 + $0x520] sm:$0xff]  ;;  %v2311_v20 = vld [vmem:[%s11634_s5 + $0x530] sm:$0xff]  ;;  %v9978_v53 = vpack.c.bf16 %v2187_v16, %v2185_v32  ;;  %v2194_v32 = vld [vmem:[%s11634_s5 + $0x188] sm:$0xff] }
 0x767   :  { %12260 = vst [vmem:[#allocation255_spill] sm:$0xff] %v9945_v19  ;;  %5960 = vmatpush1.bf16.msra.mxu1 %v9922_v63  ;;  %12261 = vst [vmem:[#allocation256_spill] sm:$0xff] %v9951_v45  ;;  %v9981_v31 = vpack.c.bf16 %v2311_v20, %v2309_v0  ;;  %v2189_v63 = vld [vmem:[%s11634_s5 + $0x160] sm:$0xff]  ;;  %v2196_v16 = vld [vmem:[%s11634_s5 + $0x198] sm:$0xff] }
 0x768   :  { %5836 = vmatpush1.bf16.msra.mxu0 %v9903_v38  ;;  %5962 = vmatprep.subr.bf16.mxu1 %v9933_v6  ;;  %12263 = vst [vmem:[#allocation258_spill] sm:$0xff] %v9963_v17  ;;  %12264 = vst [vmem:[#allocation259_spill] sm:$0xff] %v9978_v53  ;;  %v9984_v6 = vpack.c.bf16 %v2192_v49, %v2190_v50  ;;  %v2314_v0 = vld [vmem:[%s11634_s5 + $0x548] sm:$0xff]  ;;  %v2193_v50 = vld [vmem:[%s11634_s5 + $0x180] sm:$0xff] }
 0x769   :  { %5838 = vmatprep.subr.bf16.mxu0 %v9916_v8  ;;  %12265 = vst [vmem:[#allocation260_spill] sm:$0xff] %v9981_v31  ;;  %v2191_v8 = vld [vmem:[%s11634_s5 + $0x170] sm:$0xff]  ;;  %v2316_v49 = vld [vmem:[%s11634_s5 + $0x558] sm:$0xff] }
 0x76a   :  { %12266 = vst [vmem:[#allocation261_spill] sm:$0xff] %v9984_v6  ;;  %v10003_v20 = vpack.c.bf16 %v2191_v8, %v2189_v63  ;;  %v10018_v8 = vpack.c.bf16 %v2316_v49, %v2314_v0  ;;  %v2313_v63 = vld [vmem:[%s11634_s5 + $0x540] sm:$0xff]  ;;  %v2318_v0 = vld [vmem:[%s11634_s5 + $0x568] sm:$0xff] }
 0x76b   :  { %5964 = vmatpush1.bf16.msra.mxu1 %v9951_v45  ;;  %v2195_v45 = vld [vmem:[%s11634_s5 + $0x190] sm:$0xff] }
 0x76c   :  { %5840 = vmatpush1.bf16.msra.mxu0 %v9945_v19  ;;  %5966 = vmatprep.subr.bf16.mxu1 %v9963_v17  ;;  %12267 = vst [vmem:[#allocation262_spill] sm:$0xff] %v10003_v20  ;;  %v10013_v17 = vpack.c.bf16 %v2196_v16, %v2194_v32  ;;  %12269 = vst [vmem:[#allocation264_spill] sm:$0xff] %v10018_v8  ;;  %v2200_v32 = vld [vmem:[%s11634_s5 + $0x1b8] sm:$0xff]  ;;  %v10039_v49 = vpack.c.bf16 %v2195_v45, %v2193_v50  ;;  %v2317_v50 = vld [vmem:[%s11634_s5 + $0x560] sm:$0xff] }
 0x76d   :  { %5842 = vmatprep.subr.bf16.mxu0 %v9957_v59  ;;  %v2205_v59 = vld [vmem:[%s11634_s5 + $0x1e0] sm:$0xff]  ;;  %v2138_v19 = vmul.f32 %v9492_v55, %v7349_v30 }
 0x76e   :  { %12268 = vst [vmem:[#allocation263_spill] sm:$0xff] %v10013_v17  ;;  %12271 = vst [vmem:[#allocation266_spill] sm:$0xff] %v10039_v49  ;;  %v2217_v55 = vld [vmem:[%s11634_s5 + $0x240] sm:$0xff] }
 0x76f   :  { %5968 = vmatpush1.bf16.msra.mxu1 %v9981_v31  ;;  %v2315_v31 = vld [vmem:[%s11634_s5 + $0x550] sm:$0xff] }
 0x770   :  { %5844 = vmatpush1.bf16.msra.mxu0 %v9978_v53  ;;  %v10032_v16 = vpack.c.bf16 %v2315_v31, %v2313_v63  ;;  %5970 = vmatprep.subr.bf16.mxu1 %v10018_v8  ;;  %v2197_v53 = vld [vmem:[%s11634_s5 + $0x1a0] sm:$0xff]  ;;  %v2320_v31 = vld [vmem:[%s11634_s5 + $0x578] sm:$0xff]  ;;  %v2199_v8 = vld [vmem:[%s11634_s5 + $0x1b0] sm:$0xff] }
 0x771   :  { %5846 = vmatprep.subr.bf16.mxu0 %v9984_v6  ;;  %v2198_v6 = vld [vmem:[%s11634_s5 + $0x1a8] sm:$0xff]  ;;  %v10054_v45 = vpack.c.bf16 %v2320_v31, %v2318_v0  ;;  %v10072_v0 = vpack.c.bf16 %v2199_v8, %v2197_v53  ;;  %v2201_v31 = vld [vmem:[%s11634_s5 + $0x1c0] sm:$0xff]  ;;  %v2324_v8 = vld [vmem:[%s11634_s5 + $0x598] sm:$0xff] }
 0x772   :  { %12270 = vst [vmem:[#allocation265_spill] sm:$0xff] %v10032_v16  ;;  %v10049_v63 = vpack.c.bf16 %v2200_v32, %v2198_v6  ;;  %v2204_v6 = vld [vmem:[%s11634_s5 + $0x1d8] sm:$0xff]  ;;  %v2206_v53 = vld [vmem:[%s11634_s5 + $0x1e8] sm:$0xff] }
 0x773   :  { %5972 = vmatpush1.bf16.msra.mxu1 %v10032_v16  ;;  %12273 = vst [vmem:[#allocation268_spill] sm:$0xff] %v10054_v45  ;;  %v2319_v16 = vld [vmem:[%s11634_s5 + $0x570] sm:$0xff]  ;;  %12275 = vst [vmem:[#allocation270_spill] sm:$0xff] %v10072_v0 }
 0x774   :  { %5848 = vmatpush1.bf16.msra.mxu0 %v10003_v20  ;;  %12272 = vst [vmem:[#allocation267_spill] sm:$0xff] %v10049_v63  ;;  %v10068_v32 = vpack.c.bf16 %v2319_v16, %v2317_v50  ;;  %5974 = vmatprep.subr.bf16.mxu1 %v10054_v45  ;;  %v2322_v20 = vld [vmem:[%s11634_s5 + $0x588] sm:$0xff]  ;;  %v2203_v50 = vld [vmem:[%s11634_s5 + $0x1d0] sm:$0xff] }
 0x775   :  { %5850 = vmatprep.subr.bf16.mxu0 %v10013_v17  ;;  %v2202_v17 = vld [vmem:[%s11634_s5 + $0x1c8] sm:$0xff]  ;;  %v10096_v45 = vpack.c.bf16 %v2324_v8, %v2322_v20 }
 0x776   :  { %12274 = vst [vmem:[#allocation269_spill] sm:$0xff] %v10068_v32  ;;  %v10082_v16 = vpack.c.bf16 %v2204_v6, %v2202_v17  ;;  %v2321_v17 = vld [vmem:[%s11634_s5 + $0x580] sm:$0xff]  ;;  %v2323_v6 = vld [vmem:[%s11634_s5 + $0x590] sm:$0xff]  ;;  %v2326_v20 = vld [vmem:[%s11634_s5 + $0x5a8] sm:$0xff] }
 0x777   :  { %5976 = vmatpush1.bf16.msra.mxu1 %v10068_v32  ;;  %v2208_v32 = vld [vmem:[%s11634_s5 + $0x1f8] sm:$0xff]  ;;  %12277 = vst [vmem:[#allocation272_spill] sm:$0xff] %v10096_v45 }
 0x778   :  { %5852 = vmatpush1.bf16.msra.mxu0 %v10039_v49  ;;  %12276 = vst [vmem:[#allocation271_spill] sm:$0xff] %v10082_v16  ;;  %v10107_v49 = vpack.c.bf16 %v2203_v50, %v2201_v31  ;;  %5978 = vmatprep.subr.bf16.mxu1 %v10096_v45  ;;  %v10117_v8 = vpack.c.bf16 %v2208_v32, %v2206_v53  ;;  %v2210_v31 = vld [vmem:[%s11634_s5 + $0x208] sm:$0xff]  ;;  %v2328_v50 = vld [vmem:[%s11634_s5 + $0x5b8] sm:$0xff]  ;;  %v2325_v53 = vld [vmem:[%s11634_s5 + $0x5a0] sm:$0xff] }
 0x779   :  { %5854 = vmatprep.subr.bf16.mxu0 %v10049_v63  ;;  %v10104_v63 = vpack.c.bf16 %v2323_v6, %v2321_v17  ;;  %v2207_v17 = vld [vmem:[%s11634_s5 + $0x1f0] sm:$0xff]  ;;  %v2212_v6 = vld [vmem:[%s11634_s5 + $0x218] sm:$0xff]  ;;  %v10132_v32 = vpack.c.bf16 %v2328_v50, %v2326_v20  ;;  %v2330_v20 = vld [vmem:[%s11634_s5 + $0x5c8] sm:$0xff] }
 0x77a   :  { %12279 = vst [vmem:[#allocation274_spill] sm:$0xff] %v10107_v49  ;;  %12280 = vst [vmem:[#allocation275_spill] sm:$0xff] %v10117_v8  ;;  %v2327_v45 = vld [vmem:[%s11634_s5 + $0x5b0] sm:$0xff]  ;;  %v10150_v50 = vpack.c.bf16 %v2212_v6, %v2210_v31  ;;  %v2334_v31 = vld [vmem:[%s11634_s5 + $0x5e8] sm:$0xff] }
 0x77b   :  { %12278 = vst [vmem:[#allocation273_spill] sm:$0xff] %v10104_v63  ;;  %5980 = vmatpush1.bf16.msra.mxu1 %v10104_v63  ;;  %12281 = vst [vmem:[#allocation276_spill] sm:$0xff] %v10132_v32  ;;  %v10143_v63 = vpack.c.bf16 %v2207_v17, %v2205_v59  ;;  %v2329_v59 = vld [vmem:[%s11634_s5 + $0x5c0] sm:$0xff]  ;;  %v2331_v17 = vld [vmem:[%s11634_s5 + $0x5d0] sm:$0xff] }
 0x77c   :  { %5856 = vmatpush1.bf16.msra.mxu0 %v10072_v0  ;;  %5982 = vmatprep.subr.bf16.mxu1 %v10132_v32  ;;  %12284 = vst [vmem:[#allocation279_spill] sm:$0xff] %v10150_v50  ;;  %v10164_v32 = vpack.c.bf16 %v2331_v17, %v2329_v59  ;;  %v2336_v6 = vld [vmem:[%s11634_s5 + $0x5f8] sm:$0xff]  ;;  %v2335_v59 = vld [vmem:[%s11634_s5 + $0x5f0] sm:$0xff] }
 0x77d   :  { %5858 = vmatprep.subr.bf16.mxu0 %v10082_v16  ;;  %v10140_v16 = vpack.c.bf16 %v2327_v45, %v2325_v53  ;;  %12283 = vst [vmem:[#allocation278_spill] sm:$0xff] %v10143_v63  ;;  %v2332_v45 = vld [vmem:[%s11634_s5 + $0x5d8] sm:$0xff]  ;;  %v2215_v0 = vld [vmem:[%s11634_s5 + $0x230] sm:$0xff] }
 0x77e   :  { %v10156_v53 = vpack.c.bf16 %v2332_v45, %v2330_v20  ;;  %12286 = vst [vmem:[#allocation281_spill] sm:$0xff] %v10164_v32  ;;  %v10176_v20 = vpack.c.bf16 %v2336_v6, %v2334_v31  ;;  %v2333_v45 = vld [vmem:[%s11634_s5 + $0x5e0] sm:$0xff]  ;;  %v2340_v31 = vld [vmem:[%s11634_s5 + $0x618] sm:$0xff] }
 0x77f   :  { %12282 = vst [vmem:[#allocation277_spill] sm:$0xff] %v10140_v16  ;;  %5984 = vmatpush1.bf16.msra.mxu1 %v10140_v16  ;;  %v10184_v17 = vpack.c.bf16 %v2335_v59, %v2333_v45  ;;  %v2209_v59 = vld [vmem:[%s11634_s5 + $0x200] sm:$0xff] }
 0x780   :  { %5860 = vmatpush1.bf16.msra.mxu0 %v10107_v49  ;;  %12285 = vst [vmem:[#allocation280_spill] sm:$0xff] %v10156_v53  ;;  %5986 = vmatprep.subr.bf16.mxu1 %v10156_v53  ;;  %12287 = vst [vmem:[#allocation282_spill] sm:$0xff] %v10176_v20  ;;  %v2213_v49 = vld [vmem:[%s11634_s5 + $0x220] sm:$0xff] }
 0x781   :  { %5862 = vmatprep.subr.bf16.mxu0 %v10117_v8  ;;  %12288 = vst [vmem:[#allocation283_spill] sm:$0xff] %v10184_v17 }
 0x783   :  { %5988 = vmatpush1.bf16.msra.mxu1 %v10164_v32  ;;  %v2338_v32 = vld [vmem:[%s11634_s5 + $0x608] sm:$0xff] }
 0x784   :  { %5864 = vmatpush1.bf16.msra.mxu0 %v10143_v63  ;;  %5990 = vmatprep.subr.bf16.mxu1 %v10176_v20  ;;  %v10194_v6 = vpack.c.bf16 %v2340_v31, %v2338_v32  ;;  %v2214_v32 = vld [vmem:[%s11634_s5 + $0x228] sm:$0xff]  ;;  %v2216_v31 = vld [vmem:[%s11634_s5 + $0x238] sm:$0xff] }
 0x785   :  { %5866 = vmatprep.subr.bf16.mxu0 %v10150_v50  ;;  %v10217_v8 = vpack.c.bf16 %v2216_v31, %v2214_v32  ;;  %v2221_v32 = vld [vmem:[%s11634_s5 + $0x260] sm:$0xff]  ;;  %v2223_v31 = vld [vmem:[%s11634_s5 + $0x270] sm:$0xff] }
 0x786   :  { %12289 = vst [vmem:[#allocation284_spill] sm:$0xff] %v10194_v6 }
 0x787   :  { %5992 = vmatpush1.bf16.msra.mxu1 %v10184_v17  ;;  %v2211_v17 = vld [vmem:[%s11634_s5 + $0x210] sm:$0xff]  ;;  %12291 = vst [vmem:[#allocation286_spill] sm:$0xff] %v10217_v8 }
 0x788   :  { %5994 = vmatprep.subr.bf16.mxu1 %v10194_v6  ;;  %v10214_v50 = vpack.c.bf16 %v2211_v17, %v2209_v59  ;;  %v2218_v17 = vld [vmem:[%s11634_s5 + $0x248] sm:$0xff] }
 0x78a   :  { %12290 = vst [vmem:[#allocation285_spill] sm:$0xff] %v10214_v50 }
 0x7de   :  { %v10197_v53 = vpop.f32.mrb[14].mxu0 }
 0x7df   :  { %v10199_v45 = vpop.f32.mrb[15].mxu0 }
 0x7f2   :  { %v1846_v20 = vpop.f32.mrb[16].mxu0 }
 0x7f3   :  { %v1848_v6 = vpop.f32.mrb[17].mxu0  ;;  %v2135_v63 = vmul.f32 %v1846_v20, %v7349_v30  ;;  %v2220_v20 = vld [vmem:[%s11634_s5 + $0x258] sm:$0xff] }
 0x7f4   :  { %v2136_v16 = vmul.f32 %v1848_v6, %v7349_v30  ;;  %v10234_v6 = vpack.c.bf16 %v2215_v0, %v2213_v49  ;;  %v10237_v59 = vpack.c.bf16 %v2220_v20, %v2218_v17  ;;  %v2226_v17 = vld [vmem:[%s11634_s5 + $0x288] sm:$0xff]  ;;  %v2228_v20 = vld [vmem:[%s11634_s5 + $0x298] sm:$0xff] }
 0x7f6   :  { %2529 = vmatprep.mubr.f32.mxu0 %v2136_v16  ;;  %12292 = vst [vmem:[#allocation287_spill] sm:$0xff] %v10234_v6  ;;  %12293 = vst [vmem:[#allocation288_spill] sm:$0xff] %v10237_v59  ;;  %v2219_v16 = vld [vmem:[%s11634_s5 + $0x250] sm:$0xff] }
 0x7f7   :  { %2530 = vmatmul.mubr.f32.vlgmr.msra.gmra.mrb[22].mxu0 %v2135_v63  ;;  %v2222_v63 = vld [vmem:[%s11634_s5 + $0x268] sm:$0xff]  ;;  %v10252_v49 = vpack.c.bf16 %v2219_v16, %v2217_v55  ;;  %v10270_v55 = vpack.c.bf16 %v2223_v31, %v2221_v32  ;;  %v10273_v16 = vpack.c.bf16 %v2228_v20, %v2226_v17  ;;  %v2232_v32 = vld [vmem:[%s11634_s5 + $0x2b8] sm:$0xff]  ;;  %v2229_v17 = vld [vmem:[%s11634_s5 + $0x2a0] sm:$0xff] }
 0x7f8   :  { %5868 = vmatpush1.bf16.msra.mxu0 %v10214_v50  ;;  %2600 = vmatprep.mubr.f32.mxu0 %v2138_v19  ;;  %v2224_v19 = vld [vmem:[%s11634_s5 + $0x278] sm:$0xff] }
 0x7f9   :  { %5870 = vmatprep.subr.bf16.mxu0 %v10217_v8  ;;  %12294 = vst [vmem:[#allocation289_spill] sm:$0xff] %v10252_v49  ;;  %v10255_v0 = vpack.c.bf16 %v2224_v19, %v2222_v63  ;;  %12296 = vst [vmem:[#allocation291_spill] sm:$0xff] %v10270_v55  ;;  %v2225_v63 = vld [vmem:[%s11634_s5 + $0x280] sm:$0xff]  ;;  %v2227_v19 = vld [vmem:[%s11634_s5 + $0x290] sm:$0xff] }
 0x7fa   :  { %12297 = vst [vmem:[#allocation292_spill] sm:$0xff] %v10273_v16  ;;  %v10288_v31 = vpack.c.bf16 %v2227_v19, %v2225_v63  ;;  %v2339_v63 = vld [vmem:[%s11634_s5 + $0x610] sm:$0xff] }
 0x7fb   :  { %12295 = vst [vmem:[#allocation290_spill] sm:$0xff] %v10255_v0 }
 0x7fc   :  { %5872 = vmatpush1.bf16.msra.mxu0 %v10234_v6  ;;  %v2344_v6 = vld [vmem:[%s11634_s5 + $0x638] sm:$0xff] }
 0x7fd   :  { %5874 = vmatprep.subr.bf16.mxu0 %v10237_v59  ;;  %v2230_v59 = vld [vmem:[%s11634_s5 + $0x2a8] sm:$0xff] }
 0x7fe   :  { %v10294_v20 = vpack.c.bf16 %v2232_v32, %v2230_v59  ;;  %v2236_v59 = vld [vmem:[%s11634_s5 + $0x2d8] sm:$0xff] }
 0x800   :  { %5876 = vmatpush1.bf16.msra.mxu0 %v10252_v49  ;;  %12298 = vst [vmem:[#allocation293_spill] sm:$0xff] %v10294_v20  ;;  %v2337_v49 = vld [vmem:[%s11634_s5 + $0x600] sm:$0xff] }
 0x801   :  { %5878 = vmatprep.subr.bf16.mxu0 %v10255_v0  ;;  %v2231_v0 = vld [vmem:[%s11634_s5 + $0x2b0] sm:$0xff]  ;;  %v10321_v38 = vpack.c.bf16 %v2339_v63, %v2337_v49 }
 0x802   :  { %v10319_v50 = vpack.c.bf16 %v2231_v0, %v2229_v17  ;;  %v2341_v0 = vld [vmem:[%s11634_s5 + $0x620] sm:$0xff]  ;;  %v2343_v49 = vld [vmem:[%s11634_s5 + $0x630] sm:$0xff]  ;;  %v2238_v17 = vld [vmem:[%s11634_s5 + $0x2e8] sm:$0xff] }
 0x803   :  { %12300 = vst [vmem:[#allocation295_spill] sm:$0xff] %v10321_v38 }
 0x804   :  { %5880 = vmatpush1.bf16.msra.mxu0 %v10270_v55  ;;  %v2234_v55 = vld [vmem:[%s11634_s5 + $0x2c8] sm:$0xff]  ;;  %12299 = vst [vmem:[#allocation294_spill] sm:$0xff] %v10319_v50 }
 0x805   :  { %5882 = vmatprep.subr.bf16.mxu0 %v10273_v16  ;;  %v2342_v16 = vld [vmem:[%s11634_s5 + $0x628] sm:$0xff]  ;;  %v10331_v11 = vpack.c.bf16 %v2236_v59, %v2234_v55  ;;  %v2240_v55 = vld [vmem:[%s11634_s5 + $0x2f8] sm:$0xff] }
 0x806   :  { %v1988_v19 = vpop.f32.mrb[18].mxu0  ;;  %v10342_v63 = vpack.c.bf16 %v2344_v6, %v2342_v16  ;;  %v2348_v59 = vld [vmem:[%s11634_s5 + $0x658] sm:$0xff]  ;;  %v10359_v6 = vpack.c.bf16 %v2343_v49, %v2341_v0  ;;  %v2237_v16 = vld [vmem:[%s11634_s5 + $0x2e0] sm:$0xff]  ;;  %v2242_v0 = vld [vmem:[%s11634_s5 + $0x308] sm:$0xff] }
 0x807   :  { %v1990_v32 = vpop.f32.mrb[19].mxu0  ;;  %v2139_v23 = vmul.f32 %v1988_v19, %v7349_v30  ;;  %12301 = vst [vmem:[#allocation296_spill] sm:$0xff] %v10331_v11  ;;  %v2346_v19 = vld [vmem:[%s11634_s5 + $0x648] sm:$0xff]  ;;  %v2244_v49 = vld [vmem:[%s11634_s5 + $0x318] sm:$0xff] }
 0x808   :  { %v2140_v8 = vmul.f32 %v1990_v32, %v7349_v30  ;;  %5884 = vmatpush1.bf16.msra.mxu0 %v10288_v31  ;;  %12302 = vst [vmem:[#allocation297_spill] sm:$0xff] %v10342_v63  ;;  %v2142_v32 = vmul.f32 %v9589_v62, %v7349_v30  ;;  %12304 = vst [vmem:[#allocation299_spill] sm:$0xff] %v10359_v6  ;;  %v10370_v62 = vpack.c.bf16 %v2348_v59, %v2346_v19 }
 0x809   :  { %5886 = vmatprep.subr.bf16.mxu0 %v10294_v20  ;;  %v2239_v20 = vld [vmem:[%s11634_s5 + $0x2f0] sm:$0xff] }
 0x80a   :  { %2671 = vmatprep.mubr.f32.mxu1 %v2140_v8  ;;  %v10357_v8 = vpack.c.bf16 %v2235_v25, %v2233_v41  ;;  %12306 = vst [vmem:[#allocation301_spill] sm:$0xff] %v10370_v62  ;;  %v2345_v25 = vld [vmem:[%s11634_s5 + $0x640] sm:$0xff]  ;;  %v2347_v41 = vld [vmem:[%s11634_s5 + $0x650] sm:$0xff]  ;;  %v10393_v19 = vpack.c.bf16 %v2239_v20, %v2237_v16 }
 0x80b   :  { %2672 = vmatmul.mubr.f32.vlgmr.msra.gmra.mrb[20].mxu1 %v2139_v23  ;;  %v10368_v23 = vpack.c.bf16 %v2240_v55, %v2238_v17  ;;  %v2350_v17 = vld [vmem:[%s11634_s5 + $0x668] sm:$0xff]  ;;  %v2352_v55 = vld [vmem:[%s11634_s5 + $0x678] sm:$0xff]  ;;  %v10395_v59 = vpack.c.bf16 %v2347_v41, %v2345_v25  ;;  %v2349_v20 = vld [vmem:[%s11634_s5 + $0x660] sm:$0xff] }
 0x80c   :  { %5888 = vmatpush1.bf16.msra.mxu0 %v10319_v50  ;;  %5996 = vmatpush1.bf16.msra.mxu1 %v10321_v38  ;;  %12303 = vst [vmem:[#allocation298_spill] sm:$0xff] %v10357_v8  ;;  %12307 = vst [vmem:[#allocation302_spill] sm:$0xff] %v10393_v19  ;;  %v10405_v38 = vpack.c.bf16 %v2244_v49, %v2242_v0  ;;  %v2351_v16 = vld [vmem:[%s11634_s5 + $0x670] sm:$0xff]  ;;  %v2246_v25 = vld [vmem:[%s11634_s5 + $0x328] sm:$0xff] }
 0x80d   :  { %2742 = vmatprep.mubr.f32.mxu1 %v2142_v32  ;;  %5890 = vmatprep.subr.bf16.mxu0 %v10331_v11  ;;  %12305 = vst [vmem:[#allocation300_spill] sm:$0xff] %v10368_v23  ;;  %12308 = vst [vmem:[#allocation303_spill] sm:$0xff] %v10395_v59  ;;  %v2241_v32 = vld [vmem:[%s11634_s5 + $0x300] sm:$0xff]  ;;  %v2248_v41 = vld [vmem:[%s11634_s5 + $0x338] sm:$0xff] }
 0x80e   :  { %5998 = vmatprep.subr.bf16.mxu1 %v10342_v63  ;;  %v2243_v63 = vld [vmem:[%s11634_s5 + $0x310] sm:$0xff]  ;;  %12309 = vst [vmem:[#allocation304_spill] sm:$0xff] %v10405_v38  ;;  %v2354_v0 = vld [vmem:[%s11634_s5 + $0x688] sm:$0xff]  ;;  %v2356_v49 = vld [vmem:[%s11634_s5 + $0x698] sm:$0xff] }
 0x80f   :  { %v2255_v11 = vld [vmem:[%s11634_s5 + $0x370] sm:$0xff] }
 0x810   :  { %5892 = vmatpush1.bf16.msra.mxu0 %v10357_v8  ;;  %6000 = vmatpush1.bf16.msra.mxu1 %v10359_v6  ;;  %v10407_v8 = vpack.c.bf16 %v2352_v55, %v2350_v17  ;;  %v10429_v17 = vpack.c.bf16 %v2243_v63, %v2241_v32  ;;  %v10431_v55 = vpack.c.bf16 %v2351_v16, %v2349_v20  ;;  %v2247_v6 = vld [vmem:[%s11634_s5 + $0x330] sm:$0xff]  ;;  %v2353_v63 = vld [vmem:[%s11634_s5 + $0x680] sm:$0xff]  ;;  %v2250_v20 = vld [vmem:[%s11634_s5 + $0x348] sm:$0xff] }
 0x811   :  { %5894 = vmatprep.subr.bf16.mxu0 %v10368_v23  ;;  %6002 = vmatprep.subr.bf16.mxu1 %v10370_v62  ;;  %v2245_v62 = vld [vmem:[%s11634_s5 + $0x320] sm:$0xff]  ;;  %v10441_v23 = vpack.c.bf16 %v2248_v41, %v2246_v25  ;;  %v2355_v32 = vld [vmem:[%s11634_s5 + $0x690] sm:$0xff]  ;;  %v2252_v16 = vld [vmem:[%s11634_s5 + $0x358] sm:$0xff] }
 0x812   :  { %12310 = vst [vmem:[#allocation305_spill] sm:$0xff] %v10407_v8  ;;  %12311 = vst [vmem:[#allocation306_spill] sm:$0xff] %v10429_v17  ;;  %v2358_v25 = vld [vmem:[%s11634_s5 + $0x6a8] sm:$0xff]  ;;  %v2360_v41 = vld [vmem:[%s11634_s5 + $0x6b8] sm:$0xff] }
 0x813   :  { %12312 = vst [vmem:[#allocation307_spill] sm:$0xff] %v10431_v55  ;;  %12313 = vst [vmem:[#allocation308_spill] sm:$0xff] %v10441_v23 }
 0x814   :  { %5896 = vmatpush1.bf16.msra.mxu0 %v10393_v19  ;;  %6004 = vmatpush1.bf16.msra.mxu1 %v10395_v59  ;;  %v10443_v19 = vpack.c.bf16 %v2356_v49, %v2354_v0  ;;  %v10465_v0 = vpack.c.bf16 %v2247_v6, %v2245_v62  ;;  %v10467_v49 = vpack.c.bf16 %v2355_v32, %v2353_v63  ;;  %v2251_v59 = vld [vmem:[%s11634_s5 + $0x350] sm:$0xff]  ;;  %v2357_v6 = vld [vmem:[%s11634_s5 + $0x6a0] sm:$0xff]  ;;  %v2254_v63 = vld [vmem:[%s11634_s5 + $0x368] sm:$0xff] }
 0x815   :  { %5898 = vmatprep.subr.bf16.mxu0 %v10405_v38  ;;  %6006 = vmatprep.subr.bf16.mxu1 %v10407_v8  ;;  %v2249_v8 = vld [vmem:[%s11634_s5 + $0x340] sm:$0xff]  ;;  %v10477_v38 = vpack.c.bf16 %v2252_v16, %v2250_v20  ;;  %v2359_v62 = vld [vmem:[%s11634_s5 + $0x6b0] sm:$0xff]  ;;  %v2256_v20 = vld [vmem:[%s11634_s5 + $0x378] sm:$0xff] }
 0x816   :  { %12314 = vst [vmem:[#allocation309_spill] sm:$0xff] %v10443_v19  ;;  %12315 = vst [vmem:[#allocation310_spill] sm:$0xff] %v10465_v0  ;;  %v2362_v16 = vld [vmem:[%s11634_s5 + $0x6c8] sm:$0xff]  ;;  %v10517_v50 = vpack.c.bf16 %v2256_v20, %v2254_v63  ;;  %v2368_v20 = vld [vmem:[%s11634_s5 + $0x6f8] sm:$0xff] }
 0x817   :  { %12316 = vst [vmem:[#allocation311_spill] sm:$0xff] %v10467_v49  ;;  %12317 = vst [vmem:[#allocation312_spill] sm:$0xff] %v10477_v38  ;;  %v2366_v63 = vld [vmem:[%s11634_s5 + $0x6e8] sm:$0xff] }
 0x818   :  { %5900 = vmatpush1.bf16.msra.mxu0 %v10429_v17  ;;  %6008 = vmatpush1.bf16.msra.mxu1 %v10431_v55  ;;  %v10479_v17 = vpack.c.bf16 %v2360_v41, %v2358_v25  ;;  %v2364_v25 = vld [vmem:[%s11634_s5 + $0x6d8] sm:$0xff]  ;;  %v10507_v55 = vpack.c.bf16 %v2359_v62, %v2357_v6  ;;  %12321 = vst [vmem:[#allocation316_spill] sm:$0xff] %v10517_v50  ;;  %v2258_v6 = vld [vmem:[%s11634_s5 + $0x388] sm:$0xff] }
 0x819   :  { %5902 = vmatprep.subr.bf16.mxu0 %v10441_v23  ;;  %6010 = vmatprep.subr.bf16.mxu1 %v10443_v19  ;;  %v10505_v19 = vpack.c.bf16 %v2251_v59, %v2249_v8  ;;  %v2253_v23 = vld [vmem:[%s11634_s5 + $0x360] sm:$0xff]  ;;  %v2363_v59 = vld [vmem:[%s11634_s5 + $0x6d0] sm:$0xff]  ;;  %v2260_v62 = vld [vmem:[%s11634_s5 + $0x398] sm:$0xff] }
 0x81a   :  { %12318 = vst [vmem:[#allocation313_spill] sm:$0xff] %v10479_v17  ;;  %v10490_v32 = vpop.f32.mrb[20].mxu0  ;;  %12320 = vst [vmem:[#allocation315_spill] sm:$0xff] %v10507_v55  ;;  %v2361_v8 = vld [vmem:[%s11634_s5 + $0x6c0] sm:$0xff] }
 0x81b   :  { %v10501_v41 = vpop.f32.mrb[21].mxu0  ;;  %12319 = vst [vmem:[#allocation314_spill] sm:$0xff] %v10505_v19 }
 0x81c   :  { %5904 = vmatpush1.bf16.msra.mxu0 %v10465_v0  ;;  %6012 = vmatpush1.bf16.msra.mxu1 %v10467_v49  ;;  %v10519_v0 = vpack.c.bf16 %v2364_v25, %v2362_v16  ;;  %v10541_v16 = vpack.c.bf16 %v2255_v11, %v2253_v23  ;;  %v10543_v25 = vpack.c.bf16 %v2363_v59, %v2361_v8  ;;  %v2259_v49 = vld [vmem:[%s11634_s5 + $0x390] sm:$0xff]  ;;  %v2365_v11 = vld [vmem:[%s11634_s5 + $0x6e0] sm:$0xff]  ;;  %v2262_v8 = vld [vmem:[%s11634_s5 + $0x3a8] sm:$0xff] }
 0x81d   :  { %5906 = vmatprep.subr.bf16.mxu0 %v10477_v38  ;;  %6014 = vmatprep.subr.bf16.mxu1 %v10479_v17  ;;  %v2257_v17 = vld [vmem:[%s11634_s5 + $0x380] sm:$0xff]  ;;  %v10553_v38 = vpack.c.bf16 %v2260_v62, %v2258_v6  ;;  %v2367_v23 = vld [vmem:[%s11634_s5 + $0x6f0] sm:$0xff]  ;;  %v2264_v59 = vld [vmem:[%s11634_s5 + $0x3b8] sm:$0xff] }
 0x81e   :  { %12322 = vst [vmem:[#allocation317_spill] sm:$0xff] %v10519_v0  ;;  %12323 = vst [vmem:[#allocation318_spill] sm:$0xff] %v10541_v16  ;;  %v2370_v6 = vld [vmem:[%s11634_s5 + $0x708] sm:$0xff]  ;;  %v2372_v62 = vld [vmem:[%s11634_s5 + $0x718] sm:$0xff] }
 0x81f   :  { %12324 = vst [vmem:[#allocation319_spill] sm:$0xff] %v10543_v25  ;;  %12325 = vst [vmem:[#allocation320_spill] sm:$0xff] %v10553_v38 }
 0x820   :  { %5908 = vmatpush1.bf16.msra.mxu0 %v10505_v19  ;;  %6016 = vmatpush1.bf16.msra.mxu1 %v10507_v55  ;;  %v10555_v19 = vpack.c.bf16 %v2368_v20, %v2366_v63  ;;  %v10577_v63 = vpack.c.bf16 %v2259_v49, %v2257_v17  ;;  %v10579_v20 = vpack.c.bf16 %v2367_v23, %v2365_v11  ;;  %v2263_v55 = vld [vmem:[%s11634_s5 + $0x3b0] sm:$0xff]  ;;  %v2369_v17 = vld [vmem:[%s11634_s5 + $0x700] sm:$0xff]  ;;  %v2266_v11 = vld [vmem:[%s11634_s5 + $0x3c8] sm:$0xff] }
 0x821   :  { %5910 = vmatprep.subr.bf16.mxu0 %v10517_v50  ;;  %6018 = vmatprep.subr.bf16.mxu1 %v10519_v0  ;;  %v2261_v0 = vld [vmem:[%s11634_s5 + $0x3a0] sm:$0xff]  ;;  %v10589_v50 = vpack.c.bf16 %v2264_v59, %v2262_v8  ;;  %v2371_v49 = vld [vmem:[%s11634_s5 + $0x710] sm:$0xff]  ;;  %v2268_v23 = vld [vmem:[%s11634_s5 + $0x3d8] sm:$0xff] }
 0x822   :  { %12326 = vst [vmem:[#allocation321_spill] sm:$0xff] %v10555_v19  ;;  %12327 = vst [vmem:[#allocation322_spill] sm:$0xff] %v10577_v63  ;;  %v2374_v8 = vld [vmem:[%s11634_s5 + $0x728] sm:$0xff]  ;;  %v2376_v59 = vld [vmem:[%s11634_s5 + $0x738] sm:$0xff] }
 0x823   :  { %12328 = vst [vmem:[#allocation323_spill] sm:$0xff] %v10579_v20  ;;  %12329 = vst [vmem:[#allocation324_spill] sm:$0xff] %v10589_v50 }
 0x824   :  { %5912 = vmatpush1.bf16.msra.mxu0 %v10541_v16  ;;  %6020 = vmatpush1.bf16.msra.mxu1 %v10543_v25  ;;  %v10591_v16 = vpack.c.bf16 %v2372_v62, %v2370_v6  ;;  %v10613_v6 = vpack.c.bf16 %v2263_v55, %v2261_v0  ;;  %v10615_v62 = vpack.c.bf16 %v2371_v49, %v2369_v17  ;;  %v2267_v25 = vld [vmem:[%s11634_s5 + $0x3d0] sm:$0xff]  ;;  %v2373_v55 = vld [vmem:[%s11634_s5 + $0x720] sm:$0xff]  ;;  %v2270_v17 = vld [vmem:[%s11634_s5 + $0x3e8] sm:$0xff] }
 0x825   :  { %5914 = vmatprep.subr.bf16.mxu0 %v10553_v38  ;;  %6022 = vmatprep.subr.bf16.mxu1 %v10555_v19  ;;  %v2265_v19 = vld [vmem:[%s11634_s5 + $0x3c0] sm:$0xff]  ;;  %v10625_v38 = vpack.c.bf16 %v2268_v23, %v2266_v11  ;;  %v2375_v0 = vld [vmem:[%s11634_s5 + $0x730] sm:$0xff]  ;;  %v2272_v49 = vld [vmem:[%s11634_s5 + $0x3f8] sm:$0xff] }
 0x826   :  { %12330 = vst [vmem:[#allocation325_spill] sm:$0xff] %v10591_v16  ;;  %12331 = vst [vmem:[#allocation326_spill] sm:$0xff] %v10615_v62  ;;  %v2378_v11 = vld [vmem:[%s11634_s5 + $0x748] sm:$0xff]  ;;  %v2380_v23 = vld [vmem:[%s11634_s5 + $0x758] sm:$0xff] }
 0x828   :  { %5916 = vmatpush1.bf16.msra.mxu0 %v10577_v63  ;;  %6024 = vmatpush1.bf16.msra.mxu1 %v10579_v20  ;;  %v10627_v63 = vpack.c.bf16 %v2376_v59, %v2374_v8  ;;  %v10649_v8 = vpack.c.bf16 %v2267_v25, %v2265_v19  ;;  %v10651_v59 = vpack.c.bf16 %v2375_v0, %v2373_v55  ;;  %v2377_v19 = vld [vmem:[%s11634_s5 + $0x740] sm:$0xff]  ;;  %v2379_v25 = vld [vmem:[%s11634_s5 + $0x750] sm:$0xff]  ;;  %v2382_v55 = vld [vmem:[%s11634_s5 + $0x768] sm:$0xff] }
 0x829   :  { %5918 = vmatprep.subr.bf16.mxu0 %v10589_v50  ;;  %6026 = vmatprep.subr.bf16.mxu1 %v10591_v16  ;;  %v2269_v16 = vld [vmem:[%s11634_s5 + $0x3e0] sm:$0xff]  ;;  %v10658_v20 = vpack.c.bf16 %v2272_v49, %v2270_v17  ;;  %v10660_v50 = vpack.c.bf16 %v2380_v23, %v2378_v11  ;;  %v2384_v0 = vld [vmem:[%s11634_s5 + $0x778] sm:$0xff]  ;;  %v10681_v49 = vpack.c.bf16 %v2379_v25, %v2377_v19 }
 0x82a   :  { %12332 = vst [vmem:[#allocation327_spill] sm:$0xff] %v10627_v63  ;;  %v10685_v11 = vpack.c.bf16 %v2384_v0, %v2382_v55  ;;  %v2381_v23 = vld [vmem:[%s11634_s5 + $0x760] sm:$0xff]  ;;  %v2137_v25 = vmul.f32 %v9489_v43, %v7349_v30  ;;  %v2392_v43 = vld [vmem:[%s11634_s5 + $0x7b8] sm:$0xff] }
 0x82b   :  { %12333 = vst [vmem:[#allocation328_spill] sm:$0xff] %v10660_v50  ;;  %v2385_v0 = vld [vmem:[%s11634_s5 + $0x780] sm:$0xff] }
 0x82c   :  { %5920 = vmatpush1.bf16.msra.mxu0 %v10613_v6  ;;  %6028 = vmatpush1.bf16.msra.mxu1 %v10615_v62  ;;  %v2271_v62 = vld [vmem:[%s11634_s5 + $0x3f0] sm:$0xff]  ;;  %12334 = vst [vmem:[#allocation329_spill] sm:$0xff] %v10685_v11 }
 0x82d   :  { %5922 = vmatprep.subr.bf16.mxu0 %v10625_v38  ;;  %6030 = vmatprep.subr.bf16.mxu1 %v10627_v63  ;;  %v10679_v17 = vpack.c.bf16 %v2271_v62, %v2269_v16  ;;  %v2383_v63 = vld [vmem:[%s11634_s5 + $0x770] sm:$0xff]  ;;  %v2386_v16 = vld [vmem:[%s11634_s5 + $0x788] sm:$0xff]  ;;  %v2388_v62 = vld [vmem:[%s11634_s5 + $0x798] sm:$0xff] }
 0x82e   :  { %v10701_v19 = vpack.c.bf16 %v2383_v63, %v2381_v23  ;;  %v10706_v55 = vpack.c.bf16 %v2388_v62, %v2386_v16  ;;  %v2390_v63 = vld [vmem:[%s11634_s5 + $0x7a8] sm:$0xff]  ;;  %v2389_v62 = vld [vmem:[%s11634_s5 + $0x7a0] sm:$0xff] }
 0x82f   :  { %v10726_v16 = vpack.c.bf16 %v2392_v43, %v2390_v63  ;;  %v2393_v43 = vld [vmem:[%s11634_s5 + $0x7c0] sm:$0xff] }
 0x830   :  { %5924 = vmatpush1.bf16.msra.mxu0 %v10649_v8  ;;  %6032 = vmatpush1.bf16.msra.mxu1 %v10651_v59  ;;  %12335 = vst [vmem:[#allocation330_spill] sm:$0xff] %v10701_v19  ;;  %12336 = vst [vmem:[#allocation331_spill] sm:$0xff] %v10706_v55 }
 0x831   :  { %5926 = vmatprep.subr.bf16.mxu0 %v10658_v20  ;;  %6034 = vmatprep.subr.bf16.mxu1 %v10660_v50  ;;  %v2387_v50 = vld [vmem:[%s11634_s5 + $0x790] sm:$0xff]  ;;  %12338 = vst [vmem:[#allocation333_spill] sm:$0xff] %v10726_v16 }
 0x832   :  { %v10722_v23 = vpack.c.bf16 %v2387_v50, %v2385_v0  ;;  %v2394_v50 = vld [vmem:[%s11634_s5 + $0x7c8] sm:$0xff] }
 0x834   :  { %5928 = vmatpush1.bf16.msra.mxu0 %v10679_v17  ;;  %6036 = vmatpush1.bf16.msra.mxu1 %v10681_v49  ;;  %12337 = vst [vmem:[#allocation332_spill] sm:$0xff] %v10722_v23 }
 0x835   :  { %6038 = vmatprep.subr.bf16.mxu1 %v10685_v11  ;;  %6121 = vmatprep.subr.bf16.mxu0 %v12146_v14  ;;  %v2391_v11 = vld [vmem:[%s11634_s5 + $0x7b0] sm:$0xff] }
 0x836   :  { %v10742_v0 = vpack.c.bf16 %v2391_v11, %v2389_v62  ;;  %v2398_v11 = vld [vmem:[%s11634_s5 + $0x7e8] sm:$0xff]  ;;  %v2400_v62 = vld [vmem:[%s11634_s5 + $0x7f8] sm:$0xff] }
 0x837   :  { %2601 = vmatmul.mubr.f32.vlgmr.msra.gmra.mrb[22].mxu0 %v2137_v25  ;;  %v2396_v25 = vld [vmem:[%s11634_s5 + $0x7d8] sm:$0xff] }
 0x838   :  { %6040 = vmatpush1.bf16.msra.mxu1 %v10701_v19  ;;  %6123 = vmatpush1.bf16.msra.mxu0 %v7265_v2  ;;  %12339 = vst [vmem:[#allocation334_spill] sm:$0xff] %v10742_v0  ;;  %v10746_v63 = vpack.c.bf16 %v2396_v25, %v2394_v50  ;;  %v10766_v25 = vpack.c.bf16 %v2400_v62, %v2398_v11  ;;  %v2407_v19 = vld [vmem:[%s11634_s5 + $0x830] sm:$0xff] }
 0x839   :  { %6042 = vmatprep.subr.bf16.mxu1 %v10706_v55  ;;  %6124 = vmatprep.subr.bf16.mxu0 %v12146_v14  ;;  %v2395_v55 = vld [vmem:[%s11634_s5 + $0x7d0] sm:$0xff] }
 0x83a   :  { %12340 = vst [vmem:[#allocation335_spill] sm:$0xff] %v10746_v63  ;;  %v10762_v50 = vpack.c.bf16 %v2395_v55, %v2393_v43  ;;  %12342 = vst [vmem:[#allocation337_spill] sm:$0xff] %v10766_v25  ;;  %v2402_v55 = vld [vmem:[%s11634_s5 + $0x808] sm:$0xff]  ;;  %v2404_v43 = vld [vmem:[%s11634_s5 + $0x818] sm:$0xff] }
 0x83b   :  { %v10786_v62 = vpack.c.bf16 %v2404_v43, %v2402_v55  ;;  %v2141_v43 = vmul.f32 %v9586_v56, %v7349_v30  ;;  %v2410_v56 = vld [vmem:[%s11634_s5 + $0x848] sm:$0xff] }
 0x83c   :  { %6044 = vmatpush1.bf16.msra.mxu1 %v10722_v23  ;;  %6126 = vmatpush1.bf16.msra.mxu0 %v7271_v5  ;;  %12341 = vst [vmem:[#allocation336_spill] sm:$0xff] %v10762_v50  ;;  %v2399_v23 = vld [vmem:[%s11634_s5 + $0x7f0] sm:$0xff] }
 0x83d   :  { %6046 = vmatprep.subr.bf16.mxu1 %v10726_v16  ;;  %6127 = vmatprep.subr.bf16.mxu0 %v12146_v14  ;;  %v2397_v16 = vld [vmem:[%s11634_s5 + $0x7e0] sm:$0xff]  ;;  %12343 = vst [vmem:[#allocation338_spill] sm:$0xff] %v10786_v62 }
 0x83e   :  { %v10782_v11 = vpack.c.bf16 %v2399_v23, %v2397_v16  ;;  %v2406_v23 = vld [vmem:[%s11634_s5 + $0x828] sm:$0xff]  ;;  %v2408_v16 = vld [vmem:[%s11634_s5 + $0x838] sm:$0xff] }
 0x840   :  { %6048 = vmatpush1.bf16.msra.mxu1 %v10742_v0  ;;  %6129 = vmatpush1.bf16.msra.mxu0 %v7281_v9  ;;  %v2403_v0 = vld [vmem:[%s11634_s5 + $0x810] sm:$0xff] }
 0x841   :  { %6050 = vmatprep.subr.bf16.mxu1 %v10746_v63  ;;  %6130 = vmatprep.subr.bf16.mxu0 %v12146_v14  ;;  %v2401_v63 = vld [vmem:[%s11634_s5 + $0x800] sm:$0xff] }
 0x842   :  { %v10802_v55 = vpack.c.bf16 %v2403_v0, %v2401_v63  ;;  %v2144_v0 = vmul.f32 %v10501_v41, %v7349_v30  ;;  %v2412_v63 = vld [vmem:[%s11634_s5 + $0x858] sm:$0xff]  ;;  %v2409_v41 = vld [vmem:[%s11634_s5 + $0x840] sm:$0xff] }
 0x844   :  { %6052 = vmatpush1.bf16.msra.mxu1 %v10762_v50  ;;  %6132 = vmatpush1.bf16.msra.mxu0 %v7291_v12  ;;  %v2405_v50 = vld [vmem:[%s11634_s5 + $0x820] sm:$0xff] }
 0x845   :  { %6054 = vmatprep.subr.bf16.mxu1 %v10766_v25  ;;  %6133 = vmatprep.subr.bf16.mxu0 %v12146_v14  ;;  %v10808_v25 = vpack.c.bf16 %v2408_v16, %v2406_v23  ;;  %v10826_v23 = vpack.c.bf16 %v2407_v19, %v2405_v50  ;;  %v10829_v16 = vpack.c.bf16 %v2412_v63, %v2410_v56  ;;  %v2416_v19 = vld [vmem:[%s11634_s5 + $0x878] sm:$0xff]  ;;  %v2413_v56 = vld [vmem:[%s11634_s5 + $0x860] sm:$0xff]  ;;  %v2415_v63 = vld [vmem:[%s11634_s5 + $0x870] sm:$0xff] }
 0x847   :  { %12344 = vst [vmem:[#allocation339_spill] sm:$0xff] %v10808_v25  ;;  %12345 = vst [vmem:[#allocation340_spill] sm:$0xff] %v10826_v23 }
 0x848   :  { %6056 = vmatpush1.bf16.msra.mxu1 %v10782_v11  ;;  %6135 = vmatpush1.bf16.msra.mxu0 %v7301_v15  ;;  %12346 = vst [vmem:[#allocation341_spill] sm:$0xff] %v10829_v16 }
 0x849   :  { %6058 = vmatprep.subr.bf16.mxu1 %v10786_v62  ;;  %6136 = vmatprep.subr.bf16.mxu0 %v12146_v14  ;;  %v2411_v62 = vld [vmem:[%s11634_s5 + $0x850] sm:$0xff] }
 0x84a   :  { %v10846_v50 = vpack.c.bf16 %v2411_v62, %v2409_v41  ;;  %v2420_v62 = vld [vmem:[%s11634_s5 + $0x898] sm:$0xff]  ;;  %v10866_v41 = vpack.c.bf16 %v2415_v63, %v2413_v56 }
 0x84b   :  { %2743 = vmatmul.mubr.f32.vlgmr.msra.gmra.mrb[20].mxu1 %v2141_v43  ;;  %v2414_v43 = vld [vmem:[%s11634_s5 + $0x868] sm:$0xff]  ;;  %v2424_v56 = vld [vmem:[%s11634_s5 + $0x8b8] sm:$0xff] }
 0x84c   :  { %6060 = vmatpush1.bf16.msra.mxu1 %v10802_v55  ;;  %2813 = vmatprep.mubr.f32.mxu1 %v2144_v0  ;;  %12347 = vst [vmem:[#allocation342_spill] sm:$0xff] %v10846_v50  ;;  %v10849_v0 = vpack.c.bf16 %v2416_v19, %v2414_v43  ;;  %12349 = vst [vmem:[#allocation344_spill] sm:$0xff] %v10866_v41  ;;  %v2417_v19 = vld [vmem:[%s11634_s5 + $0x880] sm:$0xff] }
 0x84d   :  { %6062 = vmatprep.subr.bf16.mxu1 %v10808_v25  ;;  %6138 = vmatpush1.bf16.msra.mxu0 %v7311_v18  ;;  %v2434_v25 = vld [vmem:[%s11634_s5 + $0x908] sm:$0xff] }
 0x84e   :  { %6139 = vmatprep.subr.bf16.mxu0 %v12146_v14  ;;  %12348 = vst [vmem:[#allocation343_spill] sm:$0xff] %v10849_v0 }
 0x850   :  { %6064 = vmatpush1.bf16.msra.mxu1 %v10826_v23  ;;  %v2418_v23 = vld [vmem:[%s11634_s5 + $0x888] sm:$0xff] }
 0x851   :  { %6066 = vmatprep.subr.bf16.mxu1 %v10829_v16  ;;  %6141 = vmatpush1.bf16.msra.mxu0 %v7321_v21  ;;  %v10869_v43 = vpack.c.bf16 %v2420_v62, %v2418_v23  ;;  %v2419_v16 = vld [vmem:[%s11634_s5 + $0x890] sm:$0xff]  ;;  %v2421_v62 = vld [vmem:[%s11634_s5 + $0x8a0] sm:$0xff] }
 0x852   :  { %6142 = vmatprep.subr.bf16.mxu0 %v12146_v14  ;;  %v10886_v23 = vpack.c.bf16 %v2419_v16, %v2417_v19  ;;  %v2428_v16 = vld [vmem:[%s11634_s5 + $0x8d8] sm:$0xff] }
 0x853   :  { %12350 = vst [vmem:[#allocation345_spill] sm:$0xff] %v10869_v43 }
 0x854   :  { %6068 = vmatpush1.bf16.msra.mxu1 %v10846_v50  ;;  %v2422_v50 = vld [vmem:[%s11634_s5 + $0x8a8] sm:$0xff]  ;;  %12351 = vst [vmem:[#allocation346_spill] sm:$0xff] %v10886_v23 }
 0x855   :  { %6070 = vmatprep.subr.bf16.mxu1 %v10849_v0  ;;  %6144 = vmatpush1.bf16.msra.mxu0 %v7331_v24  ;;  %v10889_v63 = vpack.c.bf16 %v2424_v56, %v2422_v50  ;;  %v2423_v0 = vld [vmem:[%s11634_s5 + $0x8b0] sm:$0xff]  ;;  %v2425_v56 = vld [vmem:[%s11634_s5 + $0x8c0] sm:$0xff] }
 0x856   :  { %6145 = vmatprep.subr.bf16.mxu0 %v12146_v14  ;;  %v10906_v50 = vpack.c.bf16 %v2423_v0, %v2421_v62  ;;  %v2432_v0 = vld [vmem:[%s11634_s5 + $0x8f8] sm:$0xff] }
 0x857   :  { %12352 = vst [vmem:[#allocation347_spill] sm:$0xff] %v10889_v63 }
 0x858   :  { %6072 = vmatpush1.bf16.msra.mxu1 %v10866_v41  ;;  %v2426_v41 = vld [vmem:[%s11634_s5 + $0x8c8] sm:$0xff]  ;;  %12353 = vst [vmem:[#allocation348_spill] sm:$0xff] %v10906_v50 }
 0x859   :  { %6074 = vmatprep.subr.bf16.mxu1 %v10869_v43  ;;  %6147 = vmatpush1.bf16.msra.mxu0 %v7341_v27  ;;  %v10909_v19 = vpack.c.bf16 %v2428_v16, %v2426_v41  ;;  %v2427_v43 = vld [vmem:[%s11634_s5 + $0x8d0] sm:$0xff]  ;;  %v2429_v16 = vld [vmem:[%s11634_s5 + $0x8e0] sm:$0xff] }
 0x85a   :  { %6148 = vmatprep.subr.bf16.mxu0 %v12146_v14  ;;  %v10926_v41 = vpack.c.bf16 %v2427_v43, %v2425_v56  ;;  %v2436_v43 = vld [vmem:[%s11634_s5 + $0x918] sm:$0xff] }
 0x85b   :  { %12354 = vst [vmem:[#allocation349_spill] sm:$0xff] %v10909_v19  ;;  %v10947_v56 = vpack.c.bf16 %v2436_v43, %v2434_v25  ;;  %v2437_v43 = vld [vmem:[%s11634_s5 + $0x920] sm:$0xff] }
 0x85c   :  { %6076 = vmatpush1.bf16.msra.mxu1 %v10886_v23  ;;  %v2430_v23 = vld [vmem:[%s11634_s5 + $0x8e8] sm:$0xff]  ;;  %12355 = vst [vmem:[#allocation350_spill] sm:$0xff] %v10926_v41 }
 0x85d   :  { %6078 = vmatprep.subr.bf16.mxu1 %v10889_v63  ;;  %6150 = vmatpush1.bf16.msra.mxu0 %v7359_v34  ;;  %v10929_v62 = vpack.c.bf16 %v2432_v0, %v2430_v23  ;;  %v2431_v63 = vld [vmem:[%s11634_s5 + $0x8f0] sm:$0xff]  ;;  %12358 = vst [vmem:[#allocation353_spill] sm:$0xff] %v10947_v56  ;;  %v2433_v0 = vld [vmem:[%s11634_s5 + $0x900] sm:$0xff] }
 0x85e   :  { %6152 = vmatprep.subr.bf16.mxu0 %v7380_v42  ;;  %v10944_v23 = vpack.c.bf16 %v2431_v63, %v2429_v16  ;;  %v2440_v63 = vld [vmem:[%s11634_s5 + $0x938] sm:$0xff] }
 0x85f   :  { %12356 = vst [vmem:[#allocation351_spill] sm:$0xff] %v10929_v62 }
 0x860   :  { %6080 = vmatpush1.bf16.msra.mxu1 %v10906_v50  ;;  %12357 = vst [vmem:[#allocation352_spill] sm:$0xff] %v10944_v23  ;;  %v2438_v50 = vld [vmem:[%s11634_s5 + $0x928] sm:$0xff] }
 0x861   :  { %6082 = vmatprep.subr.bf16.mxu1 %v10909_v19  ;;  %v2435_v19 = vld [vmem:[%s11634_s5 + $0x910] sm:$0xff]  ;;  %v10965_v16 = vpack.c.bf16 %v2440_v63, %v2438_v50  ;;  %v2441_v63 = vld [vmem:[%s11634_s5 + $0x940] sm:$0xff] }
 0x862   :  { %v10962_v25 = vpack.c.bf16 %v2435_v19, %v2433_v0  ;;  %v2444_v19 = vld [vmem:[%s11634_s5 + $0x958] sm:$0xff] }
 0x863   :  { %12360 = vst [vmem:[#allocation355_spill] sm:$0xff] %v10965_v16 }
 0x864   :  { %6084 = vmatpush1.bf16.msra.mxu1 %v10926_v41  ;;  %12359 = vst [vmem:[#allocation354_spill] sm:$0xff] %v10962_v25  ;;  %v2442_v41 = vld [vmem:[%s11634_s5 + $0x948] sm:$0xff] }
 0x865   :  { %6086 = vmatprep.subr.bf16.mxu1 %v10929_v62  ;;  %v2439_v62 = vld [vmem:[%s11634_s5 + $0x930] sm:$0xff]  ;;  %v10983_v0 = vpack.c.bf16 %v2444_v19, %v2442_v41  ;;  %v2445_v19 = vld [vmem:[%s11634_s5 + $0x960] sm:$0xff] }
 0x866   :  { %v10980_v50 = vpack.c.bf16 %v2439_v62, %v2437_v43  ;;  %v2448_v62 = vld [vmem:[%s11634_s5 + $0x978] sm:$0xff] }
 0x867   :  { %12362 = vst [vmem:[#allocation357_spill] sm:$0xff] %v10983_v0 }
 0x868   :  { %6088 = vmatpush1.bf16.msra.mxu1 %v10944_v23  ;;  %12361 = vst [vmem:[#allocation356_spill] sm:$0xff] %v10980_v50  ;;  %v2446_v23 = vld [vmem:[%s11634_s5 + $0x968] sm:$0xff] }
 0x869   :  { %6090 = vmatprep.subr.bf16.mxu1 %v10947_v56  ;;  %v2443_v56 = vld [vmem:[%s11634_s5 + $0x950] sm:$0xff]  ;;  %v11001_v43 = vpack.c.bf16 %v2448_v62, %v2446_v23  ;;  %v2449_v62 = vld [vmem:[%s11634_s5 + $0x980] sm:$0xff] }
 0x86a   :  { %v10998_v41 = vpack.c.bf16 %v2443_v56, %v2441_v63  ;;  %v2452_v56 = vld [vmem:[%s11634_s5 + $0x998] sm:$0xff] }
 0x86b   :  { %12364 = vst [vmem:[#allocation359_spill] sm:$0xff] %v11001_v43 }
 0x86c   :  { %6092 = vmatpush1.bf16.msra.mxu1 %v10962_v25  ;;  %12363 = vst [vmem:[#allocation358_spill] sm:$0xff] %v10998_v41  ;;  %v2450_v25 = vld [vmem:[%s11634_s5 + $0x988] sm:$0xff] }
 0x86d   :  { %6094 = vmatprep.subr.bf16.mxu1 %v10965_v16  ;;  %v2447_v16 = vld [vmem:[%s11634_s5 + $0x970] sm:$0xff]  ;;  %v11019_v63 = vpack.c.bf16 %v2452_v56, %v2450_v25  ;;  %v2453_v56 = vld [vmem:[%s11634_s5 + $0x9a0] sm:$0xff] }
 0x86e   :  { %v11016_v23 = vpack.c.bf16 %v2447_v16, %v2445_v19  ;;  %v2456_v16 = vld [vmem:[%s11634_s5 + $0x9b8] sm:$0xff] }
 0x86f   :  { %12366 = vst [vmem:[#allocation361_spill] sm:$0xff] %v11019_v63 }
 0x870   :  { %6096 = vmatpush1.bf16.msra.mxu1 %v10980_v50  ;;  %12365 = vst [vmem:[#allocation360_spill] sm:$0xff] %v11016_v23  ;;  %v2454_v50 = vld [vmem:[%s11634_s5 + $0x9a8] sm:$0xff] }
 0x871   :  { %6098 = vmatprep.subr.bf16.mxu1 %v10983_v0  ;;  %v2451_v0 = vld [vmem:[%s11634_s5 + $0x990] sm:$0xff]  ;;  %v11037_v19 = vpack.c.bf16 %v2456_v16, %v2454_v50  ;;  %v2457_v16 = vld [vmem:[%s11634_s5 + $0x9c0] sm:$0xff] }
 0x872   :  { %v11034_v25 = vpack.c.bf16 %v2451_v0, %v2449_v62  ;;  %v2460_v0 = vld [vmem:[%s11634_s5 + $0x9d8] sm:$0xff] }
 0x873   :  { %12368 = vst [vmem:[#allocation363_spill] sm:$0xff] %v11037_v19 }
 0x874   :  { %6100 = vmatpush1.bf16.msra.mxu1 %v10998_v41  ;;  %12367 = vst [vmem:[#allocation362_spill] sm:$0xff] %v11034_v25  ;;  %v2458_v41 = vld [vmem:[%s11634_s5 + $0x9c8] sm:$0xff] }
 0x875   :  { %6102 = vmatprep.subr.bf16.mxu1 %v11001_v43  ;;  %v2455_v43 = vld [vmem:[%s11634_s5 + $0x9b0] sm:$0xff]  ;;  %v11055_v62 = vpack.c.bf16 %v2460_v0, %v2458_v41  ;;  %v2461_v0 = vld [vmem:[%s11634_s5 + $0x9e0] sm:$0xff] }
 0x876   :  { %v11052_v50 = vpack.c.bf16 %v2455_v43, %v2453_v56  ;;  %v2464_v43 = vld [vmem:[%s11634_s5 + $0x9f8] sm:$0xff] }
 0x878   :  { %6104 = vmatpush1.bf16.msra.mxu1 %v11016_v23  ;;  %v2462_v23 = vld [vmem:[%s11634_s5 + $0x9e8] sm:$0xff] }
 0x879   :  { %6106 = vmatprep.subr.bf16.mxu1 %v11019_v63  ;;  %v2459_v63 = vld [vmem:[%s11634_s5 + $0x9d0] sm:$0xff]  ;;  %v11073_v56 = vpack.c.bf16 %v2464_v43, %v2462_v23  ;;  %v2143_v23 = vmul.f32 %v10490_v32, %v7349_v30 }
 0x87a   :  { %v11070_v41 = vpack.c.bf16 %v2459_v63, %v2457_v16  ;;  %v12370_v16 = vld [vmem:[#allocation24_spill] sm:$0xff]  ;;  %v12371_v43 = vld [vmem:[#allocation25_spill] sm:$0xff] }
 0x87c   :  { %6108 = vmatpush1.bf16.msra.mxu1 %v11034_v25 }
 0x87d   :  { %6110 = vmatprep.subr.bf16.mxu1 %v11037_v19  ;;  %v2463_v19 = vld [vmem:[%s11634_s5 + $0x9f0] sm:$0xff]  ;;  %s7059_s5 = smov [#allocation2]  }
 0x87e   :  { %v11082_v25 = vpack.c.bf16 %v2463_v19, %v2461_v0  ;;  %v12372_v0 = vld [vmem:[#allocation26_spill] sm:$0xff]  ;;  %s4752_s30 = sshll.u32 %s7059_s5, 4  ;;  %s4753_s30 = int_to_ptr.vmem [resolvable:$true] %s4752_s30 }
 0x87f   :  { %s7031_s13 = scalar_lea.vmem %s4753_s30, 256  ;;  %p7036_p1 = scmp.lt.s32.totalorder %s4753_s30, %s4753_s30 }
 0x880   :  { %6112 = vmatpush1.bf16.msra.mxu1 %v11052_v50  ;;  %p7032_p0 = scmp.ne.s32.totalorder %s4753_s30, %s7031_s13  ;;  %p7037_p2 = scmp.lt.s32.totalorder %s7031_s13, %s7031_s13 }
 0x881   :  { %6114 = vmatprep.subr.bf16.mxu1 %v11055_v62 }
 0x882   :  { %p7038_p3 = por %p7037_p2, %p7036_p1 }
 0x884   :  { %6116 = vmatpush1.bf16.msra.mxu1 %v11070_v41  ;;  %p7039_p4 = pnand %p7038_p3, %p7032_p0 }
 0x885   :  { %6118 = vmatprep.subr.bf16.mxu1 %v11073_v56 }
 0x888   :  { %6120 = vmatpush1.bf16.msra.mxu1 %v11082_v25 }
 0x889   :  { %6420 = vmatprep.subr.bf16.mxu1 %v8537_v37 }
 0x88b   :  { %2814 = vmatmul.mubr.f32.vlgmr.msra.gmra.mrb[20].mxu1 %v2143_v23  ;;  %v12380_v23 = vld [vmem:[#allocation35_spill] sm:$0xff] }
 0x88c   :  { %6422 = vmatpush3.bf16.msra.mxu1 %v8643_v58 }
 0x88d   :  { %6424 = vmatprep.subr.bf16.mxu1 %v8655_v22 }
 0x890   :  { %6426 = vmatpush3.bf16.msra.mxu1 %v8679_v51 }
 0x891   :  { %6428 = vmatprep.subr.bf16.mxu1 %v8691_v26 }
 0x894   :  { %6430 = vmatpush3.bf16.msra.mxu1 %v8715_v57 }
 0x895   :  { %6432 = vmatprep.subr.bf16.mxu1 %v8727_v3 }
 0x898   :  { %6434 = vmatpush3.bf16.msra.mxu1 %v8751_v40 }
 0x899   :  { %6436 = vmatprep.subr.bf16.mxu1 %v8763_v52 }
 0x89c   :  { %6438 = vmatpush3.bf16.msra.mxu1 %v8787_v39 }
 0x89d   :  { %6440 = vmatprep.subr.bf16.mxu1 %v8799_v13 }
 0x8a0   :  { %6442 = vmatpush3.bf16.msra.mxu1 %v8823_v54 }
 0x8a1   :  { %6444 = vmatprep.subr.bf16.mxu1 %v8835_v1 }
 0x8a4   :  { %6446 = vmatpush3.bf16.msra.mxu1 %v8859_v28 }
 0x8a5   :  { %6448 = vmatprep.subr.bf16.mxu1 %v8868_v4 }
 0x8a8   :  { %6450 = vmatpush3.bf16.msra.mxu1 %v8889_v36 }
 0x8a9   :  { %6484 = vmatprep.subr.bf16.mxu1 %v8895_v7 }
 0x90a   :  { %v2602_v22 = vpop.f32.mrb[22].mxu0 }
 0x90b   :  { %v2604_v58 = vpop.f32.mrb[23].mxu0 }
 0x95e   :  { %v2815_v37 = vpop.f32.mrb[20].mxu1 }
 0x95f   :  { %v6990_v52 = vadd.f32 %v2815_v37, %v2602_v22  ;;  %v2817_v51 = vpop.f32.mrb[21].mxu1  ;;  %v12381_v22 = vld [vmem:[#allocation5_spill] sm:$0xff] }
 0x960   :  { %v6991_v26 = vadd.f32 %v2817_v51, %v2604_v58 }
 0x961   :  { %v2820_v13 = vmul.f32 %v6990_v52, %v10197_v53 }
 0x962   :  { %v2821_v57 = vmul.f32 %v6991_v26, %v10199_v45  ;;  %v12382_v26 = vld [vmem:[#allocation6_spill] sm:$0xff] }
 0x963   :  { %v2822_v1 = vmul.f32 %v2820_v13, %v2820_v13 }
 0x964   :  { %v2823_v3 = vmul.f32 %v2821_v57, %v2821_v57 }
 0x966   :  { %4778 = vmatprep.mubr.msk.f32.mxu0 %vm257_vm2, %v2823_v3  ;;  %v12383_v3 = vld [vmem:[#allocation7_spill] sm:$0xff] }
 0x967   :  { %2892 = vmatmul.mubr.f32.vlgmr.msra.gmra.mrb[24].mxu0 %v2822_v1  ;;  %v12384_v1 = vld [vmem:[#allocation8_spill] sm:$0xff] }
 0x968   :  { %6154 = vmatpush1.bf16.msra.mxu0 %v7385_v44  ;;  %2976 = vmatprep.mubr.f32.mxu0 %v12150_v35 }
 0x969   :  { %6156 = vmatprep.subr.bf16.mxu0 %v7398_v48  ;;  %v12369_v48 = vld [vmem:[#allocation23_spill] sm:$0xff] }
 0xa3a   :  { %v2893_v40 = vpop.f32.mrb[24].mxu0 }
 0xa3b   :  { %7019 = vrsqrt.f32 %v2893_v40  ;;  %v2895_v39 = vpop.f32.mrb[25].mxu0  ;;  %vm2899_vm11 = vcmp.eq.f32.partialorder %v2893_v40, inf  ;;  %v2902_v28 = vand.u32 2147483648, %v2893_v40  ;;  %vm2901_vm12 = vcmp.eq.f32.partialorder %v2893_v40, 0.0 }
 0xa3c   :  { %v2905_v53 = vadd.f32 1.0, %v2893_v40  ;;  %v12388_v39 = vld [vmem:[#allocation12_spill] sm:$0xff] }
 0xa45   :  { %v7020_v4 = vpop.eup %7019 }
 0xa46   :  { %v2898_v54 = vmul.f32 %v7020_v4, %v2893_v40  ;;  %v12389_v4 = vld [vmem:[#allocation13_spill] sm:$0xff] }
 0xa48   :  { %v2900_v36 = vsel %vm2899_vm11, %v2893_v40, %v2898_v54  ;;  %v12385_v40 = vld [vmem:[#allocation9_spill] sm:$0xff]  ;;  %v12390_v54 = vld [vmem:[#allocation14_spill] sm:$0xff] }
 0xa49   :  { %v2903_v7 = vsel %vm2901_vm12, %v2902_v28, %v2900_v36  ;;  %v12391_v28 = vld [vmem:[#allocation15_spill] sm:$0xff]  ;;  %v12392_v36 = vld [vmem:[#allocation16_spill] sm:$0xff] }
 0xa4a   :  { %v2904_v45 = vadd.f32 1.0, %v2903_v7 }
 0xa4c   :  { %v2906_v32 = vmul.f32 %v2905_v53, %v2904_v45  ;;  %v12394_v53 = vld [vmem:[#allocation18_spill] sm:$0xff]  ;;  %v12395_v45 = vld [vmem:[#allocation19_spill] sm:$0xff] }
 0xa4e   :  { %7021 = vrcp.f32 %v2906_v32  ;;  %v12396_v32 = vld [vmem:[#allocation20_spill] sm:$0xff] }
 0xa58   :  { %v7022_v63 = vpop.eup %7021 }
 0xa59   :  { %v2908_v19 = vmul.f32 %v7022_v63, %v2903_v7  ;;  %v12393_v7 = vld [vmem:[#allocation17_spill] sm:$0xff] }
 0xa5a   :  { %v12397_v63 = vld [vmem:[#allocation21_spill] sm:$0xff] }
 0xa5b   :  { %4779 = vmatmul.mubr.msk.f32.vlgmr.msra.gmra.mrb[26].mxu0 %vm347_vm5, %v2908_v19  ;;  %v12398_v19 = vld [vmem:[#allocation22_spill] sm:$0xff] }
 0xa5c   :  { %6158 = vmatpush1.bf16.msra.mxu0 %v7572_v29  ;;  %v12373_v29 = vld [vmem:[#allocation27_spill] sm:$0xff] }
 0xa5d   :  { %6160 = vmatprep.subr.bf16.mxu0 %v7574_v33  ;;  %v12374_v33 = vld [vmem:[#allocation28_spill] sm:$0xff] }
 0xa60   :  { %6162 = vmatpush1.bf16.msra.mxu0 %v7590_v46  ;;  %v12375_v46 = vld [vmem:[#allocation29_spill] sm:$0xff] }
 0xa61   :  { %6164 = vmatprep.subr.bf16.mxu0 %v7593_v47  ;;  %v12376_v47 = vld [vmem:[#allocation30_spill] sm:$0xff] }
 0xa64   :  { %6166 = vmatpush1.bf16.msra.mxu0 %v7608_v60  ;;  %v12377_v60 = vld [vmem:[#allocation31_spill] sm:$0xff] }
 0xa65   :  { %6168 = vmatprep.subr.bf16.mxu0 %v7611_v61  ;;  %v12378_v61 = vld [vmem:[#allocation32_spill] sm:$0xff] }
 0xa68   :  { %6170 = vmatpush1.bf16.msra.mxu0 %v7626_v10  ;;  %v12379_v10 = vld [vmem:[#allocation33_spill] sm:$0xff] }
 0xa69   :  { %6172 = vmatprep.subr.bf16.mxu0 %v12369_v48  ;;  %v12399_v48 = vld [vmem:[#allocation34_spill] sm:$0xff] }
 0xa6c   :  { %6174 = vmatpush1.bf16.msra.mxu0 %v12370_v16  ;;  %v12400_v16 = vld [vmem:[#allocation36_spill] sm:$0xff] }
 0xa6d   :  { %6176 = vmatprep.subr.bf16.mxu0 %v12371_v43  ;;  %v12401_v43 = vld [vmem:[#allocation37_spill] sm:$0xff] }
 0xa70   :  { %6178 = vmatpush1.bf16.msra.mxu0 %v12372_v0  ;;  %v12402_v0 = vld [vmem:[#allocation39_spill] sm:$0xff] }
 0xa71   :  { %6180 = vmatprep.subr.bf16.mxu0 %v12373_v29  ;;  %v12403_v29 = vld [vmem:[#allocation41_spill] sm:$0xff] }
 0xa74   :  { %6182 = vmatpush1.bf16.msra.mxu0 %v12374_v33  ;;  %v12404_v33 = vld [vmem:[#allocation43_spill] sm:$0xff] }
 0xa75   :  { %6184 = vmatprep.subr.bf16.mxu0 %v12375_v46  ;;  %v12405_v46 = vld [vmem:[#allocation45_spill] sm:$0xff] }
 0xa78   :  { %6186 = vmatpush1.bf16.msra.mxu0 %v12376_v47  ;;  %v12406_v47 = vld [vmem:[#allocation47_spill] sm:$0xff] }
 0xa79   :  { %6188 = vmatprep.subr.bf16.mxu0 %v12377_v60  ;;  %v12407_v60 = vld [vmem:[#allocation49_spill] sm:$0xff] }
 0xa7c   :  { %6190 = vmatpush1.bf16.msra.mxu0 %v12378_v61  ;;  %v12408_v61 = vld [vmem:[#allocation51_spill] sm:$0xff] }
 0xa7d   :  { %6192 = vmatprep.subr.bf16.mxu0 %v12379_v10  ;;  %v12409_v10 = vld [vmem:[#allocation53_spill] sm:$0xff] }
 0xa80   :  { %6194 = vmatpush1.bf16.msra.mxu0 %v12380_v23  ;;  %v12410_v23 = vld [vmem:[#allocation55_spill] sm:$0xff] }
 0xa81   :  { %6196 = vmatprep.subr.bf16.mxu0 %v12381_v22  ;;  %v12411_v22 = vld [vmem:[#allocation57_spill] sm:$0xff] }
 0xb2e   :  { %v2978_v58 = vpop.f32.mrb[26].mxu0 }
 0xb2f   :  { %v2980_v37 = vpop.f32.mrb[27].mxu0  ;;  %v11134_v51 = vmul.f32 %v2978_v58, %v2820_v13  ;;  %v12387_v13 = vld [vmem:[#allocation11_spill] sm:$0xff] }
 0xb30   :  { %v11132_v52 = vmul.f32 %v2980_v37, %v2821_v57  ;;  %v12386_v57 = vld [vmem:[#allocation10_spill] sm:$0xff]  ;;  %v12412_v58 = vld [vmem:[#allocation59_spill] sm:$0xff]  ;;  %v12413_v37 = vld [vmem:[#allocation61_spill] sm:$0xff] }
 0xb32   :  { %4780 = vmatprep.mubr.msk.f32.mxu0 %vm257_vm2, %v11132_v52 }
 0xb33   :  { %3053 = vmatmul.mubr.f32.vlgmr.msra.gmra.mrb[28].mxu0 %v11134_v51 }
 0xb34   :  { %6198 = vmatpush1.bf16.msra.mxu0 %v12382_v26  ;;  %4781 = vmatprep.mubr.msk.f32.mxu0 %vm257_vm2, %v11132_v52  ;;  %v12414_v26 = vld [vmem:[#allocation63_spill] sm:$0xff] }
 0xb35   :  { %6200 = vmatprep.subr.bf16.mxu0 %v12383_v3  ;;  %v12415_v3 = vld [vmem:[#allocation65_spill] sm:$0xff] }
 0xb38   :  { %6202 = vmatpush1.bf16.msra.mxu0 %v12384_v1  ;;  %v12416_v1 = vld [vmem:[#allocation67_spill] sm:$0xff] }
 0xb39   :  { %6204 = vmatprep.subr.bf16.mxu0 %v12385_v40  ;;  %v12417_v40 = vld [vmem:[#allocation69_spill] sm:$0xff] }
 0xb3c   :  { %6206 = vmatpush1.bf16.msra.mxu0 %v12386_v57  ;;  %v12418_v57 = vld [vmem:[#allocation71_spill] sm:$0xff] }
 0xb3d   :  { %6208 = vmatprep.subr.bf16.mxu0 %v12387_v13  ;;  %v12419_v13 = vld [vmem:[#allocation73_spill] sm:$0xff] }
 0xb40   :  { %6210 = vmatpush1.bf16.msra.mxu0 %v12388_v39  ;;  %v12420_v39 = vld [vmem:[#allocation75_spill] sm:$0xff] }
 0xb41   :  { %6212 = vmatprep.subr.bf16.mxu0 %v12389_v4  ;;  %v12421_v4 = vld [vmem:[#allocation38_spill] sm:$0xff] }
 0xb44   :  { %6214 = vmatpush1.bf16.msra.mxu0 %v12390_v54  ;;  %v12422_v54 = vld [vmem:[#allocation40_spill] sm:$0xff] }
 0xb45   :  { %6216 = vmatprep.subr.bf16.mxu0 %v12391_v28  ;;  %v12423_v28 = vld [vmem:[#allocation42_spill] sm:$0xff] }
 0xb48   :  { %6218 = vmatpush1.bf16.msra.mxu0 %v12392_v36  ;;  %v12424_v36 = vld [vmem:[#allocation44_spill] sm:$0xff] }
 0xb49   :  { %6220 = vmatprep.subr.bf16.mxu0 %v12393_v7  ;;  %v12425_v7 = vld [vmem:[#allocation46_spill] sm:$0xff] }
 0xb4c   :  { %6222 = vmatpush1.bf16.msra.mxu0 %v12394_v53  ;;  %v12426_v53 = vld [vmem:[#allocation48_spill] sm:$0xff] }
 0xb4d   :  { %6224 = vmatprep.subr.bf16.mxu0 %v12395_v45  ;;  %v12427_v45 = vld [vmem:[#allocation50_spill] sm:$0xff] }
 0xb50   :  { %6226 = vmatpush1.bf16.msra.mxu0 %v12396_v32  ;;  %v12428_v32 = vld [vmem:[#allocation52_spill] sm:$0xff] }
 0xb51   :  { %6228 = vmatprep.subr.bf16.mxu0 %v12397_v63  ;;  %v12429_v63 = vld [vmem:[#allocation54_spill] sm:$0xff] }
 0xb54   :  { %6230 = vmatpush1.bf16.msra.mxu0 %v12398_v19  ;;  %v12430_v19 = vld [vmem:[#allocation56_spill] sm:$0xff] }
 0xb55   :  { %6232 = vmatprep.subr.bf16.mxu0 %v12399_v48  ;;  %v12431_v48 = vld [vmem:[#allocation58_spill] sm:$0xff] }
 0xb58   :  { %6234 = vmatpush1.bf16.msra.mxu0 %v12400_v16  ;;  %v12432_v16 = vld [vmem:[#allocation60_spill] sm:$0xff] }
 0xb59   :  { %6236 = vmatprep.subr.bf16.mxu0 %v12401_v43  ;;  %v12433_v43 = vld [vmem:[#allocation62_spill] sm:$0xff] }
 0xb5b   :  { %3124 = vmatmul.mubr.f32.vlgmr.msra.gmra.mrb[30].mxu0 %v11134_v51 }
 0xb5c   :  { %6238 = vmatpush1.bf16.msra.mxu0 %v12402_v0  ;;  %4782 = vmatprep.mubr.msk.f32.mxu0 %vm257_vm2, %v11132_v52  ;;  %v12434_v0 = vld [vmem:[#allocation64_spill] sm:$0xff] }
 0xb5d   :  { %6240 = vmatprep.subr.bf16.mxu0 %v12403_v29  ;;  %v12435_v29 = vld [vmem:[#allocation66_spill] sm:$0xff] }
 0xb60   :  { %6242 = vmatpush1.bf16.msra.mxu0 %v12404_v33  ;;  %v12436_v33 = vld [vmem:[#allocation68_spill] sm:$0xff] }
 0xb61   :  { %6244 = vmatprep.subr.bf16.mxu0 %v12405_v46  ;;  %v12437_v46 = vld [vmem:[#allocation70_spill] sm:$0xff] }
 0xb64   :  { %6246 = vmatpush1.bf16.msra.mxu0 %v12406_v47  ;;  %v12438_v47 = vld [vmem:[#allocation72_spill] sm:$0xff] }
 0xb65   :  { %6248 = vmatprep.subr.bf16.mxu0 %v12407_v60  ;;  %v12439_v60 = vld [vmem:[#allocation74_spill] sm:$0xff] }
 0xb68   :  { %6250 = vmatpush1.bf16.msra.mxu0 %v12408_v61  ;;  %v12440_v61 = vld [vmem:[#allocation76_spill] sm:$0xff] }
 0xb69   :  { %6252 = vmatprep.subr.bf16.mxu0 %v12409_v10  ;;  %v12441_v10 = vld [vmem:[#allocation77_spill] sm:$0xff] }
 0xb6c   :  { %6254 = vmatpush1.bf16.msra.mxu0 %v12410_v23  ;;  %v12442_v23 = vld [vmem:[#allocation79_spill] sm:$0xff] }
 0xb6d   :  { %6256 = vmatprep.subr.bf16.mxu0 %v12411_v22  ;;  %v12443_v22 = vld [vmem:[#allocation80_spill] sm:$0xff] }
 0xb70   :  { %6258 = vmatpush1.bf16.msra.mxu0 %v12412_v58  ;;  %v12444_v58 = vld [vmem:[#allocation83_spill] sm:$0xff] }
 0xb71   :  { %6260 = vmatprep.subr.bf16.mxu0 %v12413_v37  ;;  %v12445_v37 = vld [vmem:[#allocation84_spill] sm:$0xff] }
 0xb74   :  { %6262 = vmatpush1.bf16.msra.mxu0 %v12414_v26  ;;  %v12446_v26 = vld [vmem:[#allocation87_spill] sm:$0xff] }
 0xb75   :  { %6264 = vmatprep.subr.bf16.mxu0 %v12415_v3  ;;  %v12447_v3 = vld [vmem:[#allocation88_spill] sm:$0xff] }
 0xb78   :  { %6266 = vmatpush1.bf16.msra.mxu0 %v12416_v1  ;;  %v12448_v1 = vld [vmem:[#allocation91_spill] sm:$0xff] }
 0xb79   :  { %6268 = vmatprep.subr.bf16.mxu0 %v12417_v40  ;;  %v12449_v40 = vld [vmem:[#allocation92_spill] sm:$0xff] }
 0xb7c   :  { %6270 = vmatpush1.bf16.msra.mxu0 %v12418_v57  ;;  %v12450_v57 = vld [vmem:[#allocation95_spill] sm:$0xff] }
 0xb7d   :  { %6272 = vmatprep.subr.bf16.mxu0 %v12419_v13  ;;  %v12451_v13 = vld [vmem:[#allocation96_spill] sm:$0xff] }
 0xb80   :  { %6274 = vmatpush1.bf16.msra.mxu0 %v12420_v39  ;;  %v12452_v39 = vld [vmem:[#allocation99_spill] sm:$0xff] }
 0xb81   :  { %6276 = vmatprep.subr.bf16.mxu0 %v12421_v4  ;;  %v12454_v4 = vld [vmem:[#allocation103_spill] sm:$0xff] }
 0xb83   :  { %3195 = vmatmul.mubr.f32.vlgmr.msra.gmra.mrb[32].mxu0 %v11134_v51 }
 0xb84   :  { %6278 = vmatpush1.bf16.msra.mxu0 %v12422_v54  ;;  %4783 = vmatprep.mubr.msk.f32.mxu0 %vm257_vm2, %v11132_v52  ;;  %v12455_v54 = vld [vmem:[#allocation104_spill] sm:$0xff] }
 0xb85   :  { %6280 = vmatprep.subr.bf16.mxu0 %v12423_v28  ;;  %v12456_v28 = vld [vmem:[#allocation106_spill] sm:$0xff] }
 0xb88   :  { %6282 = vmatpush1.bf16.msra.mxu0 %v12424_v36  ;;  %v12457_v36 = vld [vmem:[#allocation107_spill] sm:$0xff] }
 0xb89   :  { %6284 = vmatprep.subr.bf16.mxu0 %v12425_v7  ;;  %v12458_v7 = vld [vmem:[#allocation108_spill] sm:$0xff] }
 0xb8c   :  { %6286 = vmatpush1.bf16.msra.mxu0 %v12426_v53  ;;  %v12459_v53 = vld [vmem:[#allocation109_spill] sm:$0xff] }
 0xb8d   :  { %6288 = vmatprep.subr.bf16.mxu0 %v12427_v45  ;;  %v12460_v45 = vld [vmem:[#allocation110_spill] sm:$0xff] }
 0xb90   :  { %6290 = vmatpush1.bf16.msra.mxu0 %v12428_v32  ;;  %v12461_v32 = vld [vmem:[#allocation78_spill] sm:$0xff] }
 0xb91   :  { %6292 = vmatprep.subr.bf16.mxu0 %v12429_v63  ;;  %v12462_v63 = vld [vmem:[#allocation81_spill] sm:$0xff] }
 0xb94   :  { %6294 = vmatpush1.bf16.msra.mxu0 %v12430_v19  ;;  %v12463_v19 = vld [vmem:[#allocation82_spill] sm:$0xff] }
 0xb95   :  { %6296 = vmatprep.subr.bf16.mxu0 %v12431_v48  ;;  %v12464_v48 = vld [vmem:[#allocation85_spill] sm:$0xff] }
 0xb98   :  { %6298 = vmatpush1.bf16.msra.mxu0 %v12432_v16  ;;  %v12465_v16 = vld [vmem:[#allocation86_spill] sm:$0xff] }
 0xb99   :  { %6300 = vmatprep.subr.bf16.mxu0 %v12433_v43  ;;  %v12466_v43 = vld [vmem:[#allocation89_spill] sm:$0xff] }
 0xb9c   :  { %6302 = vmatpush1.bf16.msra.mxu0 %v12434_v0  ;;  %v12467_v0 = vld [vmem:[#allocation90_spill] sm:$0xff] }
 0xb9d   :  { %6304 = vmatprep.subr.bf16.mxu0 %v12435_v29  ;;  %v12468_v29 = vld [vmem:[#allocation93_spill] sm:$0xff] }
 0xba0   :  { %6306 = vmatpush1.bf16.msra.mxu0 %v12436_v33  ;;  %v12469_v33 = vld [vmem:[#allocation94_spill] sm:$0xff] }
 0xba1   :  { %6308 = vmatprep.subr.bf16.mxu0 %v12437_v46  ;;  %v12470_v46 = vld [vmem:[#allocation97_spill] sm:$0xff] }
 0xba4   :  { %6310 = vmatpush1.bf16.msra.mxu0 %v12438_v47  ;;  %v12471_v47 = vld [vmem:[#allocation98_spill] sm:$0xff] }
 0xba5   :  { %6312 = vmatprep.subr.bf16.mxu0 %v12439_v60  ;;  %v12473_v60 = vld [vmem:[#allocation102_spill] sm:$0xff] }
 0xba8   :  { %6314 = vmatpush1.bf16.msra.mxu0 %v12440_v61  ;;  %v12474_v61 = vld [vmem:[#allocation105_spill] sm:$0xff] }
 0xba9   :  { %6316 = vmatprep.subr.bf16.mxu0 %v12441_v10  ;;  %v12475_v10 = vld [vmem:[#allocation116_spill] sm:$0xff] }
 0xbab   :  { %3266 = vmatmul.mubr.f32.vlgmr.msra.gmra.mrb[34].mxu0 %v11134_v51 }
 0xbac   :  { %6318 = vmatpush1.bf16.msra.mxu0 %v12442_v23  ;;  %4784 = vmatprep.mubr.msk.f32.mxu0 %vm257_vm2, %v11132_v52  ;;  %v12453_v52 = vld [vmem:[#allocation100_spill] sm:$0xff]  ;;  %v12476_v23 = vld [vmem:[#allocation117_spill] sm:$0xff] }
 0xbad   :  { %6320 = vmatprep.subr.bf16.mxu0 %v12443_v22  ;;  %v12477_v22 = vld [vmem:[#allocation111_spill] sm:$0xff] }
 0xbb0   :  { %6322 = vmatpush1.bf16.msra.mxu0 %v12444_v58 }
 0xbb1   :  { %6324 = vmatprep.subr.bf16.mxu0 %v12445_v37 }
 0xbb4   :  { %6326 = vmatpush1.bf16.msra.mxu0 %v12446_v26 }
 0xbb5   :  { %6328 = vmatprep.subr.bf16.mxu0 %v12447_v3 }
 0xbb8   :  { %6330 = vmatpush1.bf16.msra.mxu0 %v12448_v1  ;;  %v12478_v1 = vld [vmem:[#allocation112_spill] sm:$0xff] }
 0xbb9   :  { %6332 = vmatprep.subr.bf16.mxu0 %v12449_v40  ;;  %v12479_v40 = vld [vmem:[#allocation113_spill] sm:$0xff] }
 0xbbc   :  { %6334 = vmatpush1.bf16.msra.mxu0 %v12450_v57  ;;  %v12480_v57 = vld [vmem:[#allocation114_spill] sm:$0xff] }
 0xbbd   :  { %6336 = vmatprep.subr.bf16.mxu0 %v12451_v13  ;;  %v12481_v13 = vld [vmem:[#allocation115_spill] sm:$0xff] }
 0xbc0   :  { %6338 = vmatpush1.bf16.msra.mxu0 %v12452_v39  ;;  %v12482_v39 = vld [vmem:[#allocation118_spill] sm:$0xff] }
 0xbc1   :  { %6340 = vmatprep.subr.bf16.mxu0 %v12453_v52  ;;  %v12483_v52 = vld [vmem:[#allocation119_spill] sm:$0xff] }
 0xbc4   :  { %6342 = vmatpush1.bf16.msra.mxu0 %v12454_v4  ;;  %v12484_v4 = vld [vmem:[#allocation120_spill] sm:$0xff] }
 0xbc5   :  { %6344 = vmatprep.subr.bf16.mxu0 %v12455_v54  ;;  %v12485_v54 = vld [vmem:[#allocation121_spill] sm:$0xff] }
 0xbc8   :  { %6346 = vmatpush1.bf16.msra.mxu0 %v12456_v28  ;;  %v12486_v28 = vld [vmem:[#allocation122_spill] sm:$0xff] }
 0xbc9   :  { %6348 = vmatprep.subr.bf16.mxu0 %v12457_v36  ;;  %v12487_v36 = vld [vmem:[#allocation123_spill] sm:$0xff] }
 0xbcc   :  { %6350 = vmatpush1.bf16.msra.mxu0 %v12458_v7  ;;  %v12488_v7 = vld [vmem:[#allocation124_spill] sm:$0xff] }
 0xbcd   :  { %6352 = vmatprep.subr.bf16.mxu0 %v12459_v53  ;;  %v12489_v53 = vld [vmem:[#allocation125_spill] sm:$0xff] }
 0xbd0   :  { %6354 = vmatpush1.bf16.msra.mxu0 %v12460_v45  ;;  %v12490_v45 = vld [vmem:[#allocation126_spill] sm:$0xff] }
 0xbd1   :  { %6356 = vmatprep.subr.bf16.mxu0 %v12461_v32  ;;  %v12491_v32 = vld [vmem:[#allocation127_spill] sm:$0xff] }
 0xbd3   :  { %3337 = vmatmul.mubr.f32.vlgmr.msra.gmra.mrb[36].mxu0 %v11134_v51  ;;  %v12472_v51 = vld [vmem:[#allocation101_spill] sm:$0xff] }
 0xbd4   :  { %6358 = vmatpush3.bf16.msra.mxu0 %v12462_v63  ;;  %v12492_v63 = vld [vmem:[#allocation128_spill] sm:$0xff] }
 0xbd5   :  { %6360 = vmatprep.subr.bf16.mxu0 %v12463_v19  ;;  %v12493_v19 = vld [vmem:[#allocation129_spill] sm:$0xff] }
 0xbd8   :  { %6362 = vmatpush3.bf16.msra.mxu0 %v12464_v48 }
 0xbd9   :  { %6364 = vmatprep.subr.bf16.mxu0 %v12465_v16 }
 0xbdc   :  { %6366 = vmatpush3.bf16.msra.mxu0 %v12466_v43 }
 0xbdd   :  { %6368 = vmatprep.subr.bf16.mxu0 %v12467_v0 }
 0xbe0   :  { %6370 = vmatpush3.bf16.msra.mxu0 %v12468_v29  ;;  %v12494_v29 = vld [vmem:[#allocation130_spill] sm:$0xff] }
 0xbe1   :  { %6372 = vmatprep.subr.bf16.mxu0 %v12469_v33  ;;  %v12495_v33 = vld [vmem:[#allocation131_spill] sm:$0xff] }
 0xbe4   :  { %6374 = vmatpush3.bf16.msra.mxu0 %v12470_v46  ;;  %v12496_v46 = vld [vmem:[#allocation132_spill] sm:$0xff] }
 0xbe5   :  { %6376 = vmatprep.subr.bf16.mxu0 %v12471_v47  ;;  %v12497_v47 = vld [vmem:[#allocation133_spill] sm:$0xff] }
 0xbe8   :  { %6378 = vmatpush3.bf16.msra.mxu0 %v12472_v51  ;;  %v12498_v51 = vld [vmem:[#allocation134_spill] sm:$0xff] }
 0xbe9   :  { %6380 = vmatprep.subr.bf16.mxu0 %v12473_v60  ;;  %v12499_v60 = vld [vmem:[#allocation135_spill] sm:$0xff] }
 0xbec   :  { %6382 = vmatpush3.bf16.msra.mxu0 %v12474_v61  ;;  %v12500_v61 = vld [vmem:[#allocation136_spill] sm:$0xff] }
 0xbed   :  { %6384 = vmatprep.subr.bf16.mxu0 %v12475_v10  ;;  %v12501_v10 = vld [vmem:[#allocation137_spill] sm:$0xff] }
 0xbf0   :  { %6386 = vmatpush3.bf16.msra.mxu0 %v12476_v23  ;;  %v12502_v23 = vld [vmem:[#allocation138_spill] sm:$0xff] }
 0xbf1   :  { %6388 = vmatprep.subr.bf16.mxu0 %v12477_v22  ;;  %v12503_v22 = vld [vmem:[#allocation139_spill] sm:$0xff] }
 0xc06   :  { %v3054_v58 = vpop.f32.mrb[28].mxu0 }
 0xc07   :  { %v3056_v37 = vpop.f32.mrb[29].mxu0  ;;  %v3343_v3 = vmul.f32 %v3054_v58, %v7349_v30  ;;  %v12504_v58 = vld [vmem:[#allocation140_spill] sm:$0xff] }
 0xc08   :  { %v3344_v26 = vmul.f32 %v3056_v37, %v7349_v30  ;;  %v12505_v37 = vld [vmem:[#allocation141_spill] sm:$0xff] }
 0xc0a   :  { %3417 = vmatprep.mubr.f32.mxu0 %v3344_v26  ;;  %v12506_v26 = vld [vmem:[#allocation142_spill] sm:$0xff] }
 0xc0b   :  { %3418 = vmatmul.mubr.f32.vlgmr.msra.gmra.mrb[38].mxu0 %v3343_v3  ;;  %v12507_v3 = vld [vmem:[#allocation143_spill] sm:$0xff] }
 0xc0c   :  { %6390 = vmatpush3.bf16.msra.mxu0 %v12478_v1  ;;  %v12508_v1 = vld [vmem:[#allocation144_spill] sm:$0xff] }
 0xc0d   :  { %6392 = vmatprep.subr.bf16.mxu0 %v12479_v40 }
 0xc10   :  { %6394 = vmatpush3.bf16.msra.mxu0 %v12480_v57 }
 0xc11   :  { %6396 = vmatprep.subr.bf16.mxu0 %v12481_v13 }
 0xc14   :  { %6398 = vmatpush3.bf16.msra.mxu0 %v12482_v39 }
 0xc15   :  { %6400 = vmatprep.subr.bf16.mxu0 %v12483_v52  ;;  %v12509_v52 = vld [vmem:[#allocation145_spill] sm:$0xff] }
 0xc18   :  { %6402 = vmatpush3.bf16.msra.mxu0 %v12484_v4  ;;  %v12510_v4 = vld [vmem:[#allocation146_spill] sm:$0xff] }
 0xc19   :  { %6404 = vmatprep.subr.bf16.mxu0 %v12485_v54  ;;  %v12511_v54 = vld [vmem:[#allocation147_spill] sm:$0xff] }
 0xc1c   :  { %6406 = vmatpush3.bf16.msra.mxu0 %v12486_v28  ;;  %v12512_v28 = vld [vmem:[#allocation148_spill] sm:$0xff] }
 0xc1d   :  { %6408 = vmatprep.subr.bf16.mxu0 %v12487_v36  ;;  %v12513_v36 = vld [vmem:[#allocation149_spill] sm:$0xff] }
 0xc20   :  { %6410 = vmatpush3.bf16.msra.mxu0 %v12488_v7  ;;  %v12514_v7 = vld [vmem:[#allocation150_spill] sm:$0xff] }
 0xc21   :  { %6412 = vmatprep.subr.bf16.mxu0 %v12489_v53  ;;  %v12515_v53 = vld [vmem:[#allocation151_spill] sm:$0xff] }
 0xc24   :  { %6414 = vmatpush3.bf16.msra.mxu0 %v12490_v45  ;;  %v12516_v45 = vld [vmem:[#allocation152_spill] sm:$0xff] }
 0xc25   :  { %6416 = vmatprep.subr.bf16.mxu0 %v12491_v32  ;;  %v12517_v32 = vld [vmem:[#allocation153_spill] sm:$0xff] }
 0xc28   :  { %6418 = vmatpush3.bf16.msra.mxu0 %v12492_v63  ;;  %v12518_v63 = vld [vmem:[#allocation154_spill] sm:$0xff] }
 0xc29   :  { %6452 = vmatprep.subr.bf16.mxu0 %v12493_v19  ;;  %v12519_v19 = vld [vmem:[#allocation155_spill] sm:$0xff] }
 0xc2e   :  { %v3125_v48 = vpop.f32.mrb[30].mxu0 }
 0xc2f   :  { %v3127_v16 = vpop.f32.mrb[31].mxu0  ;;  %v3345_v0 = vmul.f32 %v3125_v48, %v7349_v30  ;;  %v12520_v48 = vld [vmem:[#allocation156_spill] sm:$0xff] }
 0xc30   :  { %v3346_v43 = vmul.f32 %v3127_v16, %v7349_v30  ;;  %v12521_v16 = vld [vmem:[#allocation157_spill] sm:$0xff] }
 0xc32   :  { %3487 = vmatprep.mubr.f32.mxu0 %v3346_v43  ;;  %v12522_v43 = vld [vmem:[#allocation158_spill] sm:$0xff] }
 0xc33   :  { %3488 = vmatmul.mubr.f32.vlgmr.msra.gmra.mrb[40].mxu0 %v3345_v0  ;;  %v12523_v0 = vld [vmem:[#allocation159_spill] sm:$0xff] }
 0xc34   :  { %6454 = vmatpush3.bf16.msra.mxu0 %v12494_v29  ;;  %v12524_v29 = vld [vmem:[#allocation166_spill] sm:$0xff] }
 0xc35   :  { %6456 = vmatprep.subr.bf16.mxu0 %v12495_v33 }
 0xc38   :  { %6458 = vmatpush3.bf16.msra.mxu0 %v12496_v46 }
 0xc39   :  { %6460 = vmatprep.subr.bf16.mxu0 %v12497_v47 }
 0xc3c   :  { %6462 = vmatpush3.bf16.msra.mxu0 %v12498_v51 }
 0xc3d   :  { %6464 = vmatprep.subr.bf16.mxu0 %v12499_v60  ;;  %v12525_v60 = vld [vmem:[#allocation160_spill] sm:$0xff] }
 0xc40   :  { %6466 = vmatpush3.bf16.msra.mxu0 %v12500_v61  ;;  %v12526_v61 = vld [vmem:[#allocation161_spill] sm:$0xff] }
 0xc41   :  { %6468 = vmatprep.subr.bf16.mxu0 %v12501_v10  ;;  %v12527_v10 = vld [vmem:[#allocation163_spill] sm:$0xff] }
 0xc44   :  { %6470 = vmatpush3.bf16.msra.mxu0 %v12502_v23  ;;  %v12528_v23 = vld [vmem:[#allocation164_spill] sm:$0xff] }
 0xc45   :  { %6472 = vmatprep.subr.bf16.mxu0 %v12503_v22  ;;  %v12529_v22 = vld [vmem:[#allocation165_spill] sm:$0xff] }
 0xc48   :  { %6474 = vmatpush3.bf16.msra.mxu0 %v12504_v58  ;;  %v12530_v58 = vld [vmem:[#allocation186_spill] sm:$0xff] }
 0xc49   :  { %6476 = vmatprep.subr.bf16.mxu0 %v12505_v37  ;;  %v12554_v37 = vld [vmem:[#allocation230_spill] sm:$0xff] }
 0xc4c   :  { %6478 = vmatpush3.bf16.msra.mxu0 %v12506_v26 }
 0xc4d   :  { %6480 = vmatprep.subr.bf16.mxu0 %v12507_v3 }
 0xc50   :  { %6482 = vmatpush3.bf16.msra.mxu0 %v12508_v1 }
 0xc51   :  { %6515 = vmatprep.subr.bf16.mxu0 %v12146_v14 }
 0xc56   :  { %v3196_v40 = vpop.f32.mrb[32].mxu0 }
 0xc57   :  { %v3198_v57 = vpop.f32.mrb[33].mxu0  ;;  %v3347_v39 = vmul.f32 %v3196_v40, %v7349_v30 }
 0xc58   :  { %v3348_v13 = vmul.f32 %v3198_v57, %v7349_v30  ;;  %v12532_v57 = vld [vmem:[#allocation167_spill] sm:$0xff] }
 0xc5a   :  { %3557 = vmatprep.mubr.f32.mxu1 %v3348_v13  ;;  %v12533_v13 = vld [vmem:[#allocation168_spill] sm:$0xff] }
 0xc5b   :  { %3558 = vmatmul.mubr.f32.vlgmr.msra.gmra.mrb[22].mxu1 %v3347_v39  ;;  %v12534_v39 = vld [vmem:[#allocation169_spill] sm:$0xff] }
 0xc5c   :  { %6486 = vmatpush3.bf16.msra.mxu1 %v12509_v52  ;;  %v12535_v52 = vld [vmem:[#allocation170_spill] sm:$0xff] }
 0xc5d   :  { %6488 = vmatprep.subr.bf16.mxu1 %v12510_v4  ;;  %v12536_v4 = vld [vmem:[#allocation171_spill] sm:$0xff] }
 0xc60   :  { %6490 = vmatpush3.bf16.msra.mxu1 %v12511_v54  ;;  %v12537_v54 = vld [vmem:[#allocation172_spill] sm:$0xff] }
 0xc61   :  { %6492 = vmatprep.subr.bf16.mxu1 %v12512_v28  ;;  %v12538_v28 = vld [vmem:[#allocation173_spill] sm:$0xff] }
 0xc64   :  { %6494 = vmatpush3.bf16.msra.mxu1 %v12513_v36  ;;  %v12539_v36 = vld [vmem:[#allocation174_spill] sm:$0xff] }
 0xc65   :  { %6496 = vmatprep.subr.bf16.mxu1 %v12514_v7  ;;  %v12540_v7 = vld [vmem:[#allocation175_spill] sm:$0xff] }
 0xc68   :  { %6498 = vmatpush3.bf16.msra.mxu1 %v12515_v53  ;;  %v12541_v53 = vld [vmem:[#allocation176_spill] sm:$0xff] }
 0xc69   :  { %6500 = vmatprep.subr.bf16.mxu1 %v12516_v45 }
 0xc6c   :  { %6502 = vmatpush3.bf16.msra.mxu1 %v12517_v32 }
 0xc6d   :  { %6504 = vmatprep.subr.bf16.mxu1 %v12518_v63 }
 0xc70   :  { %6506 = vmatpush3.bf16.msra.mxu1 %v12519_v19 }
 0xc71   :  { %6508 = vmatprep.subr.bf16.mxu1 %v12520_v48 }
 0xc74   :  { %6510 = vmatpush3.bf16.msra.mxu1 %v12521_v16 }
 0xc75   :  { %6512 = vmatprep.subr.bf16.mxu1 %v12522_v43 }
 0xc78   :  { %6514 = vmatpush3.bf16.msra.mxu1 %v12523_v0 }
 0xc79   :  { %6557 = vmatprep.subr.bf16.mxu1 %v12524_v29 }
 0xc7e   :  { %v3267_v33 = vpop.f32.mrb[34].mxu0 }
 0xc7f   :  { %v3269_v46 = vpop.f32.mrb[35].mxu0  ;;  %v3349_v51 = vmul.f32 %v3267_v33, %v7349_v30 }
 0xc80   :  { %v3350_v47 = vmul.f32 %v3269_v46, %v7349_v30 }
 0xc82   :  { %3627 = vmatprep.mubr.f32.mxu0 %v3350_v47 }
 0xc83   :  { %3628 = vmatmul.mubr.f32.vlgmr.msra.gmra.mrb[42].mxu0 %v3349_v51 }
 0xc84   :  { %6517 = vmatpush3.bf16.msra.mxu0 %v12525_v60  ;;  %5239 = vmatprep.mubr.msk.f32.mxu0 %vm7056_vm0, %v12150_v35 }
 0xc85   :  { %6518 = vmatprep.subr.bf16.mxu0 %v12146_v14 }
 0xc88   :  { %6520 = vmatpush3.bf16.msra.mxu0 %v12526_v61 }
 0xc89   :  { %6521 = vmatprep.subr.bf16.mxu0 %v12146_v14 }
 0xc8c   :  { %6523 = vmatpush3.bf16.msra.mxu0 %v12527_v10 }
 0xc8d   :  { %6524 = vmatprep.subr.bf16.mxu0 %v12146_v14 }
 0xc90   :  { %6526 = vmatpush3.bf16.msra.mxu0 %v12528_v23 }
 0xc91   :  { %6527 = vmatprep.subr.bf16.mxu0 %v12146_v14 }
 0xc94   :  { %6529 = vmatpush3.bf16.msra.mxu0 %v12529_v22 }
 0xc95   :  { %6532 = vmatprep.subr.msk.bf16.mxu0 %vm9300_vm9, %v12530_v58 }
 0xca6   :  { %v3338_v26 = vpop.f32.mrb[36].mxu0 }
 0xca7   :  { %v3340_v3 = vpop.f32.mrb[37].mxu0  ;;  %v3351_v40 = vmul.f32 %v3338_v26, %v7349_v30  ;;  %v12542_v26 = vld [vmem:[#allocation162_spill] sm:$0xff] }
 0xca8   :  { %v3352_v1 = vmul.f32 %v3340_v3, %v7349_v30 }
 0xcaa   :  { %3697 = vmatprep.mubr.f32.mxu1 %v3352_v1 }
 0xcab   :  { %3698 = vmatmul.mubr.f32.vlgmr.msra.gmra.mrb[24].mxu1 %v3351_v40 }
 0xcac   :  { %6559 = vmatpush1.bf16.msra.mxu1 %v12532_v57  ;;  %3994 = vmatprep.mubr.f32.mxu1 %v12150_v35 }
 0xcad   :  { %6561 = vmatprep.subr.bf16.mxu1 %v12533_v13 }
 0xcb0   :  { %6563 = vmatpush1.bf16.msra.mxu1 %v12534_v39 }
 0xcb1   :  { %6565 = vmatprep.subr.bf16.mxu1 %v12535_v52  ;;  %v12543_v52 = vld [vmem:[#allocation177_spill] sm:$0xff] }
 0xcb4   :  { %6567 = vmatpush1.bf16.msra.mxu1 %v12536_v4  ;;  %v12544_v4 = vld [vmem:[#allocation178_spill] sm:$0xff] }
 0xcb5   :  { %6569 = vmatprep.subr.bf16.mxu1 %v12537_v54  ;;  %v12545_v54 = vld [vmem:[#allocation188_spill] sm:$0xff] }
 0xcb8   :  { %6571 = vmatpush1.bf16.msra.mxu1 %v12538_v28  ;;  %v12546_v28 = vld [vmem:[#allocation189_spill] sm:$0xff] }
 0xcb9   :  { %6573 = vmatprep.subr.bf16.mxu1 %v12539_v36  ;;  %v12547_v36 = vld [vmem:[#allocation179_spill] sm:$0xff] }
 0xcbc   :  { %6575 = vmatpush1.bf16.msra.mxu1 %v12540_v7  ;;  %v12548_v7 = vld [vmem:[#allocation180_spill] sm:$0xff] }
 0xcbd   :  { %6597 = vmatprep.subr.bf16.mxu1 %v12541_v53  ;;  %v12549_v53 = vld [vmem:[#allocation181_spill] sm:$0xff] }
 0xcde   :  { %v5023_v45 = vpop.f32.mrb[38].mxu0 }
 0xcdf   :  { %v5024_v32 = vpop.f32.mrb[39].mxu0 }
 0xce0   :  { %v5025_v63 = vadd.f32 %v5024_v32, %v5023_v45  ;;  %v12550_v45 = vld [vmem:[#allocation182_spill] sm:$0xff]  ;;  %v12551_v32 = vld [vmem:[#allocation183_spill] sm:$0xff] }
 0xd06   :  { %v5058_v19 = vpop.f32.mrb[40].mxu0 }
 0xd07   :  { %v5059_v48 = vpop.f32.mrb[41].mxu0 }
 0xd08   :  { %v5060_v16 = vadd.f32 %v5059_v48, %v5058_v19  ;;  %v12553_v19 = vld [vmem:[#allocation185_spill] sm:$0xff]  ;;  %v12555_v48 = vld [vmem:[#allocation231_spill] sm:$0xff] }
 0xd0a   :  { %v3490_v43 = vadd.f32 %v5060_v16, %v5025_v63  ;;  %v12552_v63 = vld [vmem:[#allocation184_spill] sm:$0xff] }
 0xd0b   :  { %v12556_v16 = vld [vmem:[#allocation232_spill] sm:$0xff] }
 0xd2e   :  { %v5093_v0 = vpop.f32.mrb[22].mxu1 }
 0xd2f   :  { %v5094_v29 = vpop.f32.mrb[23].mxu1 }
 0xd30   :  { %v5095_v33 = vadd.f32 %v5094_v29, %v5093_v0  ;;  %v12558_v0 = vld [vmem:[#allocation234_spill] sm:$0xff]  ;;  %v12559_v29 = vld [vmem:[#allocation235_spill] sm:$0xff] }
 0xd32   :  { %v3560_v46 = vadd.f32 %v5095_v33, %v3490_v43  ;;  %v12557_v43 = vld [vmem:[#allocation233_spill] sm:$0xff]  ;;  %v12560_v33 = vld [vmem:[#allocation236_spill] sm:$0xff] }
 0xd56   :  { %v5128_v47 = vpop.f32.mrb[42].mxu0 }
 0xd57   :  { %v5129_v51 = vpop.f32.mrb[43].mxu0 }
 0xd58   :  { %v5130_v60 = vadd.f32 %v5129_v51, %v5128_v47  ;;  %v12562_v47 = vld [vmem:[#allocation238_spill] sm:$0xff]  ;;  %v12563_v51 = vld [vmem:[#allocation239_spill] sm:$0xff] }
 0xd5a   :  { %v3630_v61 = vadd.f32 %v5130_v60, %v3560_v46  ;;  %v12561_v46 = vld [vmem:[#allocation237_spill] sm:$0xff]  ;;  %v12564_v60 = vld [vmem:[#allocation240_spill] sm:$0xff] }
 0xd7e   :  { %v5163_v10 = vpop.f32.mrb[24].mxu1 }
 0xd7f   :  { %v5164_v23 = vpop.f32.mrb[25].mxu1 }
 0xd80   :  { %v5165_v22 = vadd.f32 %v5164_v23, %v5163_v10  ;;  %v12566_v10 = vld [vmem:[#allocation242_spill] sm:$0xff]  ;;  %v12567_v23 = vld [vmem:[#allocation243_spill] sm:$0xff] }
 0xd82   :  { %v3700_v58 = vadd.f32 %v5165_v22, %v3630_v61  ;;  %v12565_v61 = vld [vmem:[#allocation241_spill] sm:$0xff]  ;;  %v12568_v22 = vld [vmem:[#allocation244_spill] sm:$0xff] }
 0xd84   :  { %v3703_v3 = vadd.f32 %v3700_v58, %v12542_v26  ;;  %v12569_v58 = vld [vmem:[#allocation246_spill] sm:$0xff]  ;;  %v12570_v26 = vld [vmem:[#allocation247_spill] sm:$0xff] }
 0xd86   :  { %v3704_v1 = vsel %vm1502_vm6, %v3703_v3, -inf }
 0xd87   :  { %3705 = vmax.xlane.f32.xlu0 %v3704_v1  ;;  %v12572_v1 = vld [vmem:[#allocation252_spill] sm:$0xff] }
 0xe14   :  { %v3706_v40 = vpop.xlane.xlu0 %3705 }
 0xe15   :  { %v3707_v57 = vsub.f32 %v3703_v3, %v3706_v40  ;;  %v12571_v3 = vld [vmem:[#allocation251_spill] sm:$0xff] }
 0xe16   :  { %v12573_v40 = vld [vmem:[#allocation255_spill] sm:$0xff] }
 0xe17   :  { %v3708_v13 = vmul.f32 1.442695, %v3707_v57  ;;  %v12574_v57 = vld [vmem:[#allocation257_spill] sm:$0xff] }
 0xe19   :  { %7023 = vpow2.f32 %v3708_v13  ;;  %v12575_v13 = vld [vmem:[#allocation259_spill] sm:$0xff] }
 0xe23   :  { %v11332_v39 = vpop.eup %7023 }
 0xe24   :  { %5240 = vmatmul.mubr.msk.f32.vlgmr.msra.gmra.mrb[44].mxu0 %vm1502_vm6, %v11332_v39  ;;  %4790 = vmatmul.mubr.msk.f32.vlgmr.msra.gmra.mrb[26].mxu1 %vm1502_vm6, %v11332_v39 }
 0xe25   :  { %6599 = vmatpush1.bf16.msra.mxu1 %v12543_v52  ;;  %4136 = vmatprep.mubr.f32.mxu1 %v12150_v35  ;;  %v12576_v52 = vld [vmem:[#allocation261_spill] sm:$0xff] }
 0xe26   :  { %6601 = vmatprep.subr.bf16.mxu1 %v12544_v4  ;;  %6535 = vmatpush1.bf16.msk.msra.mxu0 %vm9300_vm9, %v12545_v54  ;;  %v12577_v4 = vld [vmem:[#allocation262_spill] sm:$0xff]  ;;  %v12578_v54 = vld [vmem:[#allocation263_spill] sm:$0xff] }
 0xe27   :  { %3852 = vmatprep.mubr.f32.mxu0 %v12150_v35  ;;  %6537 = vmatprep.subr.bf16.mxu0 %v12546_v28  ;;  %v12579_v28 = vld [vmem:[#allocation266_spill] sm:$0xff] }
 0xe29   :  { %6603 = vmatpush1.bf16.msra.mxu1 %v12547_v36  ;;  %v12580_v36 = vld [vmem:[#allocation267_spill] sm:$0xff] }
 0xe2a   :  { %6605 = vmatprep.subr.bf16.mxu1 %v12548_v7  ;;  %v12581_v7 = vld [vmem:[#allocation270_spill] sm:$0xff] }
 0xe2d   :  { %6607 = vmatpush1.bf16.msra.mxu1 %v12549_v53  ;;  %v12582_v53 = vld [vmem:[#allocation271_spill] sm:$0xff] }
 0xe2e   :  { %6609 = vmatprep.subr.bf16.mxu1 %v12550_v45  ;;  %v12583_v45 = vld [vmem:[#allocation274_spill] sm:$0xff] }
 0xe31   :  { %6611 = vmatpush1.bf16.msra.mxu1 %v12551_v32  ;;  %v12584_v32 = vld [vmem:[#allocation275_spill] sm:$0xff] }
 0xe32   :  { %6613 = vmatprep.subr.bf16.mxu1 %v12552_v63  ;;  %v12585_v63 = vld [vmem:[#allocation278_spill] sm:$0xff] }
 0xe35   :  { %6615 = vmatpush1.bf16.msra.mxu1 %v12553_v19  ;;  %v12586_v19 = vld [vmem:[#allocation279_spill] sm:$0xff] }
 0xe36   :  { %6637 = vmatprep.subr.bf16.mxu1 %v12554_v37 }
 0xe38   :  { %4792 = vmatmul.mubr.msk.f32.vlgmr.msra.gmra.mrb[28].mxu1 %vm1502_vm6, %v11332_v39 }
 0xe39   :  { %6639 = vmatpush1.bf16.msra.mxu1 %v12555_v48 }
 0xe3a   :  { %6641 = vmatprep.subr.bf16.mxu1 %v12556_v16 }
 0xe3d   :  { %6643 = vmatpush1.bf16.msra.mxu1 %v12557_v43 }
 0xe3e   :  { %6645 = vmatprep.subr.bf16.mxu1 %v12558_v0 }
 0xe41   :  { %6647 = vmatpush1.bf16.msra.mxu1 %v12559_v29  ;;  %v12587_v29 = vld [vmem:[#allocation201_spill] sm:$0xff] }
 0xe42   :  { %6649 = vmatprep.subr.bf16.mxu1 %v12560_v33  ;;  %v12588_v33 = vld [vmem:[#allocation202_spill] sm:$0xff] }
 0xe45   :  { %6651 = vmatpush1.bf16.msra.mxu1 %v12561_v46  ;;  %v12589_v46 = vld [vmem:[#allocation203_spill] sm:$0xff] }
 0xe46   :  { %6653 = vmatprep.subr.bf16.mxu1 %v12562_v47  ;;  %v12590_v47 = vld [vmem:[#allocation204_spill] sm:$0xff] }
 0xe49   :  { %6655 = vmatpush1.bf16.msra.mxu1 %v12563_v51 }
 0xe4a   :  { %6657 = vmatprep.subr.bf16.mxu1 %v12564_v60  ;;  %v12591_v60 = vld [vmem:[#allocation205_spill] sm:$0xff] }
 0xe4d   :  { %6659 = vmatpush1.bf16.msra.mxu1 %v12565_v61 }
 0xe4e   :  { %6661 = vmatprep.subr.bf16.mxu1 %v12566_v10  ;;  %v12592_v10 = vld [vmem:[#allocation206_spill] sm:$0xff] }
 0xe51   :  { %6663 = vmatpush1.bf16.msra.mxu1 %v12567_v23  ;;  %v12593_v23 = vld [vmem:[#allocation207_spill] sm:$0xff] }
 0xe52   :  { %6665 = vmatprep.subr.bf16.mxu1 %v12568_v22  ;;  %v12594_v22 = vld [vmem:[#allocation208_spill] sm:$0xff] }
 0xe55   :  { %6667 = vmatpush1.bf16.msra.mxu1 %v12569_v58  ;;  %v12595_v58 = vld [vmem:[#allocation209_spill] sm:$0xff] }
 0xe56   :  { %6669 = vmatprep.subr.bf16.mxu1 %v12570_v26  ;;  %v12596_v26 = vld [vmem:[#allocation210_spill] sm:$0xff] }
 0xe59   :  { %6671 = vmatpush1.bf16.msra.mxu1 %v12571_v3  ;;  %v12597_v3 = vld [vmem:[#allocation211_spill] sm:$0xff] }
 0xe5a   :  { %6673 = vmatprep.subr.bf16.mxu1 %v12572_v1  ;;  %v12598_v1 = vld [vmem:[#allocation212_spill] sm:$0xff] }
 0xe5d   :  { %6675 = vmatpush1.bf16.msra.mxu1 %v12573_v40  ;;  %v12599_v40 = vld [vmem:[#allocation213_spill] sm:$0xff] }
 0xe5e   :  { %6677 = vmatprep.subr.bf16.mxu1 %v12574_v57  ;;  %v12600_v57 = vld [vmem:[#allocation214_spill] sm:$0xff] }
 0xe61   :  { %6679 = vmatpush1.bf16.msra.mxu1 %v12575_v13  ;;  %v12601_v13 = vld [vmem:[#allocation215_spill] sm:$0xff] }
 0xe62   :  { %6681 = vmatprep.subr.bf16.mxu1 %v12576_v52  ;;  %v12602_v52 = vld [vmem:[#allocation216_spill] sm:$0xff] }
 0xe65   :  { %6683 = vmatpush1.bf16.msra.mxu1 %v12577_v4  ;;  %v12603_v4 = vld [vmem:[#allocation217_spill] sm:$0xff] }
 0xe66   :  { %6685 = vmatprep.subr.bf16.mxu1 %v12578_v54  ;;  %v12604_v54 = vld [vmem:[#allocation218_spill] sm:$0xff] }
 0xe69   :  { %6687 = vmatpush1.bf16.msra.mxu1 %v12579_v28  ;;  %v12605_v28 = vld [vmem:[#allocation219_spill] sm:$0xff] }
 0xe6a   :  { %6689 = vmatprep.subr.bf16.mxu1 %v12580_v36  ;;  %v12606_v36 = vld [vmem:[#allocation220_spill] sm:$0xff] }
 0xe6d   :  { %6691 = vmatpush1.bf16.msra.mxu1 %v12581_v7  ;;  %v12607_v7 = vld [vmem:[#allocation221_spill] sm:$0xff] }
 0xe6e   :  { %6693 = vmatprep.subr.bf16.mxu1 %v12582_v53  ;;  %v12608_v53 = vld [vmem:[#allocation222_spill] sm:$0xff] }
 0xe71   :  { %6695 = vmatpush1.bf16.msra.mxu1 %v12583_v45  ;;  %v12609_v45 = vld [vmem:[#allocation223_spill] sm:$0xff] }
 0xe72   :  { %6697 = vmatprep.subr.bf16.mxu1 %v12584_v32  ;;  %v12610_v32 = vld [vmem:[#allocation224_spill] sm:$0xff] }
 0xe75   :  { %6699 = vmatpush1.bf16.msra.mxu1 %v12585_v63  ;;  %v12611_v63 = vld [vmem:[#allocation225_spill] sm:$0xff] }
 0xe76   :  { %6701 = vmatprep.subr.bf16.mxu1 %v12586_v19  ;;  %v12612_v19 = vld [vmem:[#allocation226_spill] sm:$0xff] }
 0xef7   :  { %v3779_v37 = vpop.f32.mrb[44].mxu0  ;;  %v11388_v48 = vpop.f32.mrb[26].mxu1 }
 0xef8   :  { %7025 = vrcp.f32 %v3779_v37  ;;  %v5241_v16 = vpop.f32.mrb[45].mxu0  ;;  %v11390_v43 = vpop.f32.mrb[27].mxu1  ;;  %v12613_v37 = vld [vmem:[#allocation227_spill] sm:$0xff] }
 0xef9   :  { %v12614_v16 = vld [vmem:[#allocation228_spill] sm:$0xff] }
 0xf02   :  { %v7026_v0 = vpop.eup %7025 }
 0xf03   :  { %4788 = vmatmul.mubr.msk.f32.vlgmr.msra.gmra.mrb[46].mxu0 %vm1598_vm10, %v7026_v0  ;;  %v12615_v0 = vld [vmem:[#allocation229_spill] sm:$0xff] }
 0xf04   :  { %6539 = vmatpush1.bf16.msra.mxu0 %v12587_v29  ;;  %3923 = vmatprep.mubr.f32.mxu0 %v12150_v35  ;;  %v12622_v29 = vld [vmem:[#allocation291_spill] sm:$0xff] }
 0xf05   :  { %6541 = vmatprep.subr.bf16.mxu0 %v12588_v33  ;;  %v12623_v33 = vld [vmem:[#allocation292_spill] sm:$0xff] }
 0xf08   :  { %6543 = vmatpush1.bf16.msra.mxu0 %v12589_v46 }
 0xf09   :  { %6545 = vmatprep.subr.bf16.mxu0 %v12590_v47  ;;  %v12624_v47 = vld [vmem:[#allocation293_spill] sm:$0xff] }
 0xf0b   :  { %v11398_v51 = vpop.f32.mrb[28].mxu1 }
 0xf0c   :  { %6547 = vmatpush1.bf16.msra.mxu0 %v12591_v60  ;;  %v11401_v61 = vpop.f32.mrb[29].mxu1  ;;  %v12625_v60 = vld [vmem:[#allocation294_spill] sm:$0xff] }
 0xf0d   :  { %6549 = vmatprep.subr.bf16.mxu0 %v12592_v10  ;;  %v12626_v10 = vld [vmem:[#allocation296_spill] sm:$0xff] }
 0xf10   :  { %6551 = vmatpush1.bf16.msra.mxu0 %v12593_v23  ;;  %v12627_v23 = vld [vmem:[#allocation298_spill] sm:$0xff] }
 0xf11   :  { %6553 = vmatprep.subr.bf16.mxu0 %v12594_v22  ;;  %v12628_v22 = vld [vmem:[#allocation300_spill] sm:$0xff] }
 0xf14   :  { %6555 = vmatpush1.bf16.msra.mxu0 %v12595_v58  ;;  %v12629_v58 = vld [vmem:[#allocation302_spill] sm:$0xff] }
 0xf15   :  { %6577 = vmatprep.subr.bf16.mxu0 %v12596_v26  ;;  %v12630_v26 = vld [vmem:[#allocation304_spill] sm:$0xff] }
 0xf17   :  { %4789 = vmatmul.mubr.msk.f32.vlgmr.msra.gmra.mrb[48].mxu0 %vm1502_vm6, %v11332_v39 }
 0xf18   :  { %6579 = vmatpush1.bf16.msra.mxu0 %v12597_v3  ;;  %4065 = vmatprep.mubr.f32.mxu0 %v12150_v35  ;;  %v12631_v3 = vld [vmem:[#allocation306_spill] sm:$0xff] }
 0xf19   :  { %6581 = vmatprep.subr.bf16.mxu0 %v12598_v1  ;;  %v12632_v1 = vld [vmem:[#allocation308_spill] sm:$0xff] }
 0xf1c   :  { %6583 = vmatpush1.bf16.msra.mxu0 %v12599_v40 }
 0xf1d   :  { %6585 = vmatprep.subr.bf16.mxu0 %v12600_v57  ;;  %v12633_v57 = vld [vmem:[#allocation310_spill] sm:$0xff] }
 0xf20   :  { %6587 = vmatpush1.bf16.msra.mxu0 %v12601_v13  ;;  %v12634_v13 = vld [vmem:[#allocation312_spill] sm:$0xff] }
 0xf21   :  { %6589 = vmatprep.subr.bf16.mxu0 %v12602_v52  ;;  %v12635_v52 = vld [vmem:[#allocation314_spill] sm:$0xff] }
 0xf24   :  { %6591 = vmatpush1.bf16.msra.mxu0 %v12603_v4  ;;  %v12636_v4 = vld [vmem:[#allocation316_spill] sm:$0xff] }
 0xf25   :  { %6593 = vmatprep.subr.bf16.mxu0 %v12604_v54  ;;  %v12637_v54 = vld [vmem:[#allocation318_spill] sm:$0xff] }
 0xf28   :  { %6595 = vmatpush1.bf16.msra.mxu0 %v12605_v28  ;;  %v12638_v28 = vld [vmem:[#allocation320_spill] sm:$0xff] }
 0xf29   :  { %6617 = vmatprep.subr.bf16.mxu0 %v12606_v36  ;;  %v12639_v36 = vld [vmem:[#allocation322_spill] sm:$0xff] }
 0xf2b   :  { %4791 = vmatmul.mubr.msk.f32.vlgmr.msra.gmra.mrb[50].mxu0 %vm1502_vm6, %v11332_v39 }
 0xf2c   :  { %6619 = vmatpush1.bf16.msra.mxu0 %v12607_v7  ;;  %4207 = vmatprep.mubr.f32.mxu0 %v12150_v35  ;;  %v12640_v7 = vld [vmem:[#allocation324_spill] sm:$0xff] }
 0xf2d   :  { %6621 = vmatprep.subr.bf16.mxu0 %v12608_v53  ;;  %v4216_v53 = vmul.f32 %v11388_v48, %v7349_v30  ;;  %v12649_v48 = vld [vmem:[#allocation198_spill] sm:$0xff] }
 0xf30   :  { %6623 = vmatpush1.bf16.msra.mxu0 %v12609_v45  ;;  %v12641_v45 = vld [vmem:[#allocation190_spill] sm:$0xff] }
 0xf31   :  { %6625 = vmatprep.subr.bf16.mxu0 %v12610_v32 }
 0xf34   :  { %6627 = vmatpush1.bf16.msra.mxu0 %v12611_v63  ;;  %v12642_v63 = vld [vmem:[#allocation191_spill] sm:$0xff] }
 0xf35   :  { %6629 = vmatprep.subr.bf16.mxu0 %v12612_v19  ;;  %v12648_v19 = vld [vmem:[#allocation197_spill] sm:$0xff] }
 0xf38   :  { %6631 = vmatpush1.bf16.msra.mxu0 %v12613_v37  ;;  %v12650_v37 = vld [vmem:[#allocation199_spill] sm:$0xff] }
 0xf39   :  { %6633 = vmatprep.subr.bf16.mxu0 %v12614_v16  ;;  %v12651_v16 = vld [vmem:[#allocation200_spill] sm:$0xff] }
 0xf3c   :  { %6635 = vmatpush1.bf16.msra.mxu0 %v12615_v0  ;;  %v12652_v0 = vld [vmem:[#allocation245_spill] sm:$0xff] }
 0xf3d   :  { %6956 = vmatprep.subr.bf16.mxu0 %v12146_v14 }
 0xf3f   :  { %4793 = vmatmul.mubr.msk.f32.vlgmr.msra.gmra.mrb[52].mxu0 %vm1502_vm6, %v11332_v39  ;;  %v12621_v39 = vld [vmem:[#allocation290_spill] sm:$0xff] }
 0xf40   :  { %6958 = vmatpush1.bf16.msra.mxu0 %v7265_v2 }
 0xf41   :  { %6959 = vmatprep.subr.bf16.mxu0 %v12146_v14 }
 0xf44   :  { %6961 = vmatpush1.bf16.msra.mxu0 %v7271_v5 }
 0xf45   :  { %6962 = vmatprep.subr.bf16.mxu0 %v12146_v14 }
 0xf48   :  { %6964 = vmatpush1.bf16.msra.mxu0 %v7281_v9 }
 0xf49   :  { %6965 = vmatprep.subr.bf16.mxu0 %v12146_v14 }
 0xf4c   :  { %6967 = vmatpush1.bf16.msra.mxu0 %v7291_v12 }
 0xf4d   :  { %6968 = vmatprep.subr.bf16.mxu0 %v12146_v14 }
 0xf50   :  { %6970 = vmatpush1.bf16.msra.mxu0 %v7301_v15 }
 0xf51   :  { %6971 = vmatprep.subr.bf16.mxu0 %v12146_v14 }
 0xf54   :  { %6973 = vmatpush1.bf16.msra.mxu0 %v7311_v18 }
 0xf55   :  { %6974 = vmatprep.subr.bf16.mxu0 %v12146_v14 }
 0xf58   :  { %6976 = vmatpush1.bf16.msra.mxu0 %v7321_v21  ;;  %v4217_v21 = vmul.f32 %v11390_v43, %v7349_v30 }
 0xf59   :  { %6977 = vmatprep.subr.bf16.mxu0 %v12146_v14 }
 0xf5c   :  { %6979 = vmatpush1.bf16.msra.mxu0 %v7331_v24  ;;  %v12616_v24 = vld [vmem:[#allocation285_spill] sm:$0xff] }
 0xf5d   :  { %6980 = vmatprep.subr.bf16.mxu0 %v12146_v14 }
 0xf60   :  { %6982 = vmatpush1.bf16.msra.mxu0 %v7341_v27  ;;  %v12617_v27 = vld [vmem:[#allocation286_spill] sm:$0xff] }
 0xf61   :  { %6983 = vmatprep.subr.bf16.mxu0 %v12146_v14  ;;  %v12620_v14 = vld [vmem:[#allocation289_spill] sm:$0xff] }
 0xf64   :  { %6985 = vmatpush1.bf16.msra.mxu0 %v7359_v34  ;;  %v12618_v34 = vld [vmem:[#allocation287_spill] sm:$0xff] }
 0xf65   :  { %6987 = vmatprep.subr.bf16.mxu0 %v7380_v42  ;;  %v12619_v42 = vld [vmem:[#allocation288_spill] sm:$0xff] }
 0xfd6   :  { %v11456_v2 = vpop.f32.mrb[46].mxu0 }
 0xfd7   :  { %v11458_v5 = vpop.f32.mrb[47].mxu0 }
 0xfea   :  { %v3925_v9 = vpop.f32.mrb[48].mxu0 }
 0xfeb   :  { %v3927_v12 = vpop.f32.mrb[49].mxu0  ;;  %v4214_v18 = vmul.f32 %v3925_v9, %v7349_v30  ;;  %v12653_v9 = vld [vmem:[#allocation248_spill] sm:$0xff] }
 0xfec   :  { %v4215_v15 = vmul.f32 %v3927_v12, %v7349_v30  ;;  %v12654_v12 = vld [vmem:[#allocation249_spill] sm:$0xff] }
 0xfee   :  { %4288 = vmatprep.mubr.f32.mxu1 %v4215_v15  ;;  %v12655_v15 = vld [vmem:[#allocation250_spill] sm:$0xff] }
 0xfef   :  { %4289 = vmatmul.mubr.f32.vlgmr.msra.gmra.mrb[30].mxu1 %v4214_v18  ;;  %v12656_v18 = vld [vmem:[#allocation253_spill] sm:$0xff] }
 0xff0   :  { %6703 = vmatpush1.bf16.msra.mxu1 %v12616_v24  ;;  %4359 = vmatprep.mubr.f32.mxu1 %v4217_v21  ;;  %v12657_v21 = vld [vmem:[#allocation254_spill] sm:$0xff]  ;;  %v12658_v24 = vld [vmem:[#allocation256_spill] sm:$0xff] }
 0xff1   :  { %6705 = vmatprep.subr.bf16.mxu1 %v12617_v27  ;;  %v12659_v27 = vld [vmem:[#allocation258_spill] sm:$0xff] }
 0xff4   :  { %6707 = vmatpush1.bf16.msra.mxu1 %v12618_v34  ;;  %v12660_v34 = vld [vmem:[#allocation260_spill] sm:$0xff] }
 0xff5   :  { %6709 = vmatprep.subr.bf16.mxu1 %v12619_v42  ;;  %v12661_v42 = vld [vmem:[#allocation264_spill] sm:$0xff] }
 0xff8   :  { %6711 = vmatpush1.bf16.msra.mxu1 %v12620_v14  ;;  %v12662_v14 = vld [vmem:[#allocation265_spill] sm:$0xff] }
 0xff9   :  { %6713 = vmatprep.subr.bf16.mxu1 %v12621_v39  ;;  %v12663_v39 = vld [vmem:[#allocation268_spill] sm:$0xff] }
 0xffc   :  { %6715 = vmatpush1.bf16.msra.mxu1 %v12622_v29  ;;  %v12664_v29 = vld [vmem:[#allocation269_spill] sm:$0xff] }
 0xffd   :  { %6717 = vmatprep.subr.bf16.mxu1 %v12623_v33  ;;  %v12665_v33 = vld [vmem:[#allocation272_spill] sm:$0xff] }
 0xffe   :  { %v11472_v43 = vpop.f32.mrb[50].mxu0 }
 0xfff   :  { %v4069_v46 = vpop.f32.mrb[51].mxu0 }
0x1000   :  { %6719 = vmatpush1.bf16.msra.mxu1 %v10288_v31  ;;  %v4219_v32 = vmul.f32 %v4069_v46, %v7349_v30  ;;  %v12666_v46 = vld [vmem:[#allocation273_spill] sm:$0xff] }
0x1001   :  { %6721 = vmatprep.subr.bf16.mxu1 %v12624_v47  ;;  %v12667_v47 = vld [vmem:[#allocation276_spill] sm:$0xff] }
0x1004   :  { %6723 = vmatpush1.bf16.msra.mxu1 %v12625_v60  ;;  %v12668_v60 = vld [vmem:[#allocation277_spill] sm:$0xff] }
0x1005   :  { %6725 = vmatprep.subr.bf16.mxu1 %v12626_v10  ;;  %v12669_v10 = vld [vmem:[#allocation280_spill] sm:$0xff] }
0x1008   :  { %6727 = vmatpush1.bf16.msra.mxu1 %v12627_v23  ;;  %v12670_v23 = vld [vmem:[#allocation281_spill] sm:$0xff] }
0x1009   :  { %6729 = vmatprep.subr.bf16.mxu1 %v12628_v22  ;;  %v12671_v22 = vld [vmem:[#allocation282_spill] sm:$0xff] }
0x100c   :  { %6731 = vmatpush1.bf16.msra.mxu1 %v12629_v58  ;;  %v12672_v58 = vld [vmem:[#allocation283_spill] sm:$0xff] }
0x100d   :  { %6733 = vmatprep.subr.bf16.mxu1 %v12630_v26  ;;  %v4218_v26 = vmul.f32 %v11472_v43, %v7349_v30  ;;  %v12680_v43 = vld [vmem:[#allocation307_spill] sm:$0xff] }
0x1010   :  { %6735 = vmatpush1.bf16.msra.mxu1 %v12631_v3  ;;  %v12673_v3 = vld [vmem:[#allocation284_spill] sm:$0xff] }
0x1011   :  { %6737 = vmatprep.subr.bf16.mxu1 %v12632_v1  ;;  %v4221_v1 = vmul.f32 %v11401_v61, %v7349_v30  ;;  %v12683_v61 = vld [vmem:[#allocation313_spill] sm:$0xff] }
0x1012   :  { %v11484_v40 = vpop.f32.mrb[52].mxu0 }
0x1013   :  { %v11486_v31 = vpop.f32.mrb[53].mxu0 }
0x1014   :  { %6739 = vmatpush1.bf16.msra.mxu1 %v12633_v57  ;;  %v12674_v57 = vld [vmem:[#allocation295_spill] sm:$0xff] }
0x1015   :  { %6741 = vmatprep.subr.bf16.mxu1 %v12634_v13  ;;  %v12675_v13 = vld [vmem:[#allocation297_spill] sm:$0xff] }
0x1018   :  { %6743 = vmatpush1.bf16.msra.mxu1 %v12635_v52  ;;  %v12676_v52 = vld [vmem:[#allocation299_spill] sm:$0xff] }
0x1019   :  { %6745 = vmatprep.subr.bf16.mxu1 %v12636_v4  ;;  %v12677_v4 = vld [vmem:[#allocation301_spill] sm:$0xff] }
0x101c   :  { %6747 = vmatpush1.bf16.msra.mxu1 %v12637_v54  ;;  %v12678_v54 = vld [vmem:[#allocation303_spill] sm:$0xff] }
0x101d   :  { %6749 = vmatprep.subr.bf16.mxu1 %v12638_v28  ;;  %v12679_v28 = vld [vmem:[#allocation305_spill] sm:$0xff] }
0x1020   :  { %6751 = vmatpush1.bf16.msra.mxu1 %v12639_v36  ;;  %v12681_v36 = vld [vmem:[#allocation309_spill] sm:$0xff] }
0x1021   :  { %6753 = vmatprep.subr.bf16.mxu1 %v12640_v7  ;;  %v12682_v7 = vld [vmem:[#allocation311_spill] sm:$0xff] }
0x1024   :  { %6755 = vmatpush1.bf16.msra.mxu1 %v10613_v6  ;;  %v12643_v6 = vld [vmem:[#allocation192_spill] sm:$0xff] }
0x1025   :  { %6757 = vmatprep.subr.bf16.mxu1 %v10625_v38  ;;  %v12644_v38 = vld [vmem:[#allocation193_spill] sm:$0xff] }
0x1028   :  { %6759 = vmatpush1.bf16.msra.mxu1 %v10649_v8  ;;  %v12645_v8 = vld [vmem:[#allocation194_spill] sm:$0xff] }
0x1029   :  { %6761 = vmatprep.subr.bf16.mxu1 %v10658_v20  ;;  %v12646_v20 = vld [vmem:[#allocation195_spill] sm:$0xff] }
0x102c   :  { %6763 = vmatpush1.bf16.msra.mxu1 %v10679_v17  ;;  %v12647_v17 = vld [vmem:[#allocation196_spill] sm:$0xff] }
0x102d   :  { %6765 = vmatprep.subr.bf16.mxu1 %v12641_v45  ;;  %v12685_v45 = vld [vmem:[#allocation317_spill] sm:$0xff] }
0x102f   :  { %4360 = vmatmul.mubr.f32.vlgmr.msra.gmra.mrb[30].mxu1 %v4216_v53  ;;  %v12684_v53 = vld [vmem:[#allocation315_spill] sm:$0xff] }
0x1030   :  { %6767 = vmatpush1.bf16.msra.mxu1 %v12642_v63  ;;  %4430 = vmatprep.mubr.f32.mxu1 %v4219_v32  ;;  %v12686_v32 = vld [vmem:[#allocation319_spill] sm:$0xff]  ;;  %v12687_v63 = vld [vmem:[#allocation321_spill] sm:$0xff] }
0x1031   :  { %6769 = vmatprep.subr.bf16.mxu1 %v12643_v6  ;;  %v12688_v6 = vld [vmem:[#allocation323_spill] sm:$0xff] }
0x1034   :  { %6771 = vmatpush1.bf16.msra.mxu1 %v12644_v38  ;;  %v12689_v38 = vld [vmem:[#allocation325_spill] sm:$0xff] }
0x1035   :  { %6773 = vmatprep.subr.bf16.mxu1 %v12645_v8  ;;  %v12690_v8 = vld [vmem:[#allocation326_spill] sm:$0xff] }
0x1038   :  { %6775 = vmatpush1.bf16.msra.mxu1 %v12646_v20  ;;  %v12691_v20 = vld [vmem:[#allocation327_spill] sm:$0xff] }
0x1039   :  { %6777 = vmatprep.subr.bf16.mxu1 %v12647_v17  ;;  %v12692_v17 = vld [vmem:[#allocation328_spill] sm:$0xff] }
0x103c   :  { %6779 = vmatpush1.bf16.msra.mxu1 %v12648_v19  ;;  %v12693_v19 = vld [vmem:[#allocation329_spill] sm:$0xff] }
0x103d   :  { %6781 = vmatprep.subr.bf16.mxu1 %v12649_v48  ;;  %v12694_v48 = vld [vmem:[#allocation330_spill] sm:$0xff] }
0x1040   :  { %6783 = vmatpush1.bf16.msra.mxu1 %v12650_v37  ;;  %v12695_v37 = vld [vmem:[#allocation331_spill] sm:$0xff] }
0x1041   :  { %6785 = vmatprep.subr.bf16.mxu1 %v12651_v16  ;;  %v12696_v16 = vld [vmem:[#allocation332_spill] sm:$0xff] }
0x1044   :  { %6787 = vmatpush1.bf16.msra.mxu1 %v12652_v0  ;;  %v12697_v0 = vld [vmem:[#allocation333_spill] sm:$0xff] }
0x1045   :  { %6789 = vmatprep.subr.bf16.mxu1 %v12653_v9  ;;  %v12698_v9 = vld [vmem:[#allocation334_spill] sm:$0xff] }
0x1048   :  { %6791 = vmatpush1.bf16.msra.mxu1 %v12654_v12  ;;  %v12699_v12 = vld [vmem:[#allocation335_spill] sm:$0xff] }
0x1049   :  { %6793 = vmatprep.subr.bf16.mxu1 %v12655_v15  ;;  %v12700_v15 = vld [vmem:[#allocation336_spill] sm:$0xff] }
0x104c   :  { %6795 = vmatpush1.bf16.msra.mxu1 %v12656_v18  ;;  %v12702_v18 = vld [vmem:[#allocation338_spill] sm:$0xff] }
0x104d   :  { %6797 = vmatprep.subr.bf16.mxu1 %v12657_v21  ;;  %v4223_v21 = vmul.f32 %v11486_v31, %v7349_v30  ;;  %v12711_v31 = vld [vmem:[#allocation347_spill] sm:$0xff] }
0x1050   :  { %6799 = vmatpush1.bf16.msra.mxu1 %v12658_v24  ;;  %v12703_v24 = vld [vmem:[#allocation339_spill] sm:$0xff] }
0x1051   :  { %6801 = vmatprep.subr.bf16.mxu1 %v12659_v27  ;;  %v12704_v27 = vld [vmem:[#allocation340_spill] sm:$0xff] }
0x1054   :  { %6803 = vmatpush1.bf16.msra.mxu1 %v12660_v34  ;;  %v12705_v34 = vld [vmem:[#allocation341_spill] sm:$0xff] }
0x1055   :  { %6805 = vmatprep.subr.bf16.mxu1 %v12661_v42  ;;  %v12706_v42 = vld [vmem:[#allocation342_spill] sm:$0xff] }
0x1058   :  { %6807 = vmatpush1.bf16.msra.mxu1 %v12662_v14  ;;  %v12709_v14 = vld [vmem:[#allocation345_spill] sm:$0xff] }
0x1059   :  { %6809 = vmatprep.subr.bf16.mxu1 %v12663_v39  ;;  %v12710_v39 = vld [vmem:[#allocation346_spill] sm:$0xff] }
0x105c   :  { %6811 = vmatpush1.bf16.msra.mxu1 %v12664_v29  ;;  %v12713_v29 = vld [vmem:[#allocation349_spill] sm:$0xff] }
0x105d   :  { %6813 = vmatprep.subr.bf16.mxu1 %v12665_v33  ;;  %v12714_v33 = vld [vmem:[#allocation350_spill] sm:$0xff] }
0x1060   :  { %6815 = vmatpush1.bf16.msra.mxu1 %v12666_v46  ;;  %v12715_v46 = vld [vmem:[#allocation351_spill] sm:$0xff] }
0x1061   :  { %6817 = vmatprep.subr.bf16.mxu1 %v12667_v47  ;;  %v12716_v47 = vld [vmem:[#allocation352_spill] sm:$0xff] }
0x1064   :  { %6819 = vmatpush1.bf16.msra.mxu1 %v12668_v60  ;;  %v12717_v60 = vld [vmem:[#allocation353_spill] sm:$0xff] }
0x1065   :  { %6821 = vmatprep.subr.bf16.mxu1 %v12669_v10  ;;  %v12718_v10 = vld [vmem:[#allocation354_spill] sm:$0xff] }
0x1068   :  { %6823 = vmatpush1.bf16.msra.mxu1 %v12670_v23  ;;  %v12719_v23 = vld [vmem:[#allocation355_spill] sm:$0xff] }
0x1069   :  { %6825 = vmatprep.subr.bf16.mxu1 %v12671_v22  ;;  %v12720_v22 = vld [vmem:[#allocation356_spill] sm:$0xff] }
0x106c   :  { %6827 = vmatpush1.bf16.msra.mxu1 %v12672_v58  ;;  %v12721_v58 = vld [vmem:[#allocation357_spill] sm:$0xff] }
0x106d   :  { %6829 = vmatprep.subr.bf16.mxu1 %v12673_v3  ;;  %v12723_v3 = vld [vmem:[#allocation359_spill] sm:$0xff] }
0x106f   :  { %4431 = vmatmul.mubr.f32.vlgmr.msra.gmra.mrb[30].mxu1 %v4218_v26  ;;  %v12722_v26 = vld [vmem:[#allocation358_spill] sm:$0xff] }
0x1070   :  { %6831 = vmatpush1.bf16.msra.mxu1 %v12674_v57  ;;  %4501 = vmatprep.mubr.f32.mxu1 %v4221_v1  ;;  %v12724_v1 = vld [vmem:[#allocation360_spill] sm:$0xff]  ;;  %v12725_v57 = vld [vmem:[#allocation361_spill] sm:$0xff] }
0x1071   :  { %6833 = vmatprep.subr.bf16.mxu1 %v12675_v13  ;;  %v12726_v13 = vld [vmem:[#allocation362_spill] sm:$0xff] }
0x1074   :  { %6835 = vmatpush1.bf16.msra.mxu1 %v12676_v52  ;;  %v12727_v52 = vld [vmem:[#allocation363_spill] sm:$0xff] }
0x1075   :  { %6837 = vmatprep.subr.bf16.mxu1 %v12677_v4  ;;  %v4222_v4 = vmul.f32 %v11484_v40, %v7349_v30 }
0x1078   :  { %6839 = vmatpush1.bf16.msra.mxu1 %v12678_v54 }
0x1079   :  { %6841 = vmatprep.subr.bf16.mxu1 %v12679_v28 }
0x107c   :  { %6843 = vmatpush1.bf16.msra.mxu1 %v12680_v43 }
0x107d   :  { %6845 = vmatprep.subr.bf16.mxu1 %v12681_v36 }
0x1080   :  { %6847 = vmatpush1.bf16.msra.mxu1 %v12682_v7 }
0x1081   :  { %6849 = vmatprep.subr.bf16.mxu1 %v12683_v61 }
0x1084   :  { %6851 = vmatpush1.bf16.msra.mxu1 %v12684_v53 }
0x1085   :  { %6853 = vmatprep.subr.bf16.mxu1 %v12685_v45 }
0x1088   :  { %6855 = vmatpush1.bf16.msra.mxu1 %v12686_v32 }
0x1089   :  { %6857 = vmatprep.subr.bf16.mxu1 %v12687_v63 }
0x108c   :  { %6859 = vmatpush1.bf16.msra.mxu1 %v12688_v6 }
0x108d   :  { %6861 = vmatprep.subr.bf16.mxu1 %v12689_v38 }
0x1090   :  { %6863 = vmatpush1.bf16.msra.mxu1 %v12690_v8 }
0x1091   :  { %6865 = vmatprep.subr.bf16.mxu1 %v12691_v20 }
0x1094   :  { %6867 = vmatpush1.bf16.msra.mxu1 %v10651_v59  ;;  %v12701_v59 = vld [vmem:[#allocation337_spill] sm:$0xff] }
0x1095   :  { %6869 = vmatprep.subr.bf16.mxu1 %v12692_v17 }
0x1098   :  { %6871 = vmatpush1.bf16.msra.mxu1 %v10681_v49  ;;  %v4220_v49 = vmul.f32 %v11398_v51, %v7349_v30  ;;  %v12708_v51 = vld [vmem:[#allocation344_spill] sm:$0xff] }
0x1099   :  { %6873 = vmatprep.subr.bf16.mxu1 %v12693_v19 }
0x109c   :  { %6875 = vmatpush1.bf16.msra.mxu1 %v12694_v48 }
0x109d   :  { %6877 = vmatprep.subr.bf16.mxu1 %v12695_v37 }
0x10a0   :  { %6879 = vmatpush1.bf16.msra.mxu1 %v12696_v16 }
0x10a1   :  { %6881 = vmatprep.subr.bf16.mxu1 %v12697_v0 }
0x10a4   :  { %6883 = vmatpush1.bf16.msra.mxu1 %v12698_v9 }
0x10a5   :  { %6885 = vmatprep.subr.bf16.mxu1 %v12699_v12 }
0x10a8   :  { %6887 = vmatpush1.bf16.msra.mxu1 %v12700_v15 }
0x10a9   :  { %6889 = vmatprep.subr.bf16.mxu1 %v12701_v59 }
0x10ac   :  { %6891 = vmatpush1.bf16.msra.mxu1 %v10782_v11  ;;  %v12707_v11 = vld [vmem:[#allocation343_spill] sm:$0xff] }
0x10ad   :  { %6893 = vmatprep.subr.bf16.mxu1 %v12702_v18 }
0x10af   :  { %4502 = vmatmul.mubr.f32.vlgmr.msra.gmra.mrb[30].mxu1 %v4220_v49 }
0x10b0   :  { %6895 = vmatpush1.bf16.msra.mxu1 %v10802_v55  ;;  %4572 = vmatprep.mubr.f32.mxu1 %v4223_v21  ;;  %v12712_v55 = vld [vmem:[#allocation348_spill] sm:$0xff] }
0x10b1   :  { %6897 = vmatprep.subr.bf16.mxu1 %v12703_v24 }
0x10b4   :  { %6899 = vmatpush1.bf16.msra.mxu1 %v12704_v27 }
0x10b5   :  { %6901 = vmatprep.subr.bf16.mxu1 %v12705_v34 }
0x10b8   :  { %6903 = vmatpush1.bf16.msra.mxu1 %v12706_v42 }
0x10b9   :  { %6905 = vmatprep.subr.bf16.mxu1 %v12707_v11 }
0x10bc   :  { %6907 = vmatpush1.bf16.msra.mxu1 %v12708_v51 }
0x10bd   :  { %6909 = vmatprep.subr.bf16.mxu1 %v12709_v14 }
0x10c0   :  { %6911 = vmatpush1.bf16.msra.mxu1 %v12710_v39 }
0x10c1   :  { %6913 = vmatprep.subr.bf16.mxu1 %v12711_v31 }
0x10c4   :  { %6915 = vmatpush1.bf16.msra.mxu1 %v12712_v55 }
0x10c5   :  { %6917 = vmatprep.subr.bf16.mxu1 %v12713_v29 }
0x10c8   :  { %6919 = vmatpush1.bf16.msra.mxu1 %v12714_v33 }
0x10c9   :  { %6921 = vmatprep.subr.bf16.mxu1 %v12715_v46 }
0x10cc   :  { %6923 = vmatpush1.bf16.msra.mxu1 %v12716_v47 }
0x10cd   :  { %6925 = vmatprep.subr.bf16.mxu1 %v12717_v60 }
0x10d0   :  { %6927 = vmatpush1.bf16.msra.mxu1 %v12718_v10 }
0x10d1   :  { %6929 = vmatprep.subr.bf16.mxu1 %v12719_v23 }
0x10d4   :  { %6931 = vmatpush1.bf16.msra.mxu1 %v12720_v22 }
0x10d5   :  { %6933 = vmatprep.subr.bf16.mxu1 %v12721_v58 }
0x10d8   :  { %6935 = vmatpush1.bf16.msra.mxu1 %v12722_v26 }
0x10d9   :  { %6937 = vmatprep.subr.bf16.mxu1 %v12723_v3 }
0x10dc   :  { %6939 = vmatpush1.bf16.msra.mxu1 %v12724_v1 }
0x10dd   :  { %6941 = vmatprep.subr.bf16.mxu1 %v12725_v57 }
0x10e0   :  { %6943 = vmatpush1.bf16.msra.mxu1 %v12726_v13 }
0x10e1   :  { %6945 = vmatprep.subr.bf16.mxu1 %v12727_v52 }
0x10e4   :  { %6947 = vmatpush1.bf16.msra.mxu1 %v11052_v50 }
0x10e5   :  { %6949 = vmatprep.subr.bf16.mxu1 %v11055_v62 }
0x10e8   :  { %6951 = vmatpush1.bf16.msra.mxu1 %v11070_v41 }
0x10e9   :  { %6953 = vmatprep.subr.bf16.mxu1 %v11073_v56 }
0x10ec   :  { %6955 = vmatpush1.bf16.msra.mxu1 %v11082_v25 }
0x10ef   :  { %4573 = vmatmul.mubr.f32.vlgmr.msra.gmra.mrb[30].mxu1 %v4222_v4 }
0x11c2   :  { %v4574_v54 = vpop.f32.mrb[30].mxu1 }
0x11c3   :  { %v4579_v28 = vmul.f32 %v4574_v54, %v11456_v2  ;;  %v4576_v43 = vpop.f32.mrb[31].mxu1 }
0x11c4   :  { %v4580_v36 = vmul.f32 %v4576_v43, %v11458_v5 }
0x11c5   :  { %v4581_v50 = vmul.f32 %v4579_v28, %v4579_v28 }
0x11c6   :  { %v4582_v7 = vmul.f32 %v4580_v36, %v4580_v36 }
0x11c8   :  { %4794 = vmatprep.mubr.msk.f32.mxu0 %vm257_vm2, %v4582_v7 }
0x11c9   :  { %4651 = vmatmul.mubr.f32.vlgmr.msra.gmra.mrb[54].mxu0 %v4581_v50 }
0x11ca   :  { %6989 = vmatpush1.bf16.msra.mxu0 %v7385_v44  ;;  %4735 = vmatprep.mubr.f32.mxu0 %v12150_v35 }
0x129c   :  { %v4652_v25 = vpop.f32.mrb[54].mxu0 }
0x129d   :  { %7027 = vrsqrt.f32 %v4652_v25  ;;  %v4654_v62 = vpop.f32.mrb[55].mxu0  ;;  %vm4658_vm13 = vcmp.eq.f32.partialorder %v4652_v25, inf  ;;  %v4661_v56 = vand.u32 2147483648, %v4652_v25  ;;  %vm4660_vm14 = vcmp.eq.f32.partialorder %v4652_v25, 0.0 }
0x129e   :  { %v4664_v5 = vadd.f32 1.0, %v4652_v25 }
0x12a7   :  { %v7028_v30 = vpop.eup %7027 }
0x12a8   :  { %v4657_v41 = vmul.f32 %v7028_v30, %v4652_v25 }
0x12aa   :  { %v4659_v2 = vsel %vm4658_vm13, %v4652_v25, %v4657_v41 }
0x12ab   :  { %v4662_v40 = vsel %vm4660_vm14, %v4661_v56, %v4659_v2 }
0x12ac   :  { %v4663_v61 = vadd.f32 1.0, %v4662_v40 }
0x12ae   :  { %v4665_v53 = vmul.f32 %v4664_v5, %v4663_v61 }
0x12b0   :  { %7029 = vrcp.f32 %v4665_v53 }
0x12ba   :  { %v7030_v45 = vpop.eup %7029 }
0x12bb   :  { %v4667_v32 = vmul.f32 %v7030_v45, %v4662_v40 }
0x12bd   :  { %4795 = vmatmul.mubr.msk.f32.vlgmr.msra.gmra.mrb[56].mxu0 %vm347_vm5, %v4667_v32 }
0x1390   :  { %v4737_v44 = vpop.f32.mrb[56].mxu0 }
0x1391   :  { %v4742_v35 = vmul.f32 %v4737_v44, %v4579_v28  ;;  %v4739_v63 = vpop.f32.mrb[57].mxu0 }
0x1392   :  { %v4743_v6 = vmul.f32 %v4739_v63, %v4580_v36 }
0x1393   :  { %4744 = vst [vmem:[#allocation2] sm:$0xff] %v4742_v35 }
0x1394   :  { %4745 = vst.msk [vmem:[#allocation2 + $0x8] sm:$0xff] %vm257_vm2, %v4743_v6 }
0x1395   :  { %7042 = shalt.err (!%p7039_p4)
}
0x1396   :  { %s7043_s3 = scalar_lea.hbm %s11641_s12, 256 }
0x1397   :  { %p7044_p5 = scmp.ne.s32.totalorder %s11641_s12, %s7043_s3  ;;  %p7047_p6 = scmp.lt.u32.totalorder %s7043_s3, %s11641_s12 }
0x1399   :  { %p7049_p7 = pnand %p7047_p6, %p7044_p5 }
0x139b   :  { %7052 = shalt.err (!%p7049_p7)
}
0x139c   :  { %4755 = dma.vmem_to_hbm [thread:$0]  %s4753_s30, 256, %s11641_s12, [#allocation3]  }
0x139d   :  { %7053 = dma.done.wait [#allocation3], 256  }
0x139e   :  { %7054 = vsyncadd [#allocation3], 4294967040 }
0x139f   :  { %4759 = vsyncpa [#allocation3], 1 }

</bundles_post_ra>
